<compile_context>
chip_gen: v5e
topology: v5e:2x2
jax: 0.10.0
libtpu: 0.0.40
codegen_flags: <defaults>
</compile_context>

<pallas_src>
import functools
import math

import jax
import jax.numpy as jnp
from jax import lax
from jax.experimental import pallas as pl
from jax.experimental.pallas import tpu as pltpu

EPS = 1e-5                      # nn.LayerNorm default eps
_SQRT_HALF = 0.7071067811865476


def _layernorm_f32(x, g, b):
    m = jnp.mean(x, axis=-1, keepdims=True)
    v = jnp.mean((x - m) ** 2, axis=-1, keepdims=True)
    return (x - m) * lax.rsqrt(v + EPS) * g + b


# ----------------------------- Pallas kernel -----------------------------

def ff_kernel(x_ref, g_ref, b_ref, w1_ref, b1_ref, w2_ref, b2_ref, o_ref,
              xn_ref, *, elem_bf16):
    """One (row-tile i, hidden-tile k) step of the fused FeedForward.

    The output block is resident across the k (reduction) axis, so it doubles
    as the f32 accumulator (no separate acc scratch, no extra copy pass).
    """
    k = pl.program_id(1)

    @pl.when(k == 0)
    def _init():
        # LayerNorm once per row tile (f32 math); cache a bf16 copy for the MXU.
        x = x_ref[...].astype(jnp.float32)
        xn = _layernorm_f32(x, g_ref[...], b_ref[...])
        xn_ref[...] = xn.astype(jnp.bfloat16)
        o_ref[...] = jnp.zeros_like(o_ref)

    # Linear1 over this hidden tile: (tm, dim)bf16 @ (dim, th)bf16 -> f32
    h = jnp.dot(xn_ref[...], w1_ref[...],
                preferred_element_type=jnp.float32) + b1_ref[...]

    # Exact (erf) GELU — PyTorch nn.GELU() default.
    if elem_bf16:
        # v6e/v7x: VPU/EUP have bf16 paths -> halves VALU cost & vreg pressure.
        hb = h.astype(jnp.bfloat16)
        h16 = 0.5 * hb * (1.0 + lax.erf(hb * _SQRT_HALF))
    else:
        # v5e: no bf16 VPU/EUP -> keep elementwise math in f32.
        h = 0.5 * h * (1.0 + lax.erf(h * _SQRT_HALF))
        h16 = h.astype(jnp.bfloat16)

    # Linear2 partial sum for this hidden tile, accumulated straight into o_ref (f32).
    o_ref[...] += jnp.dot(h16, w2_ref[...], preferred_element_type=jnp.float32)

    @pl.when(k == pl.num_programs(1) - 1)
    def _finalize():
        o_ref[...] += b2_ref[...]


# ----------------------------- tiling / wrapper -----------------------------

def _round_up(n, m):
    return ((n + m - 1) // m) * m


def _tpu_generation():
    try:
        kind = jax.devices()[0].device_kind.lower()
    except Exception:
        return None
    for tag in ("v7", "v6", "v5"):
        if tag in kind:
            return tag
    return None


def _vmem_estimate(tm, th, dim):
    x_io = 2 * (tm * dim * 4) + 2 * (tm * dim * 4)   # x + out f32, double-buffered
    wts = 2 * (dim * th * 2) + 2 * (th * dim * 2)    # w1 + w2 bf16, double-buffered
    bias = 2 * (th * 4) + 6 * (dim * 4)              # b1 + (gamma, beta, b2)
    xn = tm * dim * 2                                # cached LayerNorm tile (bf16)
    temp = tm * th * 4                               # GELU intermediate
    return x_io + wts + bias + xn + temp


def _choose_tiles(M, dim, hidden, gen):
    if gen == "v7":
        # 64 MiB physical VMEM/TC: leave headroom for compiler-internal scratch.
        vmem_limit = 48 * 1024 * 1024
        tm_target, th_cands = 256, (1024, 512, 256, 128)
    elif gen in ("v5", "v6"):
        # 128 MiB physical VMEM: use it (bigger th => fewer reduction steps).
        vmem_limit = 100 * 1024 * 1024
        tm_target, th_cands = 512, (2048, 1024, 512, 256, 128)
    else:
        vmem_limit = 64 * 1024 * 1024
        tm_target, th_cands = 256, (1024, 512, 256, 128)

    tm = min(tm_target, _round_up(M, 8))               # rows are padded, never "divided"
    th = next((c for c in th_cands if c <= hidden), th_cands[-1])

    budget = int(vmem_limit * 0.8)
    while _vmem_estimate(tm, th, dim) > budget and th > 128:
        th //= 2
    while _vmem_estimate(tm, th, dim) > budget and tm > 64:
        tm = _round_up(tm // 2, 8)
    return tm, th, vmem_limit


def feedforward(x, params):
    """x: (..., dim) float32.  Returns float32 of the same shape."""
    g, b = params["g"], params["b"]
    w1, b1 = params["w1"], params["b1"]
    w2, b2 = params["w2"], params["b2"]
    dim = x.shape[-1]
    hidden = w1.shape[1]
    lead = x.shape[:-1]
    M = math.prod(lead) if lead else 1

    gen = _tpu_generation()
    tm, th, vmem_limit = _choose_tiles(M, dim, hidden, gen)
    elem_bf16 = gen in ("v6", "v7")

    # Pad rows up to a tile multiple (junk rows computed then sliced off) and hidden
    # up to a tile multiple (zero weight cols/rows -> exactly zero contribution).
    M_pad = _round_up(M, tm)
    H_pad = _round_up(hidden, th)

    x2 = x.reshape(M, dim)
    if M_pad != M:
        x2 = jnp.pad(x2, ((0, M_pad - M), (0, 0)))
    if H_pad != hidden:
        w1 = jnp.pad(w1, ((0, 0), (0, H_pad - hidden)))
        b1 = jnp.pad(b1, ((0, 0), (0, H_pad - hidden)))
        w2 = jnp.pad(w2, ((0, H_pad - hidden), (0, 0)))

    grid = (M_pad // tm, H_pad // th)

    out = pl.pallas_call(
        functools.partial(ff_kernel, elem_bf16=elem_bf16),
        grid=grid,
        in_specs=[
            pl.BlockSpec((tm, dim), lambda i, k: (i, 0)),   # x rows
            pl.BlockSpec((1, dim), lambda i, k: (0, 0)),    # LN gamma
            pl.BlockSpec((1, dim), lambda i, k: (0, 0)),    # LN beta
            pl.BlockSpec((dim, th), lambda i, k: (0, k)),   # w1 hidden tile
            pl.BlockSpec((1, th), lambda i, k: (0, k)),     # b1 hidden tile
            pl.BlockSpec((th, dim), lambda i, k: (k, 0)),   # w2 hidden tile
            pl.BlockSpec((1, dim), lambda i, k: (0, 0)),    # b2
        ],
        out_specs=pl.BlockSpec((tm, dim), lambda i, k: (i, 0)),
        out_shape=jax.ShapeDtypeStruct((M_pad, dim), jnp.float32),
        scratch_shapes=[
            pltpu.VMEM((tm, dim), jnp.bfloat16),   # cached LayerNorm(x) tile
        ],
        compiler_params=pltpu.CompilerParams(
            dimension_semantics=("parallel", "arbitrary"),
            vmem_limit_bytes=vmem_limit,
        ),
    )(x2, g, b, w1, b1, w2, b2)

    if M_pad != M:
        out = out[:M]
    return out.reshape(*lead, dim)


# ----------------------------- params & reference -----------------------------

def init_params(key, dim, hidden):
    k1, k2, k3, k4, k5, k6 = jax.random.split(key, 6)
    return {
        "g":  1.0 + 0.1 * jax.random.normal(k1, (1, dim), jnp.float32),
        "b":  0.1 * jax.random.normal(k2, (1, dim), jnp.float32),
        # weights stored bf16 (MXU-native, half the HBM/VMEM footprint)
        "w1": (0.02 * jax.random.normal(k3, (dim, hidden), jnp.float32)
               ).astype(jnp.bfloat16),
        "b1": 0.02 * jax.random.normal(k4, (1, hidden), jnp.float32),
        "w2": (0.02 * jax.random.normal(k5, (hidden, dim), jnp.float32)
               ).astype(jnp.bfloat16),
        "b2": 0.02 * jax.random.normal(k6, (1, dim), jnp.float32),
    }


def feedforward_reference(x, params):
    # pure-JAX f32 reference of the same math (dropout p=0 is identity)
    xn = _layernorm_f32(x, params["g"], params["b"])
    h = xn @ params["w1"].astype(jnp.float32) + params["b1"]
    h = 0.5 * h * (1.0 + lax.erf(h * _SQRT_HALF))
    return h @ params["w2"].astype(jnp.float32) + params["b2"]


if __name__ == "__main__":
    # N=17 -> M=34 exercises the row-padding path; hidden=1536 exercises the
    # hidden-padding path and a multi-step reduction over the hidden grid axis.
    B, N, dim, hidden = 2, 17, 128, 1536
    key = jax.random.PRNGKey(0)
    kx, kp = jax.random.split(key)
    x = jax.random.normal(kx, (B, N, dim), jnp.float32)
    params = init_params(kp, dim, hidden)

    out = feedforward(x, params)
    jax.block_until_ready(out)

    ref = feedforward_reference(x, params)
    assert out.shape == (B, N, dim)
    # bf16 matmul operands (and bf16 GELU chain on v6e/v7x) with f32 accumulation
    assert jnp.allclose(out, ref, atol=1e-2, rtol=1e-2), \
        float(jnp.max(jnp.abs(out - ref)))
    print("KERNEL_OK")
</pallas_src>

<mosaic_0001>
module attributes {stable_mosaic.version = 11 : i64} {
  func.func @ff_kernel(%arg0: i32, %arg1: i32, %arg2: memref<40x128xf32, #tpu.memory_space<vmem>>, %arg3: memref<1x128xf32, #tpu.memory_space<vmem>>, %arg4: memref<1x128xf32, #tpu.memory_space<vmem>>, %arg5: memref<128x1024xbf16, #tpu.memory_space<vmem>>, %arg6: memref<1x1024xf32, #tpu.memory_space<vmem>>, %arg7: memref<1024x128xbf16, #tpu.memory_space<vmem>>, %arg8: memref<1x128xf32, #tpu.memory_space<vmem>>, %arg9: memref<40x128xf32, #tpu.memory_space<vmem>>, %arg10: memref<40x128xbf16, #tpu.memory_space<vmem>>) attributes {dimension_semantics = [#tpu.dimension_semantics<parallel>, #tpu.dimension_semantics<arbitrary>], iteration_bounds = array<i64: 1, 2>, scalar_prefetch = 0 : i64, scratch_operands = 1 : i64, tpu.core_type = #tpu.core_type<tc>, window_params = [{transform_indices = @transform_0, window_bounds = array<i64: 40, 128>}, {pipeline_mode = #tpu.pipeline_mode<synchronous>, transform_indices = @transform_1, window_bounds = array<i64: 1, 128>}, {pipeline_mode = #tpu.pipeline_mode<synchronous>, transform_indices = @transform_2, window_bounds = array<i64: 1, 128>}, {transform_indices = @transform_3, window_bounds = array<i64: 128, 1024>}, {transform_indices = @transform_4, window_bounds = array<i64: 1, 1024>}, {transform_indices = @transform_5, window_bounds = array<i64: 1024, 128>}, {pipeline_mode = #tpu.pipeline_mode<synchronous>, transform_indices = @transform_6, window_bounds = array<i64: 1, 128>}, {transform_indices = @transform_7, window_bounds = array<i64: 40, 128>}]} {
    %c0_i32 = arith.constant 0 : i32
    %0 = arith.cmpi eq, %arg1, %c0_i32 : i32
    %1 = arith.extui %0 : i1 to i32
    %c0_i32_0 = arith.constant 0 : i32
    %2 = arith.cmpi ne, %1, %c0_i32_0 : i32
    scf.if %2 {
      %c0_17 = arith.constant 0 : index
      %c0_18 = arith.constant 0 : index
      %26 = vector.load %arg2[%c0_17, %c0_18] : memref<40x128xf32, #tpu.memory_space<vmem>>, vector<40x128xf32>
      %c0_19 = arith.constant 0 : index
      %c0_20 = arith.constant 0 : index
      %27 = vector.load %arg3[%c0_19, %c0_20] : memref<1x128xf32, #tpu.memory_space<vmem>>, vector<1x128xf32>
      %c0_21 = arith.constant 0 : index
      %c0_22 = arith.constant 0 : index
      %28 = vector.load %arg4[%c0_21, %c0_22] : memref<1x128xf32, #tpu.memory_space<vmem>>, vector<1x128xf32>
      %cst_23 = arith.constant dense<0.000000e+00> : vector<40xf32>
      %29 = vector.multi_reduction <add>, %26, %cst_23 [1] : vector<40x128xf32> to vector<40xf32>
      %30 = vector.shape_cast %29 : vector<40xf32> to vector<40x1xf32>
      %cst_24 = arith.constant 1.280000e+02 : f32
      %31 = vector.broadcast %cst_24 : f32 to vector<40x1xf32>
      %32 = arith.divf %30, %31 : vector<40x1xf32>
      %33 = vector.broadcast %32 : vector<40x1xf32> to vector<40x128xf32>
      %34 = arith.subf %26, %33 : vector<40x128xf32>
      %35 = arith.mulf %34, %34 : vector<40x128xf32>
      %cst_25 = arith.constant dense<0.000000e+00> : vector<40xf32>
      %36 = vector.multi_reduction <add>, %35, %cst_25 [1] : vector<40x128xf32> to vector<40xf32>
      %37 = vector.shape_cast %36 : vector<40xf32> to vector<40x1xf32>
      %cst_26 = arith.constant 1.280000e+02 : f32
      %38 = vector.broadcast %cst_26 : f32 to vector<40x1xf32>
      %39 = arith.divf %37, %38 : vector<40x1xf32>
      %40 = vector.broadcast %32 : vector<40x1xf32> to vector<40x128xf32>
      %41 = arith.subf %26, %40 : vector<40x128xf32>
      %cst_27 = arith.constant 9.99999974E-6 : f32
      %42 = vector.broadcast %cst_27 : f32 to vector<40x1xf32>
      %43 = arith.addf %39, %42 : vector<40x1xf32>
      %44 = math.rsqrt %43 : vector<40x1xf32>
      %45 = vector.broadcast %44 : vector<40x1xf32> to vector<40x128xf32>
      %46 = arith.mulf %41, %45 : vector<40x128xf32>
      %47 = vector.broadcast %27 : vector<1x128xf32> to vector<40x128xf32>
      %48 = arith.mulf %46, %47 : vector<40x128xf32>
      %49 = vector.broadcast %28 : vector<1x128xf32> to vector<40x128xf32>
      %50 = arith.addf %48, %49 : vector<40x128xf32>
      %51 = arith.truncf %50 : vector<40x128xf32> to vector<40x128xbf16>
      %c0_28 = arith.constant 0 : index
      %c0_29 = arith.constant 0 : index
      %52 = vector.load %arg10[%c0_28, %c0_29] : memref<40x128xbf16, #tpu.memory_space<vmem>>, vector<40x128xbf16>
      tpu.vector_store %arg10[%c0_28, %c0_29], %51 {strides = array<i32>} : memref<40x128xbf16, #tpu.memory_space<vmem>>, vector<40x128xbf16>,
      %cst_30 = arith.constant 0.000000e+00 : f32
      %53 = vector.broadcast %cst_30 : f32 to vector<40x128xf32>
      %c0_31 = arith.constant 0 : index
      %c0_32 = arith.constant 0 : index
      %54 = vector.load %arg9[%c0_31, %c0_32] : memref<40x128xf32, #tpu.memory_space<vmem>>, vector<40x128xf32>
      tpu.vector_store %arg9[%c0_31, %c0_32], %53 {strides = array<i32>} : memref<40x128xf32, #tpu.memory_space<vmem>>, vector<40x128xf32>,
    } else {
    }
    %c0 = arith.constant 0 : index
    %c0_1 = arith.constant 0 : index
    %3 = vector.load %arg10[%c0, %c0_1] : memref<40x128xbf16, #tpu.memory_space<vmem>>, vector<40x128xbf16>
    %c0_2 = arith.constant 0 : index
    %c0_3 = arith.constant 0 : index
    %4 = vector.load %arg5[%c0_2, %c0_3] : memref<128x1024xbf16, #tpu.memory_space<vmem>>, vector<128x1024xbf16>
    %cst = arith.constant dense<0.000000e+00> : vector<40x1024xf32>
    %5 = tpu.matmul %3, %4, %cst {dimension_numbers = #tpu.dot_dimension_numbers<[1], [0], [0], [1], [0, 0, 1, 1], [], []>} : vector<40x128xbf16>, vector<128x1024xbf16>, vector<40x1024xf32> -> vector<40x1024xf32>
    %c0_4 = arith.constant 0 : index
    %c0_5 = arith.constant 0 : index
    %6 = vector.load %arg6[%c0_4, %c0_5] : memref<1x1024xf32, #tpu.memory_space<vmem>>, vector<1x1024xf32>
    %7 = vector.broadcast %6 : vector<1x1024xf32> to vector<40x1024xf32>
    %8 = arith.addf %5, %7 : vector<40x1024xf32>
    %cst_6 = arith.constant 5.000000e-01 : f32
    %9 = vector.broadcast %cst_6 : f32 to vector<40x1024xf32>
    %10 = arith.mulf %9, %8 : vector<40x1024xf32>
    %cst_7 = arith.constant 0.707106769 : f32
    %11 = vector.broadcast %cst_7 : f32 to vector<40x1024xf32>
    %12 = arith.mulf %8, %11 : vector<40x1024xf32>
    %13 = math.erf %12 : vector<40x1024xf32>
    %cst_8 = arith.constant 1.000000e+00 : f32
    %14 = vector.broadcast %cst_8 : f32 to vector<40x1024xf32>
    %15 = arith.addf %14, %13 : vector<40x1024xf32>
    %16 = arith.mulf %10, %15 : vector<40x1024xf32>
    %17 = arith.truncf %16 : vector<40x1024xf32> to vector<40x1024xbf16>
    %c0_9 = arith.constant 0 : index
    %c0_10 = arith.constant 0 : index
    %18 = vector.load %arg9[%c0_9, %c0_10] : memref<40x128xf32, #tpu.memory_space<vmem>>, vector<40x128xf32>
    %c0_11 = arith.constant 0 : index
    %c0_12 = arith.constant 0 : index
    %19 = vector.load %arg7[%c0_11, %c0_12] : memref<1024x128xbf16, #tpu.memory_space<vmem>>, vector<1024x128xbf16>
    %cst_13 = arith.constant dense<0.000000e+00> : vector<40x128xf32>
    %20 = tpu.matmul %17, %19, %cst_13 {dimension_numbers = #tpu.dot_dimension_numbers<[1], [0], [0], [1], [0, 0, 1, 1], [], []>} : vector<40x1024xbf16>, vector<1024x128xbf16>, vector<40x128xf32> -> vector<40x128xf32>
    %21 = arith.addf %18, %20 : vector<40x128xf32>
    %c0_14 = arith.constant 0 : index
    %c0_15 = arith.constant 0 : index
    %22 = vector.load %arg9[%c0_14, %c0_15] : memref<40x128xf32, #tpu.memory_space<vmem>>, vector<40x128xf32>
    tpu.vector_store %arg9[%c0_14, %c0_15], %21 {strides = array<i32>} : memref<40x128xf32, #tpu.memory_space<vmem>>, vector<40x128xf32>,
    %c1_i32 = arith.constant 1 : i32
    %23 = arith.cmpi eq, %arg1, %c1_i32 : i32
    %24 = arith.extui %23 : i1 to i32
    %c0_i32_16 = arith.constant 0 : i32
    %25 = arith.cmpi ne, %24, %c0_i32_16 : i32
    scf.if %25 {
      %c0_17 = arith.constant 0 : index
      %c0_18 = arith.constant 0 : index
      %26 = vector.load %arg9[%c0_17, %c0_18] : memref<40x128xf32, #tpu.memory_space<vmem>>, vector<40x128xf32>
      %c0_19 = arith.constant 0 : index
      %c0_20 = arith.constant 0 : index
      %27 = vector.load %arg8[%c0_19, %c0_20] : memref<1x128xf32, #tpu.memory_space<vmem>>, vector<1x128xf32>
      %28 = vector.broadcast %27 : vector<1x128xf32> to vector<40x128xf32>
      %29 = arith.addf %26, %28 : vector<40x128xf32>
      %c0_21 = arith.constant 0 : index
      %c0_22 = arith.constant 0 : index
      %30 = vector.load %arg9[%c0_21, %c0_22] : memref<40x128xf32, #tpu.memory_space<vmem>>, vector<40x128xf32>
      tpu.vector_store %arg9[%c0_21, %c0_22], %29 {strides = array<i32>} : memref<40x128xf32, #tpu.memory_space<vmem>>, vector<40x128xf32>,
    } else {
    }
    return
  }
  func.func @transform_0(%arg0: i32, %arg1: i32) -> (i32, i32) {
    %c0_i32 = arith.constant 0 : i32
    %c0_i32_0 = arith.constant 0 : i32
    return %arg0, %c0_i32 : i32, i32
  }
  func.func @transform_1(%arg0: i32, %arg1: i32) -> (i32, i32) {
    %c0_i32 = arith.constant 0 : i32
    %c0_i32_0 = arith.constant 0 : i32
    %c0_i32_1 = arith.constant 0 : i32
    return %c0_i32, %c0_i32_0 : i32, i32
  }
  func.func @transform_2(%arg0: i32, %arg1: i32) -> (i32, i32) {
    %c0_i32 = arith.constant 0 : i32
    %c0_i32_0 = arith.constant 0 : i32
    %c0_i32_1 = arith.constant 0 : i32
    return %c0_i32, %c0_i32_0 : i32, i32
  }
  func.func @transform_3(%arg0: i32, %arg1: i32) -> (i32, i32) {
    %c0_i32 = arith.constant 0 : i32
    %c0_i32_0 = arith.constant 0 : i32
    return %c0_i32, %arg1 : i32, i32
  }
  func.func @transform_4(%arg0: i32, %arg1: i32) -> (i32, i32) {
    %c0_i32 = arith.constant 0 : i32
    %c0_i32_0 = arith.constant 0 : i32
    return %c0_i32, %arg1 : i32, i32
  }
  func.func @transform_5(%arg0: i32, %arg1: i32) -> (i32, i32) {
    %c0_i32 = arith.constant 0 : i32
    %c0_i32_0 = arith.constant 0 : i32
    return %arg1, %c0_i32 : i32, i32
  }
  func.func @transform_6(%arg0: i32, %arg1: i32) -> (i32, i32) {
    %c0_i32 = arith.constant 0 : i32
    %c0_i32_0 = arith.constant 0 : i32
    %c0_i32_1 = arith.constant 0 : i32
    return %c0_i32, %c0_i32_0 : i32, i32
  }
  func.func @transform_7(%arg0: i32, %arg1: i32) -> (i32, i32) {
    %c0_i32 = arith.constant 0 : i32
    %c0_i32_0 = arith.constant 0 : i32
    return %arg0, %c0_i32 : i32, i32
  }
}

</mosaic_0001>

<bundles_post_ra>
// kernel: tpu_custom_call.1
= control target key start
LH: loop header
LB: loop body
LE: loop exit
PB: predicated region body
PF: predicated region fallthrough
CT: control target
= control target key end

     0   :  { %s7389_s0 = inlined_call_operand.hbm [shape: f32[40,128], index: 0, kind: input, shape index: {}]   ;;  %s7390_s1 = inlined_call_operand.hbm [shape: f32[1,128], index: 1, kind: input, shape index: {}]   ;;  %s7391_s2 = inlined_call_operand.vmem [shape: f32[1,128], index: 2, kind: input, shape index: {}]   ;;  %s7392_s3 = inlined_call_operand.hbm [shape: bf16[128,2048], index: 3, kind: input, shape index: {}]   ;;  %s7393_s4 = inlined_call_operand.hbm [shape: f32[1,2048], index: 4, kind: input, shape index: {}]   ;;  %s7394_s5 = inlined_call_operand.hbm [shape: bf16[2048,128], index: 5, kind: input, shape index: {}]   ;;  %s7395_s6 = inlined_call_operand.vmem [shape: f32[1,128], index: 6, kind: input, shape index: {}]   ;;  %s7396_s7 = inlined_call_operand.hbm [shape: f32[40,128], index: 7, kind: output, shape index: {}]  }
   0x1   :  { %7449 = sst [smem:[#allocation68_spill]] %s7389_s0 }
   0x2   :  { %7450 = sst [smem:[#allocation69_spill]] %s7392_s3 }
   0x3   :  { %7451 = sst [smem:[#allocation70_spill]] %s7396_s7 }
   0x4   :  { %12 = vsyncpa [#allocation4], 0 }
   0x5   :  { %13 = vsyncpa [#allocation7], 0 }
   0x6   :  { %14 = vsyncpa [#allocation5], 0  ;;  %s5055_s24 = smov 0   ;;  %s5057_s25 = smov 0  }
   0x7   :  { %s5059_s26 = smov 0   ;;  %s5061_s27 = smov 0  }
   0x8   :  { %s5063_s28 = smov 0   ;;  %s5065_s29 = smov 0  }
   0x9 LB: > { %7452 = sst [smem:[#allocation16_spill]] %s4987_s26  ;;  %s5084_s30 = sadd.s32 4294967295, %s4999_s29   ;;  %s4999_s29 = sphi %s5065_s29, %s20_s29   ;;  %s4995_s28 = sphi %s5063_s28, %s7685_s28   ;;  %s4991_s27 = sphi %s5061_s27, %s7684_s27   ;;  %s4987_s26 = sphi %s5059_s26, %s7683_s26   ;;  %s4983_s25 = sphi %s5057_s25, %s7682_s25   ;;  %s4979_s24 = sphi %s5055_s24, %s7681_s24  }
   0xa   : > { %7453 = sst [smem:[#allocation17_spill]] %s4999_s29  ;;  %s107_s8 = sadd.s32 1, %s4987_s26 }
   0xb   : > { %p114_p0 = scmp.ne.s32.totalorder %s4987_s26, %s4983_s25  ;;  %p115_p1 = scmp.eq.s32.totalorder %s4999_s29, 0 }
   0xc   : > { %p120_p2 = scmp.ne.s32.totalorder %s4983_s25, %s4979_s24  ;;  %p121_p3 = scmp.eq.s32.totalorder %s5084_s30, 0 }
   0xd   : > { %p5092_p4 = por %p115_p1, %p114_p0  ;;  %p3832_p5 = scmp.ge.s32.totalorder %s4999_s29, 1 }
   0xe   : > { %p5099_p6 = por %p121_p3, %p120_p2  ;;  %p230_p7 = scmp.lt.s32.totalorder %s4999_s29, 3 }
   0xf   : > { %s7456_s0 = sld [smem:[#allocation68_spill]]  ;;  %s5001_s15 = smov [#allocation3]  }
  0x10   : > { %p5107_p8 = pnand %p3832_p5, %p230_p7  ;;  %s246_s16 = sshll.u32 %s5001_s15, 4  ;;  %s247_s16 = int_to_ptr.vmem [resolvable:$true] %s246_s16 }
  0x11   : > { %p4596_p11 = scmp.lt.s32.totalorder %s4999_s29, 2  ;;  %s5002_s18 = smov 128  }
  0x12   : > { %p4577_p9 = pneg %p5107_p8  ;;  %s5003_s19 = smov 8  }
  0x13   : > { %p5124_p12 = pnand %p4596_p11, %p5092_p4  ;;  %s29_s21 = sadd.s32 1, %s4995_s28 }
  0x14   : > { %p5115_p10 = pnand %p4577_p9, %p121_p3  ;;  %p30_p13 = scmp.ge.s32.totalorder %s29_s21, 2 }
  0x15   : > { %s244_s13 = sshll.u32 %s7456_s0, 4  ;;  %s278_s22 = sand.u32 1, %s4999_s29   ;;  %s245_s13 = int_to_ptr.hbm [resolvable:$true] %s244_s13 }
  0x16   : > { %4580 = dma.hbm_to_vmem [thread:$0]  (!%p5115_p10), %s245_s13, 640, %s247_s16, [#allocation4], %s5002_s18, %s5002_s18, %s5003_s19  }
  0x17   : > { %s7687_s21 = smov (%p30_p13, %s29_s21), 0  ;;  %s280_s23 = sand.u32 1, %s4987_s26  }
  0x18   : > { %7460 = sst [smem:[#allocation18_spill]] %s7687_s21  ;;  %s4416_s24 = sshll.u32 %s4995_s28, 5 }
  0x19   : > { %s104_s11 = ssub.s32 %s4995_s28, %s7687_s21  ;;  %s5136_s12 = sshll.u32 %s280_s23, 9 }
  0x1a   : > { %p105_p0 = scmp.eq.s32.totalorder %s104_s11, 0  ;;  %s7461_s3 = sld [smem:[#allocation69_spill]] }
  0x1b   : > { %s282_s16 = scalar_lea.vmem [#allocation8], %s5136_s12  ;;  %s5147_s29 = scalar_lea.sflag [#allocation4], %s278_s22 }
  0x1c   : > { %s290_s18 = sshll.u32 %s282_s16, 4  ;;  %s5004_s21 = smov 1024   ;;  %s291_s18 = int_to_ptr.vmem [resolvable:$true] %s290_s18 }
  0x1d   : > { %s5145_s19 = scalar_select %p105_p0, %s4987_s26, %s107_s8  }
  0x1e   : > { %s5005_s7 = smov 512   ;;  %s5006_s11 = smov 32  }
  0x1f   : > { %7462 = sst [smem:[#allocation19_spill]] %s5145_s19  ;;  %s3840_s9 = sshll.u32 %s4995_s28, 3 }
  0x20   : > { %s287_s15 = scalar_lea.hbm %s7461_s3, %s4416_s24  ;;  %s3839_s24 = sshll.u32 %s280_s23, 3 }
  0x21   : > { %s288_s0 = sshll.u32 %s287_s15, 4  ;;  %s308_s15 = scalar_lea.hbm %s7393_s4, %s3840_s9  ;;  %s289_s0 = int_to_ptr.hbm [resolvable:$true] %s288_s0 }
  0x22   : > { %4587 = dma.hbm_to_vmem [thread:$0]  (!%p5124_p12), %s289_s0, 8192, %s291_s18, %s5147_s29, %s5004_s21, %s5005_s7, %s5006_s11  }
  0x23   : > { %s310_s16 = sshll.u32 %s308_s15, 4  ;;  %s304_s3 = scalar_lea.vmem [#allocation9], %s3839_s24  ;;  %s311_s16 = int_to_ptr.hbm [resolvable:$true] %s310_s16 }
  0x24   : > { %s312_s22 = sshll.u32 %s304_s3, 4  ;;  %s259_s0 = sshll.u32 %s7390_s1, 4  ;;  %s313_s22 = int_to_ptr.vmem [resolvable:$true] %s312_s22  ;;  %s260_s0 = int_to_ptr.hbm [resolvable:$true] %s259_s0 }
  0x25   : > { %4590 = dma.hbm_to_vmem [thread:$0]  (!%p5124_p12), %s311_s16, 128, %s313_s22, %s5147_s29  }
  0x26   : > { %s5007_s7 = smov [#allocation6]   ;;  %s4417_s23 = sshll.u32 %s4995_s28, 9 }
  0x27   : > { %s261_s21 = sshll.u32 %s5007_s7, 4  ;;  %s323_s18 = scalar_lea.vmem [#allocation10], %s5136_s12  ;;  %s262_s21 = int_to_ptr.vmem [resolvable:$true] %s261_s21 }
  0x28   : > { %4583 = dma.hbm_to_vmem [thread:$0]  (!%p5115_p10), %s260_s0, 16, %s262_s21, [#allocation7]  }
  0x29   : > { %s331_s11 = sshll.u32 %s323_s18, 4  ;;  %s328_s9 = scalar_lea.hbm %s7394_s5, %s4417_s23  ;;  %s332_s11 = int_to_ptr.vmem [resolvable:$true] %s331_s11 }
  0x2a   : > { %s329_s8 = sshll.u32 %s328_s9, 4  ;;  %s5008_s26 = smov 64   ;;  %s330_s8 = int_to_ptr.hbm [resolvable:$true] %s329_s8 }
  0x2b   : > { %s5009_s19 = smov 4   ;;  %343 = sbr.rel (%p5107_p8) target bundleno = 1124 (0x464), region = 48 }
  0x2c   : > { %4593 = dma.hbm_to_vmem [thread:$0]  (!%p5124_p12), %s330_s8, 8192, %s332_s11, %s5147_s29, %s5008_s26, %s5008_s26, %s5009_s19  }
  0x30   : > { %4962 = dma.done.wait (%p121_p3), [#allocation4], 640  }
  0x31   : > { %4964 = vsyncadd (%p121_p3), [#allocation4], 4294966656 }
  0x32   : > { %4966 = dma.done.wait (%p121_p3), [#allocation7], 16  }
  0x33   : > { %4968 = vsyncadd (%p121_p3), [#allocation7], 4294967280  ;;  %s355_s17 = sand.u32 1, %s5084_s30   ;;  %s357_s29 = sand.u32 1, %s4983_s25  }
  0x34   : > { %s3847_s20 = sshll.u32 %s357_s29, 9  ;;  %s356_s14 = scalar_lea.sflag [#allocation4], %s355_s17 }
  0x35   : > { %s5184_s12 = scalar_lea.vmem [#allocation8], %s3847_s20 }
  0x36   : > { %4970 = dma.done.wait (%p5099_p6), %s356_s14, 16512  }
  0x37   : > { %4972 = vsyncadd (%p5099_p6), %s356_s14, 4294950784  ;;  %s5190_s13 = sshll.u32 %s357_s29, 3  ;;  %s5193_s16 = scalar_lea.vmem [#allocation10], %s3847_s20 }
  0x38   : > { %s369_s15 = scalar_lea.vmem [#allocation9], %s5190_s13  ;;  %p3850_p1 = scmp.ne.s32.totalorder %s4991_s27, 0 }
  0x3a   : > { %424 = sbr.rel (%p3850_p1) target bundleno = 349 (0x15d), region = 72 }
  0x3f   : > { %v427_v0 = vld [vmem:[#allocation3 + $0x10] sm:$0xff]  ;;  %v425_v1 = vld [vmem:[#allocation3] sm:$0xff]  ;;  %v428_v3 = vld [vmem:[#allocation3 + $0x18] sm:$0xff]  ;;  %v5010_v5 = vmov 128.0   ;;  %v5011_v52 = vmov 0.0  }
  0x40   : > { %436 = vadd.xlane.f32.xlu1 %v427_v0  ;;  %432 = vadd.xlane.f32.xlu0 %v425_v1  ;;  %v429_v2 = vld [vmem:[#allocation3 + $0x20] sm:$0xff]  ;;  %v426_v4 = vld [vmem:[#allocation3 + $0x8] sm:$0xff]  ;;  %4665 = vrcp.f32 %v5010_v5  ;;  %565 = vst [vmem:[#allocation11] sm:$0xff] %v5011_v52 }
  0x41   : > { %440 = vadd.xlane.f32.xlu2 %v429_v2  ;;  %566 = vst [vmem:[#allocation11 + $0x8] sm:$0xff] %v5011_v52 }
  0x42   : > { %567 = vst [vmem:[#allocation11 + $0x10] sm:$0xff] %v5011_v52 }
  0x43   : > { %568 = vst [vmem:[#allocation11 + $0x18] sm:$0xff] %v5011_v52 }
  0x44   : > { %569 = vst [vmem:[#allocation11 + $0x20] sm:$0xff] %v5011_v52 }
  0x46   : > { %v4666_v6 = vpop.eup %4665 }
  0x47   : > { %v443_v7 = vmul.f32 128.0, %v4666_v6  ;;  %vm447_vm0 = vweird.f32 %v4666_v6 }
  0x48   : > { %438 = vadd.xlane.f32.xlu1 %v428_v3  ;;  %434 = vadd.xlane.f32.xlu0 %v426_v4 }
  0x49   : > { %v444_v8 = vsub.f32 1.0, %v443_v7 }
  0x4b   : > { %v445_v9 = vmul.f32 %v4666_v6, %v444_v8  ;;  %v4663_v8 = vld [vmem:[#allocation6] ss:$0 sm:$0xff] }
  0x4d   : > { %v446_v10 = vadd.f32 %v4666_v6, %v445_v9 }
  0x4f   : > { %v448_v11 = vsel %vm447_vm0, %v4666_v6, %v446_v10 }
  0xb3   : > { %v437_v12 = vpop.xlane.xlu1 %436  ;;  %v433_v13 = vpop.xlane.xlu0 %432 }
  0xb4   : > { %v451_v14 = vmul.f32 %v448_v11, %v437_v12  ;;  %v449_v15 = vmul.f32 %v448_v11, %v433_v13  ;;  %v441_v20 = vpop.xlane.xlu2 %440 }
  0xb5   : > { %v453_v27 = vmul.f32 %v448_v11, %v441_v20 }
  0xb6   : > { %v5196_v16 = vsub.f32 %v427_v0, %v451_v14  ;;  %v5198_v17 = vsub.f32 %v425_v1, %v449_v15 }
  0xb7   : > { %v5212_v30 = vsub.f32 %v429_v2, %v453_v27 }
  0xb8   : > { %v461_v18 = vmul.f32 %v5196_v16, %v5196_v16  ;;  %v459_v19 = vmul.f32 %v5198_v17, %v5198_v17 }
  0xb9   : > { %v463_v31 = vmul.f32 %v5212_v30, %v5212_v30 }
  0xba   : > { %468 = vadd.xlane.f32.xlu1 %v461_v18  ;;  %464 = vadd.xlane.f32.xlu2 %v459_v19  ;;  %v4664_v19 = vld [vmem:[%s7391_s2] ss:$0 sm:$0xff] }
  0xbb   : > { %v439_v21 = vpop.xlane.xlu1 %438  ;;  %v435_v22 = vpop.xlane.xlu0 %434 }
  0xbc   : > { %v452_v23 = vmul.f32 %v448_v11, %v439_v21  ;;  %v450_v24 = vmul.f32 %v448_v11, %v435_v22 }
  0xbe   : > { %v5204_v25 = vsub.f32 %v428_v3, %v452_v23  ;;  %v5206_v26 = vsub.f32 %v426_v4, %v450_v24 }
  0xc0   : > { %v462_v28 = vmul.f32 %v5204_v25, %v5204_v25  ;;  %v460_v29 = vmul.f32 %v5206_v26, %v5206_v26 }
  0xc2   : > { %470 = vadd.xlane.f32.xlu2 %v462_v28  ;;  %466 = vadd.xlane.f32.xlu0 %v460_v29 }
  0xca   : > { %472 = vadd.xlane.f32.xlu0 %v463_v31 }
 0x12d   : > { %v469_v32 = vpop.xlane.xlu1 %468  ;;  %v465_v33 = vpop.xlane.xlu2 %464 }
 0x12e   : > { %v476_v34 = vmul.f32 %v469_v32, %v448_v11  ;;  %v474_v35 = vmul.f32 %v465_v33, %v448_v11 }
 0x130   : > { %v481_v36 = vadd.f32 1e-05, %v476_v34  ;;  %v479_v37 = vadd.f32 1e-05, %v474_v35 }
 0x132   : > { %4667 = vrsqrt.f32 %v481_v36  ;;  %vm510_vm1 = vweird.f32 %v481_v36  ;;  %vm490_vm5 = vweird.f32 %v479_v37 }
 0x133   : > { %4669 = vrsqrt.f32 %v479_v37 }
 0x135   : > { %v471_v38 = vpop.xlane.xlu2 %470  ;;  %v467_v39 = vpop.xlane.xlu0 %466 }
 0x136   : > { %v477_v40 = vmul.f32 %v471_v38, %v448_v11  ;;  %v475_v41 = vmul.f32 %v467_v39, %v448_v11 }
 0x138   : > { %v4668_v42 = vpop.eup %4667  ;;  %v482_v43 = vadd.f32 1e-05, %v477_v40  ;;  %v480_v44 = vadd.f32 1e-05, %v475_v41 }
 0x139   : > { %v4670_v45 = vpop.eup %4669  ;;  %v505_v46 = vmul.f32 %v4668_v42, %v481_v36  ;;  %vm511_vm2 = vweird.f32 %v4668_v42 }
 0x13a   : > { %v485_v47 = vmul.f32 %v4670_v45, %v479_v37  ;;  %4671 = vrsqrt.f32 %v482_v43  ;;  %vm491_vm3 = vweird.f32 %v4670_v45  ;;  %vm512_vm4 = vmor %vm510_vm1, %vm511_vm2  ;;  %vm520_vm7 = vweird.f32 %v482_v43 }
 0x13b   : > { %v506_v48 = vmul.f32 %v4668_v42, %v505_v46  ;;  %4673 = vrsqrt.f32 %v480_v44  ;;  %vm492_vm6 = vmor %vm490_vm5, %vm491_vm3  ;;  %vm500_vm11 = vweird.f32 %v480_v44 }
 0x13c   : > { %v486_v49 = vmul.f32 %v4670_v45, %v485_v47 }
 0x13d   : > { %v507_v50 = vmul.f32 0.5, %v506_v48  ;;  %v473_v51 = vpop.xlane.xlu0 %472 }
 0x13e   : > { %v487_v53 = vmul.f32 0.5, %v486_v49  ;;  %v478_v54 = vmul.f32 %v473_v51, %v448_v11 }
 0x13f   : > { %v508_v55 = vsub.f32 1.5, %v507_v50 }
 0x140   : > { %v4672_v56 = vpop.eup %4671  ;;  %v488_v57 = vsub.f32 1.5, %v487_v53  ;;  %v483_v58 = vadd.f32 1e-05, %v478_v54 }
 0x141   : > { %v4674_v59 = vpop.eup %4673  ;;  %v509_v60 = vmul.f32 %v4668_v42, %v508_v55  ;;  %v515_v61 = vmul.f32 %v4672_v56, %v482_v43  ;;  %vm521_vm8 = vweird.f32 %v4672_v56 }
 0x142   : > { %v489_v62 = vmul.f32 %v4670_v45, %v488_v57  ;;  %v495_v63 = vmul.f32 %v4674_v59, %v480_v44  ;;  %4675 = vrsqrt.f32 %v483_v58  ;;  %vm501_vm9 = vweird.f32 %v4674_v59  ;;  %vm522_vm10 = vmor %vm520_vm7, %vm521_vm8 }
 0x143   : > { %v516_v0 = vmul.f32 %v4672_v56, %v515_v61  ;;  %v513_v2 = vsel %vm512_vm4, %v4668_v42, %v509_v60  ;;  %vm502_vm12 = vmor %vm500_vm11, %vm501_vm9  ;;  %vm530_vm14 = vweird.f32 %v483_v58 }
 0x144   : > { %v496_v1 = vmul.f32 %v4674_v59, %v495_v63  ;;  %v493_v4 = vsel %vm492_vm6, %v4670_v45, %v489_v62  ;;  %v536_v9 = vmul.f32 %v513_v2, %v5196_v16 }
 0x145   : > { %v517_v3 = vmul.f32 0.5, %v516_v0  ;;  %v534_v11 = vmul.f32 %v493_v4, %v5198_v17 }
 0x146   : > { %v497_v5 = vmul.f32 0.5, %v496_v1  ;;  %v544_v20 = vmul.f32 %v4663_v8, %v536_v9 }
 0x147   : > { %v518_v6 = vsub.f32 1.5, %v517_v3  ;;  %v542_v22 = vmul.f32 %v4663_v8, %v534_v11 }
 0x148   : > { %v4676_v7 = vpop.eup %4675  ;;  %v498_v10 = vsub.f32 1.5, %v497_v5  ;;  %v552_v29 = vadd.f32 %v4664_v19, %v544_v20 }
 0x149   : > { %v519_v12 = vmul.f32 %v4672_v56, %v518_v6  ;;  %v525_v13 = vmul.f32 %v4676_v7, %v483_v58  ;;  %vm531_vm13 = vweird.f32 %v4676_v7  ;;  %v550_v32 = vadd.f32 %v4664_v19, %v542_v22 }
 0x14a   : > { %v499_v14 = vmul.f32 %v4674_v59, %v498_v10  ;;  %vm532_vm15 = vmor %vm530_vm14, %vm531_vm13 }
 0x14b   : > { %v523_v15 = vsel %vm522_vm10, %v4672_v56, %v519_v12  ;;  %v526_v18 = vmul.f32 %v4676_v7, %v525_v13 }
 0x14c   : > { %v537_v21 = vmul.f32 %v523_v15, %v5204_v25  ;;  %v503_v16 = vsel %vm502_vm12, %v4674_v59, %v499_v14 }
 0x14d   : > { %v535_v23 = vmul.f32 %v503_v16, %v5206_v26  ;;  %v527_v17 = vmul.f32 0.5, %v526_v18 }
 0x14e   : > { %v545_v24 = vmul.f32 %v4663_v8, %v537_v21 }
 0x14f   : > { %v543_v27 = vmul.f32 %v4663_v8, %v535_v23  ;;  %v528_v28 = vsub.f32 1.5, %v527_v17 }
 0x150   : > { %v553_v31 = vadd.f32 %v4664_v19, %v545_v24 }
 0x151   : > { %v551_v33 = vadd.f32 %v4664_v19, %v543_v27  ;;  %v529_v34 = vmul.f32 %v4676_v7, %v528_v28 }
 0x152   : > { %v4556_v35 = vpack.c.bf16 %v553_v31, %v552_v29 }
 0x153   : > { %v4551_v36 = vpack.c.bf16 %v551_v33, %v550_v32  ;;  %v533_v37 = vsel %vm532_vm15, %v4676_v7, %v529_v34 }
 0x154   : > { %4558 = vst [vmem:[#allocation2 + $0x8] sm:$0xff] %v4556_v35   ;;  %v538_v25 = vmul.f32 %v533_v37, %v5212_v30 }
 0x155   : > { %4552 = vst [vmem:[#allocation2] sm:$0xff] %v4551_v36  }
 0x156   : > { %v546_v26 = vmul.f32 %v4663_v8, %v538_v25 }
 0x158   : > { %v554_v38 = vadd.f32 %v4664_v19, %v546_v26 }
 0x15a   : > { %v559_v39 = vpack.c.bf16 %v554_v38, %v554_v38 }
 0x15c   : > { %564 = vst [vmem:[#allocation2 + $0x10] sm:$0xf] %v559_v39 }
 0x15d PF: > { %v4085_v40 = vld [vmem:[%s5184_s12 + $0x1c0] sm:$0xf]  ;;  %v4476_v41 = vld [vmem:[%s5184_s12 + $0x1c4] sm:$0xf]  ;;  %v4093_v44 = vld [vmem:[%s5184_s12 + $0x1c8] sm:$0xf] }
 0x15e   : > { %v4480_v30 = vld [vmem:[%s5184_s12 + $0x1dc] sm:$0xf0]  ;;  %v4087_v43 = vld [vmem:[%s5184_s12 + $0x1e0] sm:$0xf0]  ;;  %v4481_v45 = vld [vmem:[%s5184_s12 + $0x1e4] sm:$0xf0] }
 0x15f   : > { %v4086_v42 = vor.u32 %v4480_v30, %v4085_v40  ;;  %v4090_v46 = vor.u32 %v4476_v41, %v4087_v43  ;;  %v4094_v47 = vor.u32 %v4481_v45, %v4093_v44  ;;  %v4477_v48 = vld [vmem:[%s5184_s12 + $0x1cc] sm:$0xf]  ;;  %v4053_v50 = vld [vmem:[%s5184_s12 + $0x180] sm:$0xf]  ;;  %v4468_v53 = vld [vmem:[%s5184_s12 + $0x184] sm:$0xf] }
 0x160   : > { %v4095_v49 = vld [vmem:[%s5184_s12 + $0x1e8] sm:$0xf0]  ;;  %v4472_v52 = vld [vmem:[%s5184_s12 + $0x19c] sm:$0xf0]  ;;  %v4055_v54 = vld [vmem:[%s5184_s12 + $0x1a0] sm:$0xf0] }
 0x161   : > { %993 = vmatpush.bf16.msra.mxu0 %v4086_v42  ;;  %v4098_v51 = vor.u32 %v4477_v48, %v4095_v49  ;;  %1016 = vmatpush.bf16.msra.mxu1 %v4090_v46  ;;  %v4054_v55 = vor.u32 %v4472_v52, %v4053_v50  ;;  %v4058_v56 = vor.u32 %v4468_v53, %v4055_v54  ;;  %v4061_v57 = vld [vmem:[%s5184_s12 + $0x188] sm:$0xf]  ;;  %v4469_v59 = vld [vmem:[%s5184_s12 + $0x18c] sm:$0xf]  ;;  %v4021_v62 = vld [vmem:[%s5184_s12 + $0x140] sm:$0xf] }
 0x162   : > { %1039 = vmatpush.bf16.msra.mxu2 %v4094_v47  ;;  %v4473_v58 = vld [vmem:[%s5184_s12 + $0x1a4] sm:$0xf0]  ;;  %v4063_v61 = vld [vmem:[%s5184_s12 + $0x1a8] sm:$0xf0]  ;;  %v4464_v63 = vld [vmem:[%s5184_s12 + $0x15c] sm:$0xf0] }
 0x163   : > { %1062 = vmatpush.bf16.msra.mxu3 %v4098_v51  ;;  %v4062_v60 = vor.u32 %v4473_v58, %v4061_v57  ;;  %v4066_v0 = vor.u32 %v4469_v59, %v4063_v61  ;;  %v4460_v1 = vld [vmem:[%s5184_s12 + $0x144] sm:$0xf]  ;;  %v4029_v3 = vld [vmem:[%s5184_s12 + $0x148] sm:$0xf]  ;;  %v4022_v4 = vor.u32 %v4464_v63, %v4021_v62  ;;  %v4461_v6 = vld [vmem:[%s5184_s12 + $0x14c] sm:$0xf] }
 0x164   : > { %v4023_v2 = vld [vmem:[%s5184_s12 + $0x160] sm:$0xf0]  ;;  %v4465_v5 = vld [vmem:[%s5184_s12 + $0x164] sm:$0xf0]  ;;  %v4031_v7 = vld [vmem:[%s5184_s12 + $0x168] sm:$0xf0] }
 0x165   : > { %994 = vmatpush.bf16.msra.mxu0 %v4054_v55  ;;  %1017 = vmatpush.bf16.msra.mxu1 %v4058_v56  ;;  %v4026_v8 = vor.u32 %v4460_v1, %v4023_v2  ;;  %v4030_v9 = vor.u32 %v4465_v5, %v4029_v3  ;;  %v3989_v10 = vld [vmem:[%s5184_s12 + $0x100] sm:$0xf]  ;;  %v4452_v12 = vld [vmem:[%s5184_s12 + $0x104] sm:$0xf]  ;;  %v4034_v13 = vor.u32 %v4461_v6, %v4031_v7  ;;  %v3997_v15 = vld [vmem:[%s5184_s12 + $0x108] sm:$0xf] }
 0x166   : > { %1040 = vmatpush.bf16.msra.mxu2 %v4062_v60  ;;  %v4456_v11 = vld [vmem:[%s5184_s12 + $0x11c] sm:$0xf0]  ;;  %v3991_v14 = vld [vmem:[%s5184_s12 + $0x120] sm:$0xf0]  ;;  %v4457_v18 = vld [vmem:[%s5184_s12 + $0x124] sm:$0xf0] }
 0x167   : > { %1063 = vmatpush.bf16.msra.mxu3 %v4066_v0  ;;  %v4453_v19 = vld [vmem:[%s5184_s12 + $0x10c] sm:$0xf]  ;;  %v3990_v21 = vor.u32 %v4456_v11, %v3989_v10  ;;  %v3994_v16 = vor.u32 %v4452_v12, %v3991_v14  ;;  %v3998_v22 = vor.u32 %v4457_v18, %v3997_v15  ;;  %v3957_v23 = vld [vmem:[%s5184_s12 + $0xc0] sm:$0xf]  ;;  %v4444_v24 = vld [vmem:[%s5184_s12 + $0xc4] sm:$0xf] }
 0x168   : > { %v3999_v20 = vld [vmem:[%s5184_s12 + $0x128] sm:$0xf0]  ;;  %v4448_v17 = vld [vmem:[%s5184_s12 + $0xdc] sm:$0xf0]  ;;  %v3959_v28 = vld [vmem:[%s5184_s12 + $0xe0] sm:$0xf0] }
 0x169   : > { %995 = vmatpush.bf16.msra.mxu0 %v4022_v4  ;;  %1018 = vmatpush.bf16.msra.mxu1 %v4026_v8  ;;  %v4002_v27 = vor.u32 %v4453_v19, %v3999_v20  ;;  %v3965_v29 = vld [vmem:[%s5184_s12 + $0xc8] sm:$0xf]  ;;  %v4445_v32 = vld [vmem:[%s5184_s12 + $0xcc] sm:$0xf]  ;;  %v3958_v34 = vor.u32 %v4448_v17, %v3957_v23  ;;  %v3962_v35 = vor.u32 %v4444_v24, %v3959_v28  ;;  %v3925_v37 = vld [vmem:[%s5184_s12 + $0x80] sm:$0xf] }
 0x16a   : > { %1041 = vmatpush.bf16.msra.mxu2 %v4030_v9  ;;  %v4449_v31 = vld [vmem:[%s5184_s12 + $0xe4] sm:$0xf0]  ;;  %v3967_v33 = vld [vmem:[%s5184_s12 + $0xe8] sm:$0xf0]  ;;  %v4440_v25 = vld [vmem:[%s5184_s12 + $0x9c] sm:$0xf0] }
 0x16b   : > { %1064 = vmatpush.bf16.msra.mxu3 %v4034_v13  ;;  %v3966_v36 = vor.u32 %v4449_v31, %v3965_v29  ;;  %v4436_v26 = vld [vmem:[%s5184_s12 + $0x84] sm:$0xf]  ;;  %v3970_v38 = vor.u32 %v4445_v32, %v3967_v33  ;;  %v3933_v40 = vld [vmem:[%s5184_s12 + $0x88] sm:$0xf]  ;;  %v4437_v41 = vld [vmem:[%s5184_s12 + $0x8c] sm:$0xf]  ;;  %v3926_v43 = vor.u32 %v4440_v25, %v3925_v37 }
 0x16c   : > { %v3927_v39 = vld [vmem:[%s5184_s12 + $0xa0] sm:$0xf0]  ;;  %v4441_v30 = vld [vmem:[%s5184_s12 + $0xa4] sm:$0xf0]  ;;  %v3935_v42 = vld [vmem:[%s5184_s12 + $0xa8] sm:$0xf0] }
 0x16d   : > { %996 = vmatpush.bf16.msra.mxu0 %v3990_v21  ;;  %1019 = vmatpush.bf16.msra.mxu1 %v3994_v16  ;;  %v3930_v44 = vor.u32 %v4436_v26, %v3927_v39  ;;  %v3934_v45 = vor.u32 %v4441_v30, %v3933_v40  ;;  %v3893_v46 = vld [vmem:[%s5184_s12 + $0x40] sm:$0xf]  ;;  %v4428_v48 = vld [vmem:[%s5184_s12 + $0x44] sm:$0xf]  ;;  %v3938_v49 = vor.u32 %v4437_v41, %v3935_v42  ;;  %v3901_v51 = vld [vmem:[%s5184_s12 + $0x48] sm:$0xf] }
 0x16e   : > { %1042 = vmatpush.bf16.msra.mxu2 %v3998_v22  ;;  %v4432_v47 = vld [vmem:[%s5184_s12 + $0x5c] sm:$0xf0]  ;;  %v3895_v50 = vld [vmem:[%s5184_s12 + $0x60] sm:$0xf0]  ;;  %v4433_v52 = vld [vmem:[%s5184_s12 + $0x64] sm:$0xf0] }
 0x16f   : > { %1065 = vmatpush.bf16.msra.mxu3 %v4002_v27  ;;  %v4429_v53 = vld [vmem:[%s5184_s12 + $0x4c] sm:$0xf]  ;;  %v3894_v55 = vor.u32 %v4432_v47, %v3893_v46  ;;  %v3861_v56 = vld [vmem:[%s5184_s12] sm:$0xf]  ;;  %v3898_v57 = vor.u32 %v4428_v48, %v3895_v50  ;;  %v3902_v58 = vor.u32 %v4433_v52, %v3901_v51  ;;  %v4420_v60 = vld [vmem:[%s5184_s12 + $0x4] sm:$0xf] }
 0x170   : > { %v3903_v54 = vld [vmem:[%s5184_s12 + $0x68] sm:$0xf0]  ;;  %v4424_v59 = vld [vmem:[%s5184_s12 + $0x1c] sm:$0xf0]  ;;  %v3863_v61 = vld [vmem:[%s5184_s12 + $0x20] sm:$0xf0] }
 0x171   : > { %997 = vmatpush.bf16.msra.mxu0 %v3958_v34  ;;  %1020 = vmatpush.bf16.msra.mxu1 %v3962_v35  ;;  %v3906_v62 = vor.u32 %v4429_v53, %v3903_v54  ;;  %v3869_v63 = vld [vmem:[%s5184_s12 + $0x8] sm:$0xf]  ;;  %v4421_v1 = vld [vmem:[%s5184_s12 + $0xc] sm:$0xf]  ;;  %v4109_v3 = vld [vmem:[%s5184_s12 + $0x1d8] sm:$0xf]  ;;  %v3862_v5 = vor.u32 %v4424_v59, %v3861_v56  ;;  %v3866_v8 = vor.u32 %v4420_v60, %v3863_v61 }
 0x172   : > { %1043 = vmatpush.bf16.msra.mxu2 %v3966_v36  ;;  %v4425_v0 = vld [vmem:[%s5184_s12 + $0x24] sm:$0xf0]  ;;  %v3871_v2 = vld [vmem:[%s5184_s12 + $0x28] sm:$0xf0]  ;;  %v4483_v4 = vld [vmem:[%s5184_s12 + $0x1f4] sm:$0xf0] }
 0x173   : > { %1066 = vmatpush.bf16.msra.mxu3 %v3970_v38  ;;  %v4479_v6 = vld [vmem:[%s5184_s12 + $0x1dc] sm:$0xf]  ;;  %v3870_v9 = vor.u32 %v4425_v0, %v3869_v63  ;;  %v5292_v10 = vld [vmem:[#allocation2] sm:$0xff]  ;;  %v3874_v11 = vor.u32 %v4421_v1, %v3871_v2  ;;  %v4110_v12 = vor.u32 %v4483_v4, %v4109_v3  ;;  %v4077_v13 = vld [vmem:[%s5184_s12 + $0x198] sm:$0xf]  ;;  %p4411_p2 = scmp.ne.s32.totalorder %s4991_s27, 1 }
 0x174   : > { %v4111_v7 = vld [vmem:[%s5184_s12 + $0x1f8] sm:$0xf0]  ;;  %v4101_v14 = vld [vmem:[%s5184_s12 + $0x1d0] sm:$0xf]  ;;  %v4475_v19 = vld [vmem:[%s5184_s12 + $0x1b4] sm:$0xf0] }
 0x175   : > { %998 = vmatpush.bf16.msra.mxu0 %v3926_v43  ;;  %1021 = vmatpush.bf16.msra.mxu1 %v3930_v44  ;;  %v4482_v15 = vld [vmem:[%s5184_s12 + $0x1ec] sm:$0xf0]  ;;  %v4114_v18 = vor.u32 %v4479_v6, %v4111_v7  ;;  %v4478_v20 = vld [vmem:[%s5184_s12 + $0x1d4] sm:$0xf]  ;;  %v4471_v16 = vld [vmem:[%s5184_s12 + $0x19c] sm:$0xf]  ;;  %v4078_v17 = vor.u32 %v4475_v19, %v4077_v13 }
 0x176   : > { %1044 = vmatpush.bf16.msra.mxu2 %v3934_v45  ;;  %v4103_v21 = vld [vmem:[%s5184_s12 + $0x1f0] sm:$0xf0]  ;;  %v4079_v22 = vld [vmem:[%s5184_s12 + $0x1b8] sm:$0xf0]  ;;  %v4102_v23 = vor.u32 %v4482_v15, %v4101_v14  ;;  %v4045_v27 = vld [vmem:[%s5184_s12 + $0x158] sm:$0xf] }
 0x177   : > { %1067 = vmatpush.bf16.msra.mxu3 %v3938_v49  ;;  %v4106_v24 = vor.u32 %v4478_v20, %v4103_v21  ;;  %v4069_v28 = vld [vmem:[%s5184_s12 + $0x190] sm:$0xf]  ;;  %v4082_v31 = vor.u32 %v4471_v16, %v4079_v22  ;;  %v4467_v32 = vld [vmem:[%s5184_s12 + $0x174] sm:$0xf0]  ;;  %v4470_v33 = vld [vmem:[%s5184_s12 + $0x194] sm:$0xf] }
 0x178   : > { %v4474_v29 = vld [vmem:[%s5184_s12 + $0x1ac] sm:$0xf0]  ;;  %v4071_v34 = vld [vmem:[%s5184_s12 + $0x1b0] sm:$0xf0]  ;;  %v4463_v35 = vld [vmem:[%s5184_s12 + $0x15c] sm:$0xf]  ;;  %v4046_v25 = vor.u32 %v4467_v32, %v4045_v27 }
 0x179   : > { %999 = vmatpush.bf16.msra.mxu0 %v3894_v55  ;;  %1022 = vmatpush.bf16.msra.mxu1 %v3898_v57  ;;  %v4047_v36 = vld [vmem:[%s5184_s12 + $0x178] sm:$0xf0]  ;;  %v4070_v37 = vor.u32 %v4474_v29, %v4069_v28  ;;  %v4074_v26 = vor.u32 %v4470_v33, %v4071_v34  ;;  %v4013_v38 = vld [vmem:[%s5184_s12 + $0x118] sm:$0xf]  ;;  %v4037_v39 = vld [vmem:[%s5184_s12 + $0x150] sm:$0xf] }
 0x17a   : > { %1045 = vmatpush.bf16.msra.mxu2 %v3902_v58  ;;  %v4466_v40 = vld [vmem:[%s5184_s12 + $0x16c] sm:$0xf0]  ;;  %v4050_v30 = vor.u32 %v4463_v35, %v4047_v36  ;;  %v4459_v41 = vld [vmem:[%s5184_s12 + $0x134] sm:$0xf0]  ;;  %v4462_v42 = vld [vmem:[%s5184_s12 + $0x154] sm:$0xf] }
 0x17b   : > { %1068 = vmatpush.bf16.msra.mxu3 %v3906_v62  ;;  %v4039_v43 = vld [vmem:[%s5184_s12 + $0x170] sm:$0xf0]  ;;  %v4455_v44 = vld [vmem:[%s5184_s12 + $0x11c] sm:$0xf]  ;;  %v4038_v46 = vor.u32 %v4466_v40, %v4037_v39  ;;  %v4014_v47 = vor.u32 %v4459_v41, %v4013_v38  ;;  %v3981_v49 = vld [vmem:[%s5184_s12 + $0xd8] sm:$0xf] }
 0x17c   : > { %v4015_v45 = vld [vmem:[%s5184_s12 + $0x138] sm:$0xf0]  ;;  %v4042_v48 = vor.u32 %v4462_v42, %v4039_v43  ;;  %v4005_v50 = vld [vmem:[%s5184_s12 + $0x110] sm:$0xf]  ;;  %v4451_v53 = vld [vmem:[%s5184_s12 + $0xf4] sm:$0xf0] }
 0x17d   : > { %1000 = vmatpush.bf16.msra.mxu0 %v3862_v5  ;;  %1023 = vmatpush.bf16.msra.mxu1 %v3866_v8  ;;  %v4458_v51 = vld [vmem:[%s5184_s12 + $0x12c] sm:$0xf0]  ;;  %v4018_v52 = vor.u32 %v4455_v44, %v4015_v45  ;;  %v4454_v54 = vld [vmem:[%s5184_s12 + $0x114] sm:$0xf]  ;;  %v4447_v56 = vld [vmem:[%s5184_s12 + $0xdc] sm:$0xf]  ;;  %v3982_v60 = vor.u32 %v4451_v53, %v3981_v49 }
 0x17e   : > { %1046 = vmatpush.bf16.msra.mxu2 %v3870_v9  ;;  %v4007_v55 = vld [vmem:[%s5184_s12 + $0x130] sm:$0xf0]  ;;  %v3983_v57 = vld [vmem:[%s5184_s12 + $0xf8] sm:$0xf0]  ;;  %v5330_v58 = vld [vmem:[#allocation2 + $0x8] sm:$0xff]  ;;  %v4006_v59 = vor.u32 %v4458_v51, %v4005_v50 }
 0x17f   : > { %1069 = vmatpush.bf16.msra.mxu3 %v3874_v11  ;;  %v4010_v61 = vor.u32 %v4454_v54, %v4007_v55  ;;  %v3949_v62 = vld [vmem:[%s5184_s12 + $0x98] sm:$0xf]  ;;  %v3973_v63 = vld [vmem:[%s5184_s12 + $0xd0] sm:$0xf]  ;;  %v3986_v1 = vor.u32 %v4447_v56, %v3983_v57  ;;  %v4446_v3 = vld [vmem:[%s5184_s12 + $0xd4] sm:$0xf] }
 0x180   : > { %1001 = vmatmul.bf16.vlgmr.msra.gmra.mxu0 %v5292_v10  ;;  %1024 = vmatmul.bf16.vlgmr.msra.gmra.mxu1 %v5292_v10  ;;  %v4450_v0 = vld [vmem:[%s5184_s12 + $0xec] sm:$0xf0]  ;;  %v4443_v2 = vld [vmem:[%s5184_s12 + $0xb4] sm:$0xf0]  ;;  %v3975_v4 = vld [vmem:[%s5184_s12 + $0xf0] sm:$0xf0] }
 0x181   : > { %1047 = vmatmul.bf16.vlgmr.msra.gmra.mxu2 %v5292_v10  ;;  %1085 = vmatpush.bf16.msrb.mxu0 %v4102_v23  ;;  %v4439_v5 = vld [vmem:[%s5184_s12 + $0x9c] sm:$0xf]  ;;  %v3974_v7 = vor.u32 %v4450_v0, %v3973_v63  ;;  %v3950_v8 = vor.u32 %v4443_v2, %v3949_v62  ;;  %v3978_v9 = vor.u32 %v4446_v3, %v3975_v4  ;;  %v3917_v11 = vld [vmem:[%s5184_s12 + $0x58] sm:$0xf]  ;;  %v4442_v13 = vld [vmem:[%s5184_s12 + $0xac] sm:$0xf0] }
 0x182   : > { %1131 = vmatpush.bf16.msrb.mxu2 %v4110_v12  ;;  %1070 = vmatmul.bf16.vlgmr.msra.gmra.mxu3 %v5292_v10  ;;  %v3951_v6 = vld [vmem:[%s5184_s12 + $0xb8] sm:$0xf0]  ;;  %v3941_v12 = vld [vmem:[%s5184_s12 + $0x90] sm:$0xf]  ;;  %v4435_v15 = vld [vmem:[%s5184_s12 + $0x74] sm:$0xf0] }
 0x183   : > { %1154 = vmatpush.bf16.msrb.mxu3 %v4114_v18  ;;  %1108 = vmatpush.bf16.msrb.mxu1 %v4106_v24  ;;  %v3954_v14 = vor.u32 %v4439_v5, %v3951_v6  ;;  %v4438_v18 = vld [vmem:[%s5184_s12 + $0x94] sm:$0xf]  ;;  %v4431_v20 = vld [vmem:[%s5184_s12 + $0x5c] sm:$0xf]  ;;  %v3942_v16 = vor.u32 %v4442_v13, %v3941_v12  ;;  %v3918_v22 = vor.u32 %v4435_v15, %v3917_v11  ;;  %v4434_v24 = vld [vmem:[%s5184_s12 + $0x6c] sm:$0xf0] }
 0x184   : > { %v3943_v19 = vld [vmem:[%s5184_s12 + $0xb0] sm:$0xf0]  ;;  %v3919_v21 = vld [vmem:[%s5184_s12 + $0x78] sm:$0xf0]  ;;  %v4427_v32 = vld [vmem:[%s5184_s12 + $0x34] sm:$0xf0] }
 0x185   : > { %1086 = vmatpush.bf16.msrb.mxu0 %v4070_v37  ;;  %v3946_v23 = vor.u32 %v4438_v18, %v3943_v19  ;;  %v4430_v27 = vld [vmem:[%s5184_s12 + $0x54] sm:$0xf]  ;;  %v3922_v28 = vor.u32 %v4431_v20, %v3919_v21  ;;  %v4423_v34 = vld [vmem:[%s5184_s12 + $0x1c] sm:$0xf]  ;;  %v4426_v38 = vld [vmem:[%s5184_s12 + $0x2c] sm:$0xf0] }
 0x186   : > { %1132 = vmatpush.bf16.msrb.mxu2 %v4078_v17  ;;  %v3909_v17 = vld [vmem:[%s5184_s12 + $0x50] sm:$0xf]  ;;  %v3911_v29 = vld [vmem:[%s5184_s12 + $0x70] sm:$0xf0]  ;;  %v3887_v35 = vld [vmem:[%s5184_s12 + $0x38] sm:$0xf0] }
 0x187   : > { %1155 = vmatpush.bf16.msrb.mxu3 %v4082_v31  ;;  %1109 = vmatpush.bf16.msrb.mxu1 %v4074_v26  ;;  %v3885_v31 = vld [vmem:[%s5184_s12 + $0x18] sm:$0xf]  ;;  %v574_v33 = vld [vmem:[#allocation2 + $0x10] sm:$0xf]  ;;  %v3910_v36 = vor.u32 %v4434_v24, %v3909_v17  ;;  %v3914_v37 = vor.u32 %v4430_v27, %v3911_v29  ;;  %v3890_v40 = vor.u32 %v4423_v34, %v3887_v35  ;;  %v639_v45 = vld [vmem:[%s369_s15] sm:$0xff] }
 0x188   : > { %v3877_v26 = vld [vmem:[%s5184_s12 + $0x10] sm:$0xf]  ;;  %v666_v39 = vunpack.c.l.b16 %v574_v33  ;;  %v3879_v41 = vld [vmem:[%s5184_s12 + $0x30] sm:$0xf0]  ;;  %v5390_v53 = vperm.slane %v639_v45, 2  ;;  %v5394_v55 = vperm.slane %v639_v45, 3 }
 0x189   : > { %1087 = vmatpush.bf16.msrb.mxu0 %v4038_v46  ;;  %v3878_v42 = vor.u32 %v4426_v38, %v3877_v26  ;;  %v5374_v46 = vperm.slane %v639_v45, 0 }
 0x18a   : > { %1133 = vmatpush.bf16.msrb.mxu2 %v4046_v25  ;;  %v3886_v25 = vor.u32 %v4427_v32, %v3885_v31  ;;  %v669_v44 = vpack.c.b16 %v666_v39, %v666_v39 }
 0x18b   : > { %1156 = vmatpush.bf16.msrb.mxu3 %v4050_v30  ;;  %1110 = vmatpush.bf16.msrb.mxu1 %v4042_v48  ;;  %v4422_v30 = vld [vmem:[%s5184_s12 + $0x14] sm:$0xf] }
 0x18c   : > { %v3882_v43 = vor.u32 %v4422_v30, %v3879_v41 }
 0x18d   : > { %1088 = vmatpush.bf16.msrb.mxu0 %v4006_v59 }
 0x18e   : > { %1134 = vmatpush.bf16.msrb.mxu2 %v4014_v47  ;;  %v5376_v47 = vperm.slane %v639_v45, 1 }
 0x18f   : > { %1157 = vmatpush.bf16.msrb.mxu3 %v4018_v52  ;;  %1111 = vmatpush.bf16.msrb.mxu1 %v4010_v61 }
 0x190   : > { %1006 = vmatmul.bf16.gmra.mxu0 %v5330_v58  ;;  %1029 = vmatmul.bf16.gmra.mxu1 %v5330_v58 }
 0x191   : > { %1052 = vmatmul.bf16.gmra.mxu2 %v5330_v58  ;;  %1089 = vmatpush.bf16.msrb.mxu0 %v3974_v7 }
 0x192   : > { %1135 = vmatpush.bf16.msrb.mxu2 %v3982_v60  ;;  %1075 = vmatmul.bf16.gmra.mxu3 %v5330_v58 }
 0x193   : > { %1158 = vmatpush.bf16.msrb.mxu3 %v3986_v1  ;;  %1112 = vmatpush.bf16.msrb.mxu1 %v3978_v9 }
 0x195   : > { %1090 = vmatpush.bf16.msrb.mxu0 %v3942_v16 }
 0x196   : > { %1136 = vmatpush.bf16.msrb.mxu2 %v3950_v8 }
 0x197   : > { %1159 = vmatpush.bf16.msrb.mxu3 %v3954_v14  ;;  %1113 = vmatpush.bf16.msrb.mxu1 %v3946_v23 }
 0x199   : > { %1091 = vmatpush.bf16.msrb.mxu0 %v3910_v36 }
 0x19a   : > { %1137 = vmatpush.bf16.msrb.mxu2 %v3918_v22 }
 0x19b   : > { %1160 = vmatpush.bf16.msrb.mxu3 %v3922_v28  ;;  %1114 = vmatpush.bf16.msrb.mxu1 %v3914_v37 }
 0x19d   : > { %1092 = vmatpush.bf16.msrb.mxu0 %v3878_v42 }
 0x19e   : > { %1138 = vmatpush.bf16.msrb.mxu2 %v3886_v25 }
 0x19f   : > { %1161 = vmatpush.bf16.msrb.mxu3 %v3890_v40  ;;  %1115 = vmatpush.bf16.msrb.mxu1 %v3882_v43 }
 0x1a0   : > { %1011 = vmatmul.bf16.gmra.mxu0 %v669_v44  ;;  %1034 = vmatmul.bf16.gmra.mxu1 %v669_v44 }
 0x1a1   : > { %1057 = vmatmul.bf16.gmra.mxu2 %v669_v44 }
 0x1a2   : > { %1080 = vmatmul.bf16.gmra.mxu3 %v669_v44 }
 0x1b0   : > { %1093 = vmatmul.bf16.vlgmr.msrb.gmra.mxu0 %v5292_v10  ;;  %1116 = vmatmul.bf16.vlgmr.msrb.gmra.mxu1 %v5292_v10 }
 0x1b1   : > { %1139 = vmatmul.bf16.vlgmr.msrb.gmra.mxu2 %v5292_v10 }
 0x1b2   : > { %1162 = vmatmul.bf16.vlgmr.msrb.gmra.mxu3 %v5292_v10 }
 0x1c0   : > { %1098 = vmatmul.bf16.gmra.mxu0 %v5330_v58  ;;  %1121 = vmatmul.bf16.gmra.mxu1 %v5330_v58 }
 0x1c1   : > { %1144 = vmatmul.bf16.gmra.mxu2 %v5330_v58 }
 0x1c2   : > { %1167 = vmatmul.bf16.gmra.mxu3 %v5330_v58 }
 0x1d0   : > { %1103 = vmatmul.bf16.gmra.mxu0 %v669_v44  ;;  %1126 = vmatmul.bf16.gmra.mxu1 %v669_v44 }
 0x1d1   : > { %1149 = vmatmul.bf16.gmra.mxu2 %v669_v44 }
 0x1d2   : > { %1172 = vmatmul.bf16.gmra.mxu3 %v669_v44 }
 0x1fd   : > { %v1002_v48 = vpop.f32.mrf.mxu0  ;;  %v1025_v49 = vpop.f32.mrf.mxu1 }
 0x1fe   : > { %v5379_v10 = vadd.f32 %v1002_v48, %v5374_v46  ;;  %v5382_v50 = vadd.f32 %v1025_v49, %v5376_v47 }
 0x200   : > { %v5385_v51 = vmul.f32 0.70710677, %v5379_v10  ;;  %v5388_v52 = vmul.f32 0.70710677, %v5382_v50 }
 0x202   : > { %v1257_v54 = vmul.f32 %v5385_v51, %v5385_v51  ;;  %v1297_v56 = vmul.f32 %v5388_v52, %v5388_v52 }
 0x204   : > { %v5398_v57 = vmin.f32 %v1257_v54, 16.0  ;;  %v1048_v58 = vpop.f32.mrf.mxu2  ;;  %v5400_v59 = vmin.f32 %v1297_v56, 16.0 }
 0x205   : > { %v5403_v60 = vadd.f32 %v1048_v58, %v5390_v53  ;;  %v1071_v61 = vpop.f32.mrf.mxu3  ;;  %v1004_v18 = vpop.f32.mrf.mxu0 }
 0x206   : > { %v1259_v62 = vmul.f32 2.1237322e-06, %v5398_v57  ;;  %v1270_v63 = vmul.f32 3.8918573e-05, %v5398_v57  ;;  %v5408_v0 = vadd.f32 %v1071_v61, %v5394_v55  ;;  %v1310_v1 = vmul.f32 3.8918573e-05, %v5400_v59 }
 0x207   : > { %v5412_v3 = vmul.f32 0.70710677, %v5403_v60  ;;  %v1299_v4 = vmul.f32 2.1237322e-06, %v5400_v59  ;;  %v5434_v27 = vadd.f32 %v1004_v18, %v5374_v46 }
 0x208   : > { %v1271_v2 = vadd.f32 0.001143296, %v1270_v63  ;;  %v1311_v5 = vadd.f32 0.001143296, %v1310_v1  ;;  %v1260_v6 = vadd.f32 0.00028619796, %v1259_v62 }
 0x209   : > { %v1337_v8 = vmul.f32 %v5412_v3, %v5412_v3  ;;  %v5419_v9 = vmul.f32 0.70710677, %v5408_v0  ;;  %v1300_v21 = vadd.f32 0.00028619796, %v1299_v4  ;;  %v5441_v37 = vmul.f32 0.70710677, %v5434_v27  ;;  %v1027_v4 = vpop.f32.mrf.mxu1 }
 0x20a   : > { %v1272_v7 = vmul.f32 %v1271_v2, %v5398_v57  ;;  %v1312_v11 = vmul.f32 %v1311_v5, %v5400_v59  ;;  %v1261_v19 = vmul.f32 %v1260_v6, %v5398_v57  ;;  %v5465_v18 = vadd.f32 %v1027_v4, %v5376_v47 }
 0x20b   : > { %v5422_v13 = vmin.f32 %v1337_v8, 16.0  ;;  %v1377_v14 = vmul.f32 %v5419_v9, %v5419_v9  ;;  %v1301_v31 = vmul.f32 %v1300_v21, %v5400_v59  ;;  %v1577_v43 = vmul.f32 %v5441_v37, %v5441_v37 }
 0x20c   : > { %v1273_v12 = vadd.f32 0.014752088, %v1272_v7  ;;  %v1313_v15 = vadd.f32 0.014752088, %v1312_v11  ;;  %v1262_v29 = vadd.f32 0.0036580483, %v1261_v19 }
 0x20d   : > { %v1350_v16 = vmul.f32 3.8918573e-05, %v5422_v13  ;;  %v5429_v22 = vmin.f32 %v1377_v14, 16.0  ;;  %v1339_v24 = vmul.f32 2.1237322e-06, %v5422_v13  ;;  %v5452_v61 = vmin.f32 %v1577_v43, 16.0  ;;  %v1050_v43 = vpop.f32.mrf.mxu2 }
 0x20e   : > { %v1274_v20 = vmul.f32 %v1273_v12, %v5398_v57  ;;  %v1314_v17 = vmul.f32 %v1313_v15, %v5400_v59  ;;  %v1263_v26 = vmul.f32 %v1262_v29, %v5398_v57  ;;  %v1302_v38 = vadd.f32 0.0036580483, %v1301_v31 }
 0x20f   : > { %v1351_v28 = vadd.f32 0.001143296, %v1350_v16  ;;  %v1390_v34 = vmul.f32 3.8918573e-05, %v5429_v22  ;;  %v1340_v36 = vadd.f32 0.00028619796, %v1339_v24 }
 0x210   : > { %v1275_v23 = vadd.f32 0.112945676, %v1274_v20  ;;  %v1315_v35 = vadd.f32 0.112945676, %v1314_v17  ;;  %v1264_v48 = vadd.f32 0.05243302, %v1263_v26  ;;  %v1303_v49 = vmul.f32 %v1302_v38, %v5400_v59 }
 0x211   : > { %v1352_v33 = vmul.f32 %v1351_v28, %v5422_v13  ;;  %v1391_v30 = vadd.f32 0.001143296, %v1390_v34  ;;  %v1341_v42 = vmul.f32 %v1340_v36, %v5422_v13  ;;  %v1379_v7 = vmul.f32 2.1237322e-06, %v5429_v22 }
 0x212   : > { %v1276_v32 = vmul.f32 %v1275_v23, %v5398_v57  ;;  %v1316_v41 = vmul.f32 %v1315_v35, %v5400_v59  ;;  %v1265_v1 = vmul.f32 %v1264_v48, %v5398_v57  ;;  %v1304_v2 = vadd.f32 0.05243302, %v1303_v49  ;;  %v1073_v49 = vpop.f32.mrf.mxu3 }
 0x213   : > { %v1353_v25 = vadd.f32 0.014752088, %v1352_v33  ;;  %v1392_v45 = vmul.f32 %v1391_v30, %v5429_v22  ;;  %v1342_v58 = vadd.f32 0.0036580483, %v1341_v42  ;;  %v1590_v14 = vmul.f32 3.8918573e-05, %v5452_v61 }
 0x214   : > { %v1277_v39 = vadd.f32 0.4994258, %v1276_v32  ;;  %v1317_v56 = vadd.f32 0.4994258, %v1316_v41  ;;  %v1266_v20 = vadd.f32 0.18741608, %v1265_v1  ;;  %v1305_v21 = vmul.f32 %v1304_v2, %v5400_v59 }
 0x215   : > { %v1354_v40 = vmul.f32 %v1353_v25, %v5422_v13  ;;  %v1393_v63 = vadd.f32 0.014752088, %v1392_v45  ;;  %v1343_v12 = vmul.f32 %v1342_v58, %v5422_v13  ;;  %v1380_v16 = vadd.f32 0.00028619796, %v1379_v7 }
 0x216   : > { %v1278_v54 = vmul.f32 %v1277_v39, %v5398_v57  ;;  %v1318_v11 = vmul.f32 %v1317_v56, %v5400_v59  ;;  %v1591_v28 = vadd.f32 0.001143296, %v1590_v14  ;;  %v5475_v31 = vmul.f32 0.70710677, %v5465_v18 }
 0x217   : > { %v1355_v44 = vadd.f32 0.112945676, %v1354_v40  ;;  %v1394_v8 = vmul.f32 %v1393_v63, %v5429_v22  ;;  %v1344_v17 = vadd.f32 0.05243302, %v1343_v12  ;;  %v1267_v33 = vmul.f32 %v1266_v20, %v5398_v57 }
 0x218   : > { %v5456_v5 = vadd.f32 1.0, %v1278_v54  ;;  %v5469_v23 = vadd.f32 1.0, %v1318_v11  ;;  %v1306_v34 = vadd.f32 0.18741608, %v1305_v21  ;;  %v1592_v35 = vmul.f32 %v1591_v28, %v5452_v61 }
 0x219   : > { %v1356_v62 = vmul.f32 %v1355_v44, %v5422_v13  ;;  %v1395_v19 = vadd.f32 0.112945676, %v1394_v8  ;;  %v1345_v36 = vmul.f32 %v1344_v17, %v5422_v13  ;;  %v1381_v25 = vmul.f32 %v1380_v16, %v5429_v22 }
 0x21a   : > { %4677 = vrcp.f32 %v5456_v5  ;;  %v1579_v38 = vmul.f32 2.1237322e-06, %v5452_v61  ;;  %v1593_v39 = vadd.f32 0.014752088, %v1592_v35  ;;  %v1617_v40 = vmul.f32 %v5475_v31, %v5475_v31 }
 0x21b   : > { %v1357_v6 = vadd.f32 0.4994258, %v1356_v62  ;;  %v1396_v24 = vmul.f32 %v1395_v19, %v5429_v22  ;;  %4679 = vrcp.f32 %v5469_v23  ;;  %v1268_v30 = vadd.f32 1.1283791, %v1267_v33 }
 0x21c   : > { %v1307_v41 = vmul.f32 %v1306_v34, %v5400_v59  ;;  %v1594_v42 = vmul.f32 %v1593_v39, %v5452_v61  ;;  %v1346_v45 = vadd.f32 0.18741608, %v1345_v36  ;;  %v1382_v48 = vadd.f32 0.0036580483, %v1381_v25 }
 0x21d   : > { %v1358_v15 = vmul.f32 %v1357_v6, %v5422_v13  ;;  %v1397_v32 = vadd.f32 0.4994258, %v1396_v24  ;;  %v5494_v54 = vmul.f32 0.5, %v5379_v10  ;;  %v1580_v56 = vadd.f32 0.00028619796, %v1579_v38 }
 0x21e   : > { %v5496_v58 = vmin.f32 %v1617_v40, 16.0  ;;  %v5501_v63 = vmul.f32 0.5, %v5403_v60  ;;  %v5504_v59 = vmul.f32 0.5, %v5408_v0  ;;  %v1051_v2 = vadd.f32 %v1050_v43, %v5390_v53 }
 0x21f   : > { %v5472_v29 = vadd.f32 1.0, %v1358_v15  ;;  %v1398_v57 = vmul.f32 %v1397_v32, %v5429_v22  ;;  %v5512_v10 = vmul.f32 %v1268_v30, %v5385_v51  ;;  %v1308_v6 = vadd.f32 1.1283791, %v1307_v41 }
 0x220   : > { %v5482_v26 = vpop.eup %4677  ;;  %v1595_v7 = vadd.f32 0.112945676, %v1594_v42  ;;  %v5515_v8 = vadd.f32 %v1073_v49, %v5394_v55  ;;  %v1291_v60 = vand.u32 2147483648, %v5456_v5  ;;  %v1347_v0 = vmul.f32 %v1346_v45, %v5422_v13 }
 0x221   : > { %4681 = vrcp.f32 %v5472_v29  ;;  %v1281_v44 = vmul.f32 %v5482_v26, %v5456_v5  ;;  %v5498_v62 = vpop.eup %4679  ;;  %v5506_v1 = vadd.f32 1.0, %v1398_v57  ;;  %v1383_v12 = vmul.f32 %v1382_v48, %v5429_v22 }
 0x222   : > { %v1321_v14 = vmul.f32 %v5498_v62, %v5469_v23  ;;  %v1331_v15 = vand.u32 2147483648, %v5469_v23  ;;  %v1581_v51 = vmul.f32 %v1580_v56, %v5452_v61  ;;  %v1630_v19 = vmul.f32 3.8918573e-05, %v5496_v58 }
 0x223   : > { %v1282_v11 = vsub.f32 1.0, %v1281_v44  ;;  %vm1285_vm0 = vweird.f32 %v5456_v5  ;;  %4683 = vrcp.f32 %v5506_v1  ;;  %v1619_v13 = vmul.f32 2.1237322e-06, %v5496_v58 }
 0x224   : > { %v5530_v21 = vmul.f32 0.70710677, %v1051_v2  ;;  %v1289_v16 = vand.u32 2147483647, %v5456_v5  ;;  %v5534_v17 = vmul.f32 %v1308_v6, %v5388_v52  ;;  %v1596_v24 = vmul.f32 %v1595_v7, %v5452_v61  ;;  %v1007_v7 = vpop.f32.mrf.mxu0 }
 0x225   : > { %v1631_v28 = vadd.f32 0.001143296, %v1630_v19  ;;  %v1283_v32 = vmul.f32 %v5482_v26, %v1282_v11  ;;  %v1329_v33 = vand.u32 2147483647, %v5469_v23  ;;  %v1348_v34 = vadd.f32 1.1283791, %v1347_v0 }
 0x226   : > { %v1384_v35 = vadd.f32 0.05243302, %v1383_v12  ;;  %v1292_v36 = vor.u32 1.1754944e-38, %v1291_v60  ;;  %v5539_v25 = vor.u32 1.1754944e-38, %v1331_v15  ;;  %v1582_v38 = vadd.f32 0.0036580483, %v1581_v51 }
 0x227   : > { %v5509_v4 = vpop.eup %4681  ;;  %v1632_v39 = vmul.f32 %v1631_v28, %v5496_v58  ;;  %v1322_v40 = vsub.f32 1.0, %v1321_v14  ;;  %v1620_v30 = vadd.f32 0.00028619796, %v1619_v13  ;;  %v1657_v52 = vmul.f32 %v5530_v21, %v5530_v21 }
 0x228   : > { %v1361_v20 = vmul.f32 %v5509_v4, %v5472_v29  ;;  %vm1286_vm1 = vweird.f32 %v5482_v26  ;;  %v1597_v41 = vadd.f32 0.4994258, %v1596_v24  ;;  %v5545_v43 = vmul.f32 0.5, %v1051_v2 }
 0x229   : > { %v1633_v42 = vadd.f32 0.014752088, %v1632_v39  ;;  %v5547_v44 = vpop.eup %4683  ;;  %v1284_v45 = vadd.f32 %v5482_v26, %v1283_v32  ;;  %vm5550_vm2 = vcmp.eq.f32.partialorder %v1289_v16, 8.507059e+37  ;;  %vm1326_vm3 = vweird.f32 %v5498_v62  ;;  %vm5576_vm6 = vmor %vm1285_vm0, %vm1286_vm1  ;;  %v5585_v16 = vpop.f32.mrf.mxu1 }
 0x22a   : > { %v1362_v57 = vsub.f32 1.0, %v1361_v20  ;;  %v5556_v49 = vmul.f32 %v1348_v34, %v5412_v3  ;;  %v1385_v56 = vmul.f32 %v1384_v35, %v5429_v22  ;;  %v5559_v6 = vmin.f32 %v1657_v52, 16.0 }
 0x22b   : > { %vm1365_vm4 = vweird.f32 %v5472_v29  ;;  %v1369_v2 = vand.u32 2147483647, %v5472_v29  ;;  %v1583_v11 = vmul.f32 %v1582_v38, %v5452_v61  ;;  %v5565_v60 = vmul.f32 0.70710677, %v5515_v8 }
 0x22c   : > { %v1323_v0 = vmul.f32 %v5498_v62, %v1322_v40  ;;  %vm1325_vm5 = vweird.f32 %v5469_v23  ;;  %v1363_v3 = vmul.f32 %v5509_v4, %v1362_v57  ;;  %v1621_v12 = vmul.f32 %v1620_v30, %v5496_v58  ;;  %v5628_v48 = vpop.f32.mrf.mxu0  ;;  %v5645_v23 = vpop.f32.mrf.mxu2 }
 0x22d   : > { %v1634_v14 = vmul.f32 %v1633_v42, %v5496_v58  ;;  %v1401_v51 = vmul.f32 %v5547_v44, %v5506_v1  ;;  %v1598_v19 = vmul.f32 %v1597_v41, %v5452_v61  ;;  %v1659_v20 = vmul.f32 2.1237322e-06, %v5559_v6  ;;  %vm5634_vm11 = vmor %vm1325_vm5, %vm1326_vm3 }
 0x22e   : > { %v1670_v13 = vmul.f32 3.8918573e-05, %v5559_v6  ;;  %v1288_v24 = vsel %vm5576_vm6, %v5482_v26, %v1284_v45  ;;  %v1371_v5 = vand.u32 2147483648, %v5472_v29  ;;  %v1386_v28 = vadd.f32 0.18741608, %v1385_v56 }
 0x22f   : > { %v1635_v32 = vadd.f32 0.112945676, %v1634_v14  ;;  %v1584_v34 = vadd.f32 0.05243302, %v1583_v11  ;;  %v1660_v35 = vadd.f32 0.00028619796, %v1659_v20  ;;  %v1697_v39 = vmul.f32 %v5565_v60, %v5565_v60 }
 0x230   : > { %v1671_v38 = vadd.f32 0.001143296, %v1670_v13  ;;  %vm5593_vm7 = vcmp.eq.f32.partialorder %v1329_v33, 8.507059e+37  ;;  %v1364_v57 = vadd.f32 %v5509_v4, %v1363_v3  ;;  %vm1366_vm8 = vweird.f32 %v5509_v4  ;;  %v4515_v14 = vld [vmem:[%s5193_s16 + $0xf8] sm:$0xff] }
 0x231   : > { %v1622_v30 = vadd.f32 0.0036580483, %v1621_v12  ;;  %v1636_v26 = vmul.f32 %v1635_v32, %v5496_v58  ;;  %v1402_v52 = vsub.f32 1.0, %v1401_v51  ;;  %v5600_v41 = vadd.f32 1.0, %v1598_v19  ;;  %vm5618_vm10 = vmor %vm1365_vm4, %vm1366_vm8  ;;  %3547 = vmatpush.bf16.msra.mxu3 %v4515_v14 }
 0x232   : > { %v1672_v42 = vmul.f32 %v1671_v38, %v5559_v6  ;;  %v5603_v45 = vmin.f32 %v1697_v39, 16.0  ;;  %v1324_v56 = vadd.f32 %v5498_v62, %v1323_v0  ;;  %vm5606_vm9 = vcmp.eq.f32.partialorder %v1369_v2, 8.507059e+37 }
 0x233   : > { %v1387_v11 = vmul.f32 %v1386_v28, %v5429_v22  ;;  %v1661_v3 = vmul.f32 %v1660_v35, %v5559_v6  ;;  %v5614_v12 = vsel %vm5550_vm2, %v1292_v36, %v1288_v24  ;;  %v1372_v15 = vor.u32 1.1754944e-38, %v1371_v5 }
 0x234   : > { %v1637_v0 = vadd.f32 0.4994258, %v1636_v26  ;;  %v1673_v2 = vadd.f32 0.014752088, %v1672_v42  ;;  %v1368_v51 = vsel %vm5618_vm10, %v5509_v4, %v1364_v57  ;;  %v1585_v22 = vmul.f32 %v1584_v34, %v5452_v61  ;;  %v5652_v57 = vpop.f32.mrf.mxu3 }
 0x235   : > { %v1623_v19 = vmul.f32 %v1622_v30, %v5496_v58  ;;  %v1699_v36 = vmul.f32 2.1237322e-06, %v5603_v45  ;;  %v1403_v20 = vmul.f32 %v5547_v44, %v1402_v52  ;;  %4685 = vrcp.f32 %v5600_v41  ;;  %v5654_v30 = vpop.f32.mrf.mxu1 }
 0x236   : > { %v1674_v4 = vmul.f32 %v1673_v2, %v5559_v6  ;;  %v1710_v13 = vmul.f32 3.8918573e-05, %v5603_v45  ;;  %v1328_v24 = vsel %vm5634_vm11, %v5498_v62, %v1324_v56  ;;  %v1388_v5 = vadd.f32 1.1283791, %v1387_v11  ;;  %v4491_v2 = vld [vmem:[%s5193_s16 + $0x38] sm:$0xff] }
 0x237   : > { %v1662_v28 = vadd.f32 0.0036580483, %v1661_v3  ;;  %v1700_v32 = vadd.f32 0.00028619796, %v1699_v36  ;;  %v1409_v34 = vand.u32 2147483647, %v5506_v1  ;;  %v1638_v35 = vmul.f32 %v1637_v0, %v5496_v58  ;;  %3478 = vmatpush.bf16.msra.mxu0 %v4491_v2 }
 0x238   : > { %v1675_v38 = vadd.f32 0.112945676, %v1674_v4  ;;  %v5650_v39 = vadd.f32 %v1007_v7, %v5374_v46  ;;  %v1373_v62 = vsel %vm5606_vm9, %v1372_v15, %v1368_v51  ;;  %v1586_v26 = vadd.f32 0.18741608, %v1585_v22  ;;  %v4507_v3 = vld [vmem:[%s5193_s16 + $0xb8] sm:$0xff] }
 0x239   : > { %v1624_v52 = vadd.f32 0.05243302, %v1623_v19  ;;  %v1711_v42 = vadd.f32 0.001143296, %v1710_v13  ;;  %v1333_v56 = vsel %vm5593_vm7, %v5539_v25, %v1328_v24  ;;  %v1404_v11 = vadd.f32 %v5547_v44, %v1403_v20  ;;  %v4499_v51 = vld [vmem:[%s5193_s16 + $0x78] sm:$0xff]  ;;  %3524 = vmatpush.bf16.msra.mxu2 %v4507_v3  ;;  %v5712_v3 = vpop.f32.mrf.mxu2 }
 0x23a   : > { %vm1406_vm12 = vweird.f32 %v5547_v44  ;;  %v1701_v7 = vmul.f32 %v1700_v32, %v5603_v45  ;;  %vm1405_vm13 = vweird.f32 %v5506_v1  ;;  %v1411_v33 = vand.u32 2147483648, %v5506_v1  ;;  %3501 = vmatpush.bf16.msra.mxu1 %v4499_v51  ;;  %v4490_v51 = vld [vmem:[%s5193_s16 + $0x30] sm:$0xff] }
 0x23b   : > { %v1663_v15 = vmul.f32 %v1662_v28, %v5559_v6  ;;  %v1676_v0 = vmul.f32 %v1675_v38, %v5559_v6  ;;  %v5672_v40 = vpop.eup %4685  ;;  %v1374_v25 = vmul.f32 %v1373_v62, %v5556_v49  ;;  %v5675_v22 = vadd.f32 1.0, %v1638_v35  ;;  %vm5683_vm14 = vmor %vm1405_vm13, %vm1406_vm12  ;;  %v5703_v62 = vpop.f32.mrf.mxu0  ;;  %3479 = vmatpush.bf16.msra.mxu0 %v4490_v51 }
 0x23c   : > { %v1712_v19 = vmul.f32 %v1711_v42, %v5603_v45  ;;  %v5679_v36 = vmul.f32 0.70710677, %v5650_v39  ;;  %vm5687_vm15 = vcmp.eq.f32.partialorder %v1409_v34, 8.507059e+37  ;;  %v1587_v49 = vmul.f32 %v1586_v26, %v5452_v61  ;;  %v5720_v2 = vpop.f32.mrf.mxu3 }
 0x23d   : > { %v1625_v20 = vmul.f32 %v1624_v52, %v5496_v58  ;;  %v1677_v4 = vadd.f32 0.4994258, %v1676_v0  ;;  %v1408_v13 = vsel %vm5683_vm14, %v5547_v44, %v1404_v11  ;;  %v1702_v24 = vadd.f32 0.0036580483, %v1701_v7 }
 0x23e   : > { %7475 = vst [vmem:[#allocation20_spill] sm:$0xff] %v5679_v36  ;;  %v1713_v28 = vadd.f32 0.014752088, %v1712_v19  ;;  %v5698_v32 = vadd.f32 %v5585_v16, %v5376_v47  ;;  %v1412_v34 = vor.u32 1.1754944e-38, %v1411_v33  ;;  %v1601_v35 = vmul.f32 %v5672_v40, %v5600_v41 }
 0x23f   : > { %v1664_v61 = vadd.f32 0.05243302, %v1663_v15  ;;  %v1678_v38 = vmul.f32 %v1677_v4, %v5559_v6  ;;  %v4117_v26 = vclamps-f32 %v1374_v25, 1.0  ;;  %4687 = vrcp.f32 %v5675_v22 }
 0x240   : > { %v1714_v44 = vmul.f32 %v1713_v28, %v5603_v45  ;;  %v1897_v52 = vmul.f32 %v5679_v36, %v5679_v36  ;;  %v1389_v16 = vmul.f32 %v1388_v5, %v5419_v9  ;;  %v1413_v42 = vsel %vm5687_vm15, %v1412_v34, %v1408_v13  ;;  %v5723_v9 = vpop.f32.mrf.mxu1  ;;  %v4506_v28 = vld [vmem:[%s5193_s16 + $0xb0] sm:$0xff] }
 0x241   : > { %v1588_v11 = vadd.f32 1.1283791, %v1587_v49  ;;  %v1626_v7 = vadd.f32 0.18741608, %v1625_v20  ;;  %v5714_v14 = vadd.f32 1.0, %v1678_v38  ;;  %v1703_v33 = vmul.f32 %v1702_v24, %v5603_v45  ;;  %v4514_v34 = vld [vmem:[%s5193_s16 + $0xf0] sm:$0xff]  ;;  %3525 = vmatpush.bf16.msra.mxu2 %v4506_v28 }
 0x242   : > { %v1715_v15 = vadd.f32 0.112945676, %v1714_v44  ;;  %v5718_v0 = vmul.f32 0.70710677, %v5698_v32  ;;  %v1602_v5 = vsub.f32 1.0, %v1601_v35  ;;  %v1611_v25 = vand.u32 2147483648, %v5600_v41  ;;  %3548 = vmatpush.bf16.msra.mxu3 %v4514_v34 }
 0x243   : > { %v1665_v19 = vmul.f32 %v1664_v61, %v5559_v6  ;;  %v5729_v1 = vadd.f32 %v5645_v23, %v5390_v53  ;;  %v2859_v29 = vadd.f32 1.0, %v4117_v26  ;;  %v5731_v49 = vmul.f32 %v1413_v42, %v1389_v16  ;;  %v1014_v44 = vpop.f32.mrf.mxu0 }
 0x244   : > { %7480 = vst [vmem:[#allocation21_spill] sm:$0xff] %v5718_v0  ;;  %4689 = vrcp.f32 %v5714_v14  ;;  %v5734_v20 = vmin.f32 %v1897_v52, 16.0  ;;  %v5738_v4 = vmul.f32 %v5614_v12, %v5512_v10  ;;  %v5741_v13 = vmul.f32 %v1333_v56, %v5534_v17  ;;  %v5794_v44 = vpop.f32.mrf.mxu2 }
 0x245   : > { %v5744_v24 = vmul.f32 %v1588_v11, %v5441_v37  ;;  %v1716_v23 = vmul.f32 %v1715_v15, %v5603_v45  ;;  %v5749_v35 = vpop.eup %4687  ;;  %vm1605_vm0 = vweird.f32 %v5600_v41  ;;  %v1609_v61 = vand.u32 2147483647, %v5600_v41 }
 0x246   : > { %7481 = vst [vmem:[#allocation22_spill] sm:$0xff] %v5734_v20  ;;  %v1627_v38 = vmul.f32 %v1626_v7, %v5496_v58  ;;  %v1704_v10 = vadd.f32 0.05243302, %v1703_v33  ;;  %v1937_v17 = vmul.f32 %v5718_v0, %v5718_v0  ;;  %v1603_v37 = vmul.f32 %v5672_v40, %v1602_v5 }
 0x247   : > { %v1666_v12 = vadd.f32 0.18741608, %v1665_v19  ;;  %v1717_v56 = vadd.f32 0.4994258, %v1716_v23  ;;  %v5758_v26 = vmul.f32 0.70710677, %v5729_v1  ;;  %v5761_v52 = vmul.f32 %v2859_v29, %v5501_v63 }
 0x248   : > { %v5764_v16 = vor.u32 1.1754944e-38, %v1611_v25  ;;  %v1899_v42 = vmul.f32 2.1237322e-06, %v5734_v20  ;;  %v1641_v11 = vmul.f32 %v5749_v35, %v5675_v22  ;;  %v5774_v15 = vadd.f32 %v5652_v57, %v5394_v55  ;;  %v4498_v63 = vld [vmem:[%s5193_s16 + $0x70] sm:$0xff]  ;;  %v1037_v29 = vpop.f32.mrf.mxu1 }
 0x249   : > { %7482 = vst [vmem:[#allocation23_spill] sm:$0xff] %v5758_v26  ;;  %v1718_v7 = vmul.f32 %v1717_v56, %v5603_v45  ;;  %v1977_v33 = vmul.f32 %v5758_v26, %v5758_v26  ;;  %vm1606_vm1 = vweird.f32 %v5672_v40  ;;  %v5778_v5 = vadd.f32 1.1283791, %v1627_v38  ;;  %3502 = vmatpush.bf16.msra.mxu1 %v4498_v63  ;;  %v5796_v29 = vpop.f32.mrf.mxu3 }
 0x24a   : > { %v4690_v51 = vpop.eup %4689  ;;  %v1705_v25 = vmul.f32 %v1704_v10, %v5603_v45  ;;  %v5781_v19 = vmin.f32 %v1937_v17, 16.0  ;;  %v5784_v23 = vadd.f32 %v5672_v40, %v1603_v37  ;;  %v1667_v57 = vmul.f32 %v1666_v12, %v5559_v6  ;;  %7485 = vst [vmem:[#allocation26_spill] sm:$0xff] %v5796_v29  ;;  %v4489_v12 = vld [vmem:[%s5193_s16 + $0x28] sm:$0xff]  ;;  %vm5814_vm2 = vmor %vm1605_vm0, %vm1606_vm1 }
 0x24b   : > { %v1681_v34 = vmul.f32 %v4690_v51, %v5714_v14  ;;  %v5790_v56 = vadd.f32 1.0, %v1718_v7  ;;  %v1900_v10 = vadd.f32 0.00028619796, %v1899_v42  ;;  %v5792_v17 = vmin.f32 %v1977_v33, 16.0  ;;  %v4497_v33 = vld [vmem:[%s5193_s16 + $0x68] sm:$0xff]  ;;  %3480 = vmatpush.bf16.msra.mxu0 %v4489_v12 }
 0x24c   : > { %7483 = vst [vmem:[#allocation24_spill] sm:$0xff] %v5781_v19  ;;  %v1642_v37 = vsub.f32 1.0, %v1641_v11  ;;  %v1691_v28 = vand.u32 2147483648, %v5714_v14  ;;  %v5800_v6 = vmul.f32 0.70710677, %v5774_v15  ;;  %v5807_v42 = vadd.f32 %v5628_v48, %v5374_v46  ;;  %v4488_v11 = vld [vmem:[%s5193_s16 + $0x20] sm:$0xff] }
 0x24d   : > { %7484 = vst [vmem:[#allocation25_spill] sm:$0xff] %v5792_v17  ;;  %v1682_v58 = vsub.f32 1.0, %v1681_v34  ;;  %v1706_v63 = vadd.f32 0.18741608, %v1705_v25  ;;  %4691 = vrcp.f32 %v5790_v56  ;;  %v1939_v7 = vmul.f32 2.1237322e-06, %v5781_v19  ;;  %3503 = vmatpush.bf16.msra.mxu1 %v4497_v33 }
 0x24e   : > { %7486 = vst [vmem:[#allocation27_spill] sm:$0xff] %v5800_v6  ;;  %vm5818_vm3 = vcmp.eq.f32.partialorder %v1609_v61, 8.507059e+37  ;;  %v1668_v25 = vadd.f32 1.1283791, %v1667_v57  ;;  %vm1686_vm4 = vweird.f32 %v4690_v51  ;;  %v1689_v48 = vand.u32 2147483647, %v5714_v14 }
 0x24f   : > { %v1683_v38 = vmul.f32 %v4690_v51, %v1682_v58  ;;  %v1608_v41 = vsel %vm5814_vm2, %v5672_v40, %v5784_v23  ;;  %vm1645_vm5 = vweird.f32 %v5675_v22  ;;  %v1901_v61 = vmul.f32 %v1900_v10, %v5734_v20  ;;  %v4496_v40 = vld [vmem:[%s5193_s16 + $0x60] sm:$0xff]  ;;  %3481 = vmatpush.bf16.msra.mxu0 %v4488_v11 }
 0x250   : > { %v1979_v26 = vmul.f32 2.1237322e-06, %v5792_v17  ;;  %v2017_v57 = vmul.f32 %v5800_v6, %v5800_v6  ;;  %v1643_v58 = vmul.f32 %v5749_v35, %v1642_v37  ;;  %vm1685_vm6 = vweird.f32 %v5714_v14 }
 0x251   : > { %v1684_v12 = vadd.f32 %v4690_v51, %v1683_v38  ;;  %v1692_v29 = vor.u32 1.1754944e-38, %v1691_v28  ;;  %vm1687_vm7 = vmor %vm1685_vm6, %vm1686_vm4  ;;  %v1707_v23 = vmul.f32 %v1706_v63, %v5603_v45  ;;  %v1940_v10 = vadd.f32 0.00028619796, %v1939_v7  ;;  %v4505_v28 = vld [vmem:[%s5193_s16 + $0xa8] sm:$0xff]  ;;  %3504 = vmatpush.bf16.msra.mxu1 %v4496_v40 }
 0x252   : > { %v5838_v0 = vmin.f32 %v2017_v57, 16.0  ;;  %v5841_v6 = vmul.f32 0.70710677, %v5807_v42  ;;  %v1669_v33 = vmul.f32 %v1668_v25, %v5530_v21  ;;  %vm1690_vm8 = vcmp.eq.f32.partialorder %v1689_v48, 8.507059e+37  ;;  %v4513_v38 = vld [vmem:[%s5193_s16 + $0xe8] sm:$0xff]  ;;  %v1060_v21 = vpop.f32.mrf.mxu2  ;;  %3526 = vmatpush.bf16.msra.mxu2 %v4505_v28 }
 0x253   : > { %v1688_v37 = vsel %vm1687_vm7, %v4690_v51, %v1684_v12  ;;  %v5846_v14 = vadd.f32 %v5654_v30, %v5376_v47  ;;  %v5850_v36 = vpop.eup %4691  ;;  %v1980_v63 = vadd.f32 0.00028619796, %v1979_v26  ;;  %v1083_v51 = vpop.f32.mrf.mxu3  ;;  %vm1646_vm9 = vweird.f32 %v5749_v35  ;;  %3549 = vmatpush.bf16.msra.mxu3 %v4513_v38  ;;  %v4512_v21 = vld [vmem:[%s5193_s16 + $0xe0] sm:$0xff] }
 0x254   : > { %7491 = vst [vmem:[#allocation28_spill] sm:$0xff] %v5838_v0  ;;  %v1693_v45 = vsel %vm1690_vm8, %v1692_v29, %v1688_v37  ;;  %v2019_v7 = vmul.f32 2.1237322e-06, %v5838_v0  ;;  %v2217_v57 = vmul.f32 %v5841_v6, %v5841_v6  ;;  %v1721_v30 = vmul.f32 %v5850_v36, %v5790_v56  ;;  %v4487_v51 = vld [vmem:[%s5193_s16 + $0x18] sm:$0xff]  ;;  %vm5886_vm11 = vmor %vm1645_vm5, %vm1646_vm9 }
 0x255   : > { %7492 = vst [vmem:[#allocation29_spill] sm:$0xff] %v5841_v6  ;;  %v1694_v25 = vmul.f32 %v1693_v45, %v1669_v33  ;;  %v1902_v48 = vadd.f32 0.0036580483, %v1901_v61  ;;  %v5859_v26 = vadd.f32 %v5749_v35, %v1643_v58  ;;  %v1708_v29 = vadd.f32 1.1283791, %v1707_v23  ;;  %3482 = vmatpush.bf16.msra.mxu0 %v4487_v51 }
 0x256   : > { %v1941_v12 = vmul.f32 %v1940_v10, %v5781_v19  ;;  %v5862_v11 = vmin.f32 %v2217_v57, 16.0  ;;  %v7494_v40 = vand.u32 2147483647, %v5675_v22  ;;  %v1722_v37 = vsub.f32 1.0, %v1721_v30  ;;  %v4504_v57 = vld [vmem:[%s5193_s16 + $0xa0] sm:$0xff] }
 0x257   : > { %v4125_v61 = vclamps-f32 %v1694_v25, 1.0  ;;  %v2020_v28 = vadd.f32 0.00028619796, %v2019_v7  ;;  %v5871_v38 = vmul.f32 0.70710677, %v5846_v14  ;;  %v1613_v58 = vsel %vm5818_vm3, %v5764_v16, %v1608_v41  ;;  %3527 = vmatpush.bf16.msra.mxu2 %v4504_v57  ;;  %3550 = vmatpush.bf16.msra.mxu3 %v4512_v21  ;;  %v4503_v7 = vld [vmem:[%s5193_s16 + $0x98] sm:$0xff] }
 0x258   : > { %7493 = vst [vmem:[#allocation30_spill] sm:$0xff] %v5862_v11  ;;  %vm5866_vm10 = vcmp.eq.f32.partialorder %v7494_v40, 8.507059e+37  ;;  %v1729_v23 = vand.u32 2147483647, %v5790_v56  ;;  %v1731_v10 = vand.u32 2147483648, %v5790_v56  ;;  %v1981_v45 = vmul.f32 %v1980_v63, %v5792_v17  ;;  %v4495_v63 = vld [vmem:[%s5193_s16 + $0x58] sm:$0xff] }
 0x259   : > { %7497 = vst [vmem:[#allocation31_spill] sm:$0xff] %v5871_v38  ;;  %v2867_v34 = vadd.f32 1.0, %v4125_v61  ;;  %v1723_v16 = vmul.f32 %v5850_v36, %v1722_v37  ;;  %vm1726_vm12 = vweird.f32 %v5850_v36  ;;  %v2257_v41 = vmul.f32 %v5871_v38, %v5871_v38  ;;  %3505 = vmatpush.bf16.msra.mxu1 %v4495_v63  ;;  %v4494_v57 = vld [vmem:[%s5193_s16 + $0x50] sm:$0xff] }
 0x25a   : > { %v1648_v25 = vsel %vm5886_vm11, %v5749_v35, %v5859_v26  ;;  %vm1725_vm13 = vweird.f32 %v5790_v56  ;;  %v1942_v30 = vadd.f32 0.0036580483, %v1941_v12  ;;  %v2219_v40 = vmul.f32 2.1237322e-06, %v5862_v11  ;;  %v4511_v35 = vld [vmem:[%s5193_s16 + $0xd8] sm:$0xff] }
 0x25b   : > { %v5902_v61 = vmul.f32 %v2867_v34, %v5545_v43  ;;  %v1724_v37 = vadd.f32 %v5850_v36, %v1723_v16  ;;  %v2021_v38 = vmul.f32 %v2020_v28, %v5838_v0  ;;  %v5906_v6 = vmin.f32 %v2257_v41, 16.0  ;;  %vm1727_vm14 = vmor %vm1725_vm13, %vm1726_vm12  ;;  %v4486_v43 = vld [vmem:[%s5193_s16 + $0x10] sm:$0xff]  ;;  %3528 = vmatpush.bf16.msra.mxu2 %v4503_v7  ;;  %3551 = vmatpush.bf16.msra.mxu3 %v4511_v35 }
 0x25c   : > { %v1709_v56 = vmul.f32 %v1708_v29, %v5565_v60  ;;  %vm1730_vm15 = vcmp.eq.f32.partialorder %v1729_v23, 8.507059e+37  ;;  %v1732_v26 = vor.u32 1.1754944e-38, %v1731_v10  ;;  %v1982_v12 = vadd.f32 0.0036580483, %v1981_v45  ;;  %3483 = vmatpush.bf16.msra.mxu0 %v4486_v43 }
 0x25d   : > { %7500 = vst [vmem:[#allocation32_spill] sm:$0xff] %v5906_v6  ;;  %v1728_v28 = vsel %vm1727_vm14, %v5850_v36, %v1724_v37  ;;  %v2259_v34 = vmul.f32 2.1237322e-06, %v5906_v6  ;;  %v5921_v51 = vadd.f32 %v5712_v3, %v5390_v53  ;;  %v7501_v60 = vand.u32 2147483648, %v5675_v22  ;;  %3506 = vmatpush.bf16.msra.mxu1 %v4494_v57 }
 0x25e   : > { %v1733_v16 = vsel %vm1730_vm15, %v1732_v26, %v1728_v28  ;;  %v1903_v23 = vmul.f32 %v1902_v48, %v5734_v20  ;;  %v2220_v10 = vadd.f32 0.00028619796, %v2219_v40  ;;  %v1614_v45 = vmul.f32 %v1613_v58, %v5744_v24 }
 0x25f   : > { %v1652_v29 = vor.u32 1.1754944e-38, %v7501_v60  ;;  %v1734_v41 = vmul.f32 %v1733_v16, %v1709_v56  ;;  %v1943_v36 = vmul.f32 %v1942_v30, %v5781_v19  ;;  %v2022_v63 = vadd.f32 0.0036580483, %v2021_v38 }
 0x260   : > { %v4115_v3 = vclamps-f32 %v5738_v4, 1.0  ;;  %v7502_v37 = vclamps-f32 %v5731_v49, 1.0  ;;  %v1983_v40 = vmul.f32 %v1982_v12, %v5792_v17  ;;  %v2260_v35 = vadd.f32 0.00028619796, %v2259_v34  ;;  %v4502_v12 = vld [vmem:[%s5193_s16 + $0x90] sm:$0xff] }
 0x261   : > { %v1653_v48 = vsel %vm5866_vm10, %v1652_v29, %v1648_v25  ;;  %v4126_v7 = vclamps-f32 %v1734_v41, 1.0  ;;  %v5935_v24 = vmul.f32 0.70710677, %v5921_v51  ;;  %v5939_v38 = vadd.f32 %v5720_v2, %v5394_v55  ;;  %v4510_v34 = vld [vmem:[%s5193_s16 + $0xd0] sm:$0xff]  ;;  %3529 = vmatpush.bf16.msra.mxu2 %v4502_v12 }
 0x262   : > { %v2860_v22 = vadd.f32 1.0, %v7502_v37  ;;  %v1629_v49 = vmul.f32 %v5778_v5, %v5475_v31  ;;  %v1188_v4 = vmul.f32 0.5, %v5515_v8  ;;  %v1904_v58 = vadd.f32 0.05243302, %v1903_v23  ;;  %3552 = vmatpush.bf16.msra.mxu3 %v4510_v34 }
 0x263   : > { %7503 = vst [vmem:[#allocation33_spill] sm:$0xff] %v5935_v24  ;;  %v2221_v33 = vmul.f32 %v2220_v10, %v5862_v11  ;;  %v4123_v25 = vclamps-f32 %v1614_v45, 1.0  ;;  %v2868_v30 = vadd.f32 1.0, %v4126_v7  ;;  %v1944_v56 = vadd.f32 0.05243302, %v1943_v36 }
 0x264   : > { %v2023_v26 = vmul.f32 %v2022_v63, %v5838_v0  ;;  %v4116_v43 = vclamps-f32 %v5741_v13, 1.0  ;;  %v5949_v57 = vmul.f32 %v2860_v22, %v5504_v59  ;;  %v1654_v2 = vmul.f32 %v1653_v48, %v1629_v49 }
 0x265   : > { %v1984_v28 = vadd.f32 0.05243302, %v1983_v40  ;;  %v5952_v31 = vmul.f32 %v2868_v30, %v1188_v4  ;;  %v2261_v8 = vmul.f32 %v2260_v35, %v5906_v6  ;;  %v2297_v5 = vmul.f32 %v5935_v24, %v5935_v24 }
 0x266   : > { %v5958_v60 = vmul.f32 0.70710677, %v5939_v38  ;;  %v2857_v29 = vadd.f32 1.0, %v4115_v3  ;;  %v1905_v13 = vmul.f32 %v1904_v58, %v5734_v20  ;;  %v2222_v16 = vadd.f32 0.0036580483, %v2221_v33 }
 0x267   : > { %v5963_v59 = vadd.f32 %v5703_v62, %v5374_v46  ;;  %v2865_v23 = vadd.f32 1.0, %v4123_v25  ;;  %v1945_v45 = vmul.f32 %v1944_v56, %v5781_v19  ;;  %v2024_v41 = vadd.f32 0.05243302, %v2023_v26 }
 0x268   : > { %7504 = vst [vmem:[#allocation34_spill] sm:$0xff] %v5958_v60  ;;  %v1178_v36 = vmul.f32 0.5, %v5382_v50  ;;  %v2858_v63 = vadd.f32 1.0, %v4116_v43  ;;  %v1185_v3 = vmul.f32 0.5, %v5434_v27  ;;  %v4124_v37 = vclamps-f32 %v1654_v2, 1.0 }
 0x269   : > { %v1985_v22 = vmul.f32 %v1984_v28, %v5792_v17  ;;  %v2262_v48 = vadd.f32 0.0036580483, %v2261_v8  ;;  %v5971_v40 = vmin.f32 %v2297_v5, 16.0  ;;  %v2337_v46 = vmul.f32 %v5958_v60, %v5958_v60 }
 0x26a   : > { %v1186_v62 = vmul.f32 0.5, %v5465_v18  ;;  %v1906_v7 = vadd.f32 0.18741608, %v1905_v13  ;;  %v2223_v35 = vmul.f32 %v2222_v16, %v5862_v11  ;;  %v5978_v49 = vmul.f32 0.70710677, %v5963_v59 }
 0x26b   : > { %7505 = vst [vmem:[#allocation35_spill] sm:$0xff] %v5971_v40  ;;  %v5981_v50 = vmul.f32 %v2857_v29, %v5494_v54  ;;  %v5983_v27 = vmul.f32 %v2865_v23, %v1185_v3  ;;  %v1946_v4 = vadd.f32 0.18741608, %v1945_v45  ;;  %v2025_v58 = vmul.f32 %v2024_v41, %v5838_v0  ;;  %v1094_v29 = vpop.f32.mrf.mxu0  ;;  %v6021_v23 = vld [vmem:[%s369_s15] sm:$0xff] }
 0x26c   : > { %7506 = vst [vmem:[#allocation36_spill] sm:$0xff] %v5978_v49  ;;  %v5986_v33 = vmul.f32 %v2858_v63, %v1178_v36  ;;  %v2866_v25 = vadd.f32 1.0, %v4124_v37  ;;  %v5989_v30 = vmul.f32 0.5, %v5650_v39  ;;  %v5992_v18 = vmul.f32 0.5, %v5698_v32 }
 0x26d   : > { %v1986_v56 = vadd.f32 0.18741608, %v1985_v22  ;;  %v2263_v26 = vmul.f32 %v2262_v48, %v5906_v6  ;;  %v2299_v54 = vmul.f32 2.1237322e-06, %v5971_v40  ;;  %v5996_v12 = vmin.f32 %v2337_v46, 16.0 }
 0x26e   : > { %7507 = vst [vmem:[#allocation37_spill] sm:$0xff] %v5989_v30  ;;  %v1907_v43 = vmul.f32 %v1906_v7, %v5734_v20  ;;  %v6000_v2 = vmul.f32 0.5, %v5729_v1  ;;  %v2224_v28 = vadd.f32 0.05243302, %v2223_v35  ;;  %v2537_v39 = vmul.f32 %v5978_v49, %v5978_v49 }
 0x26f   : > { %7508 = vst [vmem:[#allocation38_spill] sm:$0xff] %v5992_v18  ;;  %v1947_v34 = vmul.f32 %v1946_v4, %v5781_v19  ;;  %v2026_v8 = vadd.f32 0.18741608, %v2025_v58  ;;  %v6009_v5 = vadd.f32 %v5723_v9, %v5376_v47  ;;  %v6011_v13 = vmul.f32 %v2866_v25, %v1186_v62  ;;  %v1117_v58 = vpop.f32.mrf.mxu1  ;;  %v7526_v62 = vld [vmem:[#allocation27_spill] sm:$0xff] }
 0x270   : > { %7509 = vst [vmem:[#allocation39_spill] sm:$0xff] %v5996_v12  ;;  %v6014_v1 = vmul.f32 0.5, %v5774_v15  ;;  %v6017_v16 = vmul.f32 0.5, %v5807_v42  ;;  %v6024_v45 = vperm.slane %v6021_v23, 4  ;;  %v1987_v41 = vmul.f32 %v1986_v56, %v5792_v17 }
 0x271   : > { %7510 = vst [vmem:[#allocation40_spill] sm:$0xff] %v6000_v2  ;;  %v2264_v36 = vadd.f32 0.05243302, %v2263_v26  ;;  %v2300_v47 = vadd.f32 0.00028619796, %v2299_v54  ;;  %v2225_v3 = vmul.f32 %v2224_v28, %v5862_v11  ;;  %v6029_v15 = vmin.f32 %v2537_v39, 16.0 }
 0x272   : > { %7511 = vst [vmem:[#allocation41_spill] sm:$0xff] %v6014_v1  ;;  %v2339_v9 = vmul.f32 2.1237322e-06, %v5996_v12  ;;  %v1908_v63 = vadd.f32 1.1283791, %v1907_v43  ;;  %v6032_v42 = vadd.f32 %v1094_v29, %v6024_v45  ;;  %v2027_v22 = vmul.f32 %v2026_v8, %v5838_v0  ;;  %v7516_v43 = vld [vmem:[#allocation20_spill] sm:$0xff] }
 0x273   : > { %7512 = vst [vmem:[#allocation42_spill] sm:$0xff] %v6017_v16  ;;  %v1948_v37 = vadd.f32 1.1283791, %v1947_v34  ;;  %v6036_v48 = vmul.f32 0.70710677, %v6009_v5  ;;  %v6039_v46 = vperm.slane %v6021_v23, 5  ;;  %v1059_v4 = vadd.f32 %v5794_v44, %v5390_v53 }
 0x274   : > { %v6044_v7 = vmul.f32 0.5, %v5846_v14  ;;  %v6047_v35 = vmul.f32 0.5, %v5921_v51  ;;  %v1988_v25 = vadd.f32 1.1283791, %v1987_v41  ;;  %v2265_v56 = vmul.f32 %v2264_v36, %v5906_v6  ;;  %v7518_v51 = vld [vmem:[#allocation21_spill] sm:$0xff] }
 0x275   : > { %7513 = vst [vmem:[#allocation43_spill] sm:$0xff] %v6036_v48  ;;  %v2301_v26 = vmul.f32 %v2300_v47, %v5971_v40  ;;  %v2340_v54 = vadd.f32 0.00028619796, %v2339_v9  ;;  %v6054_v28 = vmul.f32 %v1908_v63, %v7516_v43  ;;  %v2226_v39 = vadd.f32 0.18741608, %v2225_v3  ;;  %v7522_v47 = vld [vmem:[#allocation26_spill] sm:$0xff] }
 0x276   : > { %7514 = vst [vmem:[#allocation44_spill] sm:$0xff] %v6044_v7  ;;  %v2539_v14 = vmul.f32 2.1237322e-06, %v6029_v15  ;;  %v6058_v34 = vmul.f32 0.70710677, %v6032_v42  ;;  %v6061_v8 = vmul.f32 %v1948_v37, %v7518_v51  ;;  %v2577_v44 = vmul.f32 %v6036_v48, %v6036_v48 }
 0x277   : > { %7515 = vst [vmem:[#allocation45_spill] sm:$0xff] %v6047_v35  ;;  %v2028_v53 = vadd.f32 1.1283791, %v2027_v22  ;;  %v6066_v29 = vadd.f32 %v1117_v58, %v6039_v46  ;;  %v6069_v41 = vmul.f32 0.5, %v5939_v38  ;;  %v6071_v36 = vmul.f32 0.70710677, %v1059_v4 }
 0x278   : > { %7517 = vst [vmem:[#allocation20_spill] sm:$0xff] %v6054_v28  ;;  %v1082_v9 = vadd.f32 %v7522_v47, %v5394_v55  ;;  %v1417_v63 = vmul.f32 %v6058_v34, %v6058_v34  ;;  %v2266_v3 = vadd.f32 0.18741608, %v2265_v56  ;;  %v2302_v37 = vadd.f32 0.0036580483, %v2301_v26  ;;  %v7524_v58 = vld [vmem:[#allocation23_spill] sm:$0xff] }
 0x279   : > { %7519 = vst [vmem:[#allocation21_spill] sm:$0xff] %v6061_v8  ;;  %v2341_v22 = vmul.f32 %v2340_v54, %v5996_v12  ;;  %v6079_v43 = vmul.f32 0.5, %v5963_v59  ;;  %v6082_v51 = vmul.f32 %v1988_v25, %v7524_v58  ;;  %v2227_v38 = vmul.f32 %v2226_v39, %v5862_v11  ;;  %v1096_v8 = vpop.f32.mrf.mxu0 }
 0x27a   : > { %7520 = vst [vmem:[#allocation46_spill] sm:$0xff] %v6069_v41  ;;  %v2540_v10 = vadd.f32 0.00028619796, %v2539_v14  ;;  %v6085_v21 = vmin.f32 %v1417_v63, 16.0  ;;  %v6088_v55 = vmul.f32 %v2028_v53, %v7526_v62  ;;  %v6090_v47 = vmin.f32 %v2577_v44, 16.0  ;;  %v1140_v14 = vpop.f32.mrf.mxu2 }
 0x27b   : > { %7521 = vst [vmem:[#allocation47_spill] sm:$0xff] %v6071_v36  ;;  %v6093_v56 = vmul.f32 0.70710677, %v6066_v29  ;;  %v6096_v26 = vperm.slane %v6021_v23, 6  ;;  %v2617_v59 = vmul.f32 %v6071_v36, %v6071_v36  ;;  %v6100_v25 = vmul.f32 0.70710677, %v1082_v9 }
 0x27c   : > { %7523 = vst [vmem:[#allocation26_spill] sm:$0xff] %v6079_v43  ;;  %v1419_v54 = vmul.f32 2.1237322e-06, %v6085_v21  ;;  %v1430_v39 = vmul.f32 3.8918573e-05, %v6085_v21  ;;  %v2267_v62 = vmul.f32 %v2266_v3, %v5906_v6  ;;  %v2303_v53 = vmul.f32 %v2302_v37, %v5971_v40 }
 0x27d   : > { %7525 = vst [vmem:[#allocation23_spill] sm:$0xff] %v6082_v51  ;;  %v2342_v44 = vadd.f32 0.0036580483, %v2341_v22  ;;  %v1457_v63 = vmul.f32 %v6093_v56, %v6093_v56  ;;  %v2228_v58 = vadd.f32 1.1283791, %v2227_v38  ;;  %v2541_v32 = vmul.f32 %v2540_v10, %v6029_v15 }
 0x27e   : > { %7527 = vst [vmem:[#allocation27_spill] sm:$0xff] %v6088_v55  ;;  %v6110_v43 = vmul.f32 0.5, %v6009_v5  ;;  %v1431_v41 = vadd.f32 0.001143296, %v1430_v39  ;;  %v2579_v1 = vmul.f32 2.1237322e-06, %v6090_v47  ;;  %v6116_v3 = vadd.f32 %v1140_v14, %v6096_v26 }
 0x27f   : > { %7528 = vst [vmem:[#allocation48_spill] sm:$0xff] %v6100_v25  ;;  %v1420_v55 = vadd.f32 0.00028619796, %v1419_v54  ;;  %v6113_v35 = vmin.f32 %v1457_v63, 16.0  ;;  %v6118_v37 = vmul.f32 0.5, %v1059_v4  ;;  %v6120_v22 = vmin.f32 %v2617_v59, 16.0 }
 0x280   : > { %7529 = vst [vmem:[#allocation49_spill] sm:$0xff] %v6110_v43  ;;  %v2657_v38 = vmul.f32 %v6100_v25, %v6100_v25  ;;  %v1432_v10 = vmul.f32 %v1431_v41, %v6085_v21  ;;  %v6125_v5 = vadd.f32 1.1283791, %v2267_v62  ;;  %v2304_v39 = vadd.f32 0.05243302, %v2303_v53  ;;  %v7531_v14 = vld [vmem:[#allocation29_spill] sm:$0xff] }
 0x281   : > { %7530 = vst [vmem:[#allocation50_spill] sm:$0xff] %v6118_v37  ;;  %v2343_v54 = vmul.f32 %v2342_v44, %v5996_v12  ;;  %v1470_v63 = vmul.f32 3.8918573e-05, %v6113_v35  ;;  %v6130_v43 = vmul.f32 %v2228_v58, %v7531_v14  ;;  %v2542_v4 = vadd.f32 0.0036580483, %v2541_v32  ;;  %v4485_v14 = vld [vmem:[%s5193_s16 + $0x8] sm:$0xff] }
 0x282   : > { %v1433_v59 = vadd.f32 0.014752088, %v1432_v10  ;;  %v1459_v37 = vmul.f32 2.1237322e-06, %v6113_v35  ;;  %v2580_v2 = vadd.f32 0.00028619796, %v2579_v1  ;;  %v1421_v51 = vmul.f32 %v1420_v55, %v6085_v21  ;;  %3484 = vmatpush.bf16.msra.mxu0 %v4485_v14 }
 0x283   : > { %7532 = vst [vmem:[#allocation29_spill] sm:$0xff] %v6130_v43  ;;  %v1471_v41 = vadd.f32 0.001143296, %v1470_v63  ;;  %v6135_v62 = vmul.f32 0.70710677, %v6116_v3  ;;  %v6138_v7 = vmul.f32 0.5, %v1082_v9  ;;  %v1163_v63 = vpop.f32.mrf.mxu3  ;;  %v2305_v9 = vmul.f32 %v2304_v39, %v5971_v40 }
 0x284   : > { %v2619_v53 = vmul.f32 2.1237322e-06, %v6120_v22  ;;  %v6140_v44 = vmin.f32 %v2657_v38, 16.0  ;;  %v1434_v58 = vmul.f32 %v1433_v59, %v6085_v21  ;;  %v4493_v32 = vld [vmem:[%s5193_s16 + $0x48] sm:$0xff]  ;;  %v2344_v10 = vadd.f32 0.05243302, %v2343_v54 }
 0x285   : > { %7533 = vst [vmem:[#allocation51_spill] sm:$0xff] %v6138_v7  ;;  %v1472_v18 = vmul.f32 %v1471_v41, %v6113_v35  ;;  %v1497_v1 = vmul.f32 %v6135_v62, %v6135_v62  ;;  %v6149_v55 = vperm.slane %v6021_v23, 7  ;;  %v2543_v38 = vmul.f32 %v2542_v4, %v6029_v15  ;;  %3507 = vmatpush.bf16.msra.mxu1 %v4493_v32  ;;  %v4484_v4 = vld [vmem:[%s5193_s16] sm:$0xff] }
 0x286   : > { %7534 = vst [vmem:[#allocation52_spill] sm:$0xff] %v6140_v44  ;;  %v1435_v7 = vadd.f32 0.112945676, %v1434_v58  ;;  %v1460_v59 = vadd.f32 0.00028619796, %v1459_v37  ;;  %v2581_v54 = vmul.f32 %v2580_v2, %v6090_v47  ;;  %v4492_v58 = vld [vmem:[%s5193_s16 + $0x40] sm:$0xff]  ;;  %3485 = vmatpush.bf16.msra.mxu0 %v4484_v4  ;;  %v2345_v17 = vmul.f32 %v2344_v10, %v5996_v12 }
 0x287   : > { %v1422_v41 = vadd.f32 0.0036580483, %v1421_v51  ;;  %v1473_v16 = vadd.f32 0.014752088, %v1472_v18  ;;  %v6154_v30 = vmin.f32 %v1497_v1, 16.0  ;;  %v6159_v39 = vadd.f32 %v1163_v63, %v6149_v55 }
 0x288   : > { %v2620_v23 = vadd.f32 0.00028619796, %v2619_v53  ;;  %v2659_v0 = vmul.f32 2.1237322e-06, %v6140_v44  ;;  %v1436_v43 = vmul.f32 %v1435_v7, %v6085_v21  ;;  %v6167_v18 = vadd.f32 %v1096_v8, %v6024_v45 }
 0x289   : > { %v1474_v37 = vmul.f32 %v1473_v16, %v6113_v35  ;;  %v1499_v14 = vmul.f32 2.1237322e-06, %v6154_v30  ;;  %v1510_v2 = vmul.f32 3.8918573e-05, %v6154_v30  ;;  %v2306_v51 = vadd.f32 0.18741608, %v2305_v9  ;;  %3508 = vmatpush.bf16.msra.mxu1 %v4492_v58 }
 0x28a   : > { %v2544_v53 = vadd.f32 0.05243302, %v2543_v38  ;;  %v1437_v32 = vadd.f32 0.4994258, %v1436_v43  ;;  %v1461_v7 = vmul.f32 %v1460_v59, %v6113_v35  ;;  %v2582_v1 = vadd.f32 0.0036580483, %v2581_v54 }
 0x28b   : > { %v1423_v63 = vmul.f32 %v1422_v41, %v6085_v21  ;;  %v1475_v16 = vadd.f32 0.112945676, %v1474_v37  ;;  %v1500_v28 = vadd.f32 0.00028619796, %v1499_v14  ;;  %v1511_v19 = vadd.f32 0.001143296, %v1510_v2 }
 0x28c   : > { %v1438_v6 = vmul.f32 %v1437_v32, %v6085_v21  ;;  %v6174_v8 = vmul.f32 0.70710677, %v6159_v39  ;;  %v4501_v9 = vld [vmem:[%s5193_s16 + $0x88] sm:$0xff]  ;;  %v2621_v43 = vmul.f32 %v2620_v23, %v6120_v22  ;;  %v2660_v59 = vadd.f32 0.00028619796, %v2659_v0 }
 0x28d   : > { %v4509_v38 = vld [vmem:[%s5193_s16 + $0xc8] sm:$0xff]  ;;  %v1476_v4 = vmul.f32 %v1475_v16, %v6113_v35  ;;  %v6181_v54 = vmul.f32 0.70710677, %v6167_v18  ;;  %v7535_v41 = vpack.c.bf16 %v5983_v27, %v5981_v50  ;;  %v7536_v10 = vpack.c.bf16 %v6011_v13, %v5986_v33  ;;  %3530 = vmatpush.bf16.msra.mxu2 %v4501_v9 }
 0x28e   : > { %v6189_v58 = vadd.f32 1.0, %v1438_v6  ;;  %v1462_v37 = vadd.f32 0.0036580483, %v1461_v7  ;;  %v1512_v14 = vmul.f32 %v1511_v19, %v6154_v30  ;;  %v1537_v0 = vmul.f32 %v6174_v8, %v6174_v8  ;;  %3553 = vmatpush.bf16.msra.mxu3 %v4509_v38 }
 0x28f   : > { %3486 = vmatmul.bf16.vlgmr.msra.gmra.mxu0 %v7535_v41  ;;  %3509 = vmatmul.bf16.vlgmr.msra.gmra.mxu1 %v7536_v10  ;;  %v2583_v23 = vmul.f32 %v2582_v1, %v6090_v47  ;;  %v1424_v2 = vadd.f32 0.05243302, %v1423_v63  ;;  %v1477_v32 = vadd.f32 0.4994258, %v1476_v4  ;;  %v1737_v50 = vmul.f32 %v6181_v54, %v6181_v54 }
 0x290   : > { %v6198_v27 = vmul.f32 %v2306_v51, %v5971_v40  ;;  %v6200_v6 = vadd.f32 0.18741608, %v2345_v17  ;;  %4693 = vrcp.f32 %v6189_v58  ;;  %v1501_v19 = vmul.f32 %v1500_v28, %v6154_v30 }
 0x291   : > { %v2545_v33 = vmul.f32 %v2544_v53, %v6029_v15  ;;  %v2622_v13 = vadd.f32 0.0036580483, %v2621_v43  ;;  %v2661_v7 = vmul.f32 %v2660_v59, %v6140_v44  ;;  %v1478_v1 = vmul.f32 %v1477_v32, %v6113_v35 }
 0x292   : > { %v1463_v63 = vmul.f32 %v1462_v37, %v6113_v35  ;;  %v1513_v16 = vadd.f32 0.014752088, %v1512_v14  ;;  %v6208_v9 = vmin.f32 %v1537_v0, 16.0  ;;  %v6210_v51 = vmin.f32 %v1737_v50, 16.0 }
 0x293   : > { %v2584_v17 = vadd.f32 0.05243302, %v2583_v23  ;;  %v6213_v38 = vmul.f32 0.5, %v6032_v42  ;;  %v1425_v28 = vmul.f32 %v1424_v2, %v6085_v21  ;;  %v6216_v4 = vadd.f32 1.0, %v1478_v1 }
 0x294   : > { %v1502_v53 = vadd.f32 0.0036580483, %v1501_v19  ;;  %v1514_v43 = vmul.f32 %v1513_v16, %v6154_v30  ;;  %v1539_v59 = vmul.f32 2.1237322e-06, %v6208_v9  ;;  %v1550_v41 = vmul.f32 3.8918573e-05, %v6208_v9 }
 0x295   : > { %v6221_v10 = vadd.f32 0.18741608, %v2545_v33  ;;  %v2662_v37 = vadd.f32 0.0036580483, %v2661_v7  ;;  %4695 = vrcp.f32 %v6216_v4  ;;  %v1739_v14 = vmul.f32 2.1237322e-06, %v6210_v51 }
 0x296   : > { %v6225_v42 = vpop.eup %4693  ;;  %v2623_v0 = vmul.f32 %v2622_v13, %v6120_v22  ;;  %v1464_v23 = vadd.f32 0.05243302, %v1463_v63  ;;  %v1515_v2 = vadd.f32 0.112945676, %v1514_v43  ;;  %v1540_v32 = vadd.f32 0.00028619796, %v1539_v59  ;;  %v1119_v59 = vpop.f32.mrf.mxu1 }
 0x297   : > { %v2585_v50 = vmul.f32 %v2584_v17, %v6090_v47  ;;  %v1441_v19 = vmul.f32 %v6225_v42, %v6189_v58  ;;  %v6232_v33 = vmul.f32 0.5, %v6066_v29  ;;  %v1551_v7 = vadd.f32 0.001143296, %v1550_v41 }
 0x298   : > { %v1426_v1 = vadd.f32 0.18741608, %v1425_v28  ;;  %v1503_v16 = vmul.f32 %v1502_v53, %v6154_v30  ;;  %v1516_v40 = vmul.f32 %v1515_v2, %v6154_v30  ;;  %v1541_v11 = vmul.f32 %v1540_v32, %v6208_v9 }
 0x299   : > { %v1442_v13 = vsub.f32 1.0, %v1441_v19  ;;  %v1552_v63 = vmul.f32 %v1551_v7, %v6208_v9  ;;  %v1740_v43 = vadd.f32 0.00028619796, %v1739_v14  ;;  %v1750_v17 = vmul.f32 3.8918573e-05, %v6210_v51 }
 0x29a   : > { %v2624_v25 = vadd.f32 0.05243302, %v2623_v0  ;;  %v2663_v36 = vmul.f32 %v2662_v37, %v6140_v44  ;;  %v1465_v29 = vmul.f32 %v1464_v23, %v6113_v35  ;;  %v1517_v41 = vadd.f32 0.4994258, %v1516_v40 }
 0x29b   : > { %v6241_v28 = vpop.eup %4695  ;;  %v1443_v53 = vmul.f32 %v6225_v42, %v1442_v13  ;;  %v1553_v2 = vadd.f32 0.014752088, %v1552_v63  ;;  %v1741_v32 = vmul.f32 %v1740_v43, %v6210_v51  ;;  %v1751_v19 = vadd.f32 0.001143296, %v1750_v17 }
 0x29c   : > { %v1427_v7 = vmul.f32 %v1426_v1, %v6085_v21  ;;  %v1481_v14 = vmul.f32 %v6241_v28, %v6216_v4  ;;  %v1518_v0 = vmul.f32 %v1517_v41, %v6154_v30  ;;  %v6250_v37 = vadd.f32 %v1119_v59, %v6039_v46 }
 0x29d   : > { %v1504_v23 = vadd.f32 0.05243302, %v1503_v16  ;;  %v1542_v40 = vadd.f32 0.0036580483, %v1541_v11  ;;  %v1554_v48 = vmul.f32 %v1553_v2, %v6208_v9  ;;  %v1742_v49 = vadd.f32 0.0036580483, %v1741_v32 }
 0x29e   : > { %v1466_v13 = vadd.f32 0.18741608, %v1465_v29  ;;  %v1482_v63 = vsub.f32 1.0, %v1481_v14  ;;  %v6253_v60 = vadd.f32 1.0, %v1518_v0  ;;  %v1752_v43 = vmul.f32 %v1751_v19, %v6210_v51 }
 0x29f   : > { %v1444_v21 = vadd.f32 %v6225_v42, %v1443_v53  ;;  %vm1446_vm0 = vweird.f32 %v6225_v42  ;;  %v1555_v1 = vadd.f32 0.112945676, %v1554_v48  ;;  %v1743_v17 = vmul.f32 %v1742_v49, %v6210_v51  ;;  %v1142_v48 = vpop.f32.mrf.mxu2 }
 0x2a0   : > { %v6259_v59 = vadd.f32 0.18741608, %v2585_v50  ;;  %vm1445_vm1 = vweird.f32 %v6189_v58  ;;  %v1449_v11 = vand.u32 2147483647, %v6189_v58  ;;  %v1451_v16 = vand.u32 2147483648, %v6189_v58 }
 0x2a1   : > { %v1483_v29 = vmul.f32 %v6241_v28, %v1482_v63  ;;  %v1505_v41 = vmul.f32 %v1504_v23, %v6154_v30  ;;  %v1543_v2 = vmul.f32 %v1542_v40, %v6208_v9  ;;  %v6268_v53 = vmul.f32 0.70710677, %v6250_v37  ;;  %vm6270_vm2 = vmor %vm1445_vm1, %vm1446_vm0 }
 0x2a2   : > { %4697 = vrcp.f32 %v6253_v60  ;;  %v1556_v49 = vmul.f32 %v1555_v1, %v6208_v9  ;;  %v1744_v50 = vadd.f32 0.05243302, %v1743_v17  ;;  %v1753_v32 = vadd.f32 0.014752088, %v1752_v43 }
 0x2a3   : > { %v2625_v58 = vmul.f32 %v2624_v25, %v6120_v22  ;;  %v1428_v19 = vadd.f32 1.1283791, %v1427_v7  ;;  %v1448_v14 = vsel %vm6270_vm2, %v6225_v42, %v1444_v21  ;;  %v1467_v0 = vmul.f32 %v1466_v13, %v6113_v35 }
 0x2a4   : > { %vm1450_vm3 = vcmp.eq.f32.partialorder %v1449_v11, 8.507059e+37  ;;  %v1452_v23 = vor.u32 1.1754944e-38, %v1451_v16  ;;  %v1557_v40 = vadd.f32 0.4994258, %v1556_v49  ;;  %v1754_v63 = vmul.f32 %v1753_v32, %v6210_v51 }
 0x2a5   : > { %vm1486_vm4 = vweird.f32 %v6241_v28  ;;  %v1506_v24 = vadd.f32 0.18741608, %v1505_v41  ;;  %v1544_v1 = vadd.f32 0.05243302, %v1543_v2  ;;  %v1777_v43 = vmul.f32 %v6268_v53, %v6268_v53 }
 0x2a6   : > { %v1453_v25 = vsel %vm1450_vm3, %v1452_v23, %v1448_v14  ;;  %v1484_v7 = vadd.f32 %v6241_v28, %v1483_v29  ;;  %v1745_v17 = vmul.f32 %v1744_v50, %v6210_v51  ;;  %v1755_v42 = vadd.f32 0.112945676, %v1754_v63 }
 0x2a7   : > { %v2664_v21 = vadd.f32 0.05243302, %v2663_v36  ;;  %v1429_v35 = vmul.f32 %v1428_v19, %v6058_v34  ;;  %v6289_v13 = vmul.f32 0.5, %v6116_v3  ;;  %v1558_v11 = vmul.f32 %v1557_v40, %v6208_v9 }
 0x2a8   : > { %v6292_v16 = vpop.eup %4697  ;;  %v6294_v41 = vadd.f32 0.18741608, %v2625_v58  ;;  %vm1485_vm5 = vweird.f32 %v6216_v4  ;;  %v1491_v2 = vand.u32 2147483648, %v6216_v4  ;;  %v1756_v29 = vmul.f32 %v1755_v42, %v6210_v51  ;;  %v1165_v42 = vpop.f32.mrf.mxu3 }
 0x2a9   : > { %v1454_v36 = vmul.f32 %v1453_v25, %v1429_v35  ;;  %vm6301_vm6 = vmor %vm1485_vm5, %vm1486_vm4  ;;  %v1489_v3 = vand.u32 2147483647, %v6216_v4  ;;  %v1507_v49 = vmul.f32 %v1506_v24, %v6154_v30  ;;  %v6307_v50 = vmin.f32 %v1777_v43, 16.0  ;;  %v4500_v24 = vld [vmem:[%s5193_s16 + $0x80] sm:$0xff] }
 0x2aa   : > { %7539 = vst [vmem:[#allocation53_spill] sm:$0xff] %v6294_v41  ;;  %v1468_v32 = vadd.f32 1.1283791, %v1467_v0  ;;  %v1488_v58 = vsel %vm6301_vm6, %v6241_v28, %v1484_v7  ;;  %v1545_v19 = vmul.f32 %v1544_v1, %v6208_v9  ;;  %v1746_v14 = vadd.f32 0.18741608, %v1745_v17  ;;  %v4508_v43 = vld [vmem:[%s5193_s16 + $0xc0] sm:$0xff]  ;;  %3531 = vmatpush.bf16.msra.mxu2 %v4500_v24 }
 0x2ab   : > { %v1521_v23 = vmul.f32 %v6292_v16, %v6253_v60  ;;  %v6315_v40 = vadd.f32 1.0, %v1558_v11  ;;  %v1757_v63 = vadd.f32 0.4994258, %v1756_v29  ;;  %v6318_v4 = vadd.f32 %v1142_v48, %v6096_v26  ;;  %3554 = vmatpush.bf16.msra.mxu3 %v4508_v43 }
 0x2ac   : > { %v6323_v30 = vmul.f32 %v6200_v6, %v5996_v12  ;;  %v1492_v0 = vor.u32 1.1754944e-38, %v1491_v2  ;;  %v1779_v28 = vmul.f32 2.1237322e-06, %v6307_v50  ;;  %v1790_v1 = vmul.f32 3.8918573e-05, %v6307_v50 }
 0x2ad   : > { %v4119_v25 = vclamps-f32 %v1454_v36, 1.0  ;;  %vm1490_vm7 = vcmp.eq.f32.partialorder %v1489_v3, 8.507059e+37  ;;  %v1508_v7 = vadd.f32 1.1283791, %v1507_v49  ;;  %v1758_v17 = vmul.f32 %v1757_v63, %v6210_v51 }
 0x2ae   : > { %7542 = vst [vmem:[#allocation54_spill] sm:$0xff] %v6323_v30  ;;  %v1493_v35 = vsel %vm1490_vm7, %v1492_v0, %v1488_v58  ;;  %v1546_v11 = vadd.f32 0.18741608, %v1545_v19  ;;  %v1780_v29 = vadd.f32 0.00028619796, %v1779_v28  ;;  %v1522_v6 = vsub.f32 1.0, %v1521_v23 }
 0x2af   : > { %v1791_v48 = vadd.f32 0.001143296, %v1790_v1  ;;  %4699 = vrcp.f32 %v6315_v40  ;;  %v6330_v2 = vadd.f32 1.0, %v1758_v17  ;;  %v6333_v34 = vmul.f32 0.70710677, %v6318_v4 }
 0x2b0   : > { %v1747_v36 = vmul.f32 %v1746_v14, %v6210_v51  ;;  %v1781_v3 = vmul.f32 %v1780_v29, %v6307_v50  ;;  %v6339_v58 = vadd.f32 %v1165_v42, %v6149_v55  ;;  %v7543_v19 = vpack.c.bf16 %v5902_v61, %v5761_v52  ;;  %v6387_v29 = vpop.f32.mrf.mxu1 }
 0x2b1   : > { %v1792_v49 = vmul.f32 %v1791_v48, %v6307_v50  ;;  %v6345_v23 = vmul.f32 %v2664_v21, %v6140_v44  ;;  %v1469_v63 = vmul.f32 %v1468_v32, %v6093_v56  ;;  %v6349_v24 = vmul.f32 0.5, %v6167_v18 }
 0x2b2   : > { %3532 = vmatmul.bf16.vlgmr.msra.gmra.mxu2 %v7543_v19  ;;  %4701 = vrcp.f32 %v6330_v2  ;;  %v7544_v51 = vpack.c.bf16 %v5952_v31, %v5949_v57  ;;  %v2861_v14 = vadd.f32 1.0, %v4119_v25  ;;  %v1531_v0 = vand.u32 2147483648, %v6253_v60 }
 0x2b3   : > { %v1547_v52 = vmul.f32 %v1546_v11, %v6208_v9  ;;  %v1782_v61 = vadd.f32 0.0036580483, %v1781_v3  ;;  %v6357_v28 = vmul.f32 %v1493_v35, %v1469_v63  ;;  %v1523_v21 = vmul.f32 %v6292_v16, %v1522_v6  ;;  %v1099_v11 = vpop.f32.mrf.mxu0 }
 0x2b4   : > { %3555 = vmatmul.bf16.vlgmr.msra.gmra.mxu3 %v7544_v51  ;;  %v1793_v56 = vadd.f32 0.014752088, %v1792_v49  ;;  %v1817_v18 = vmul.f32 %v6333_v34, %v6333_v34  ;;  %v6363_v32 = vmul.f32 %v1508_v7, %v6135_v62  ;;  %v1748_v1 = vadd.f32 1.1283791, %v1747_v36 }
 0x2b5   : > { %v6366_v57 = vmul.f32 0.5, %v6250_v37  ;;  %v6369_v31 = vmul.f32 0.70710677, %v6339_v58  ;;  %v6371_v9 = vpop.eup %4699  ;;  %v1529_v43 = vand.u32 2147483647, %v6253_v60  ;;  %v1783_v25 = vmul.f32 %v1782_v61, %v6307_v50 }
 0x2b6   : > { %v1794_v17 = vmul.f32 %v1793_v56, %v6307_v50  ;;  %v6376_v42 = vmin.f32 %v1817_v18, 16.0  ;;  %v6379_v62 = vmul.f32 %v2861_v14, %v6213_v38  ;;  %v6381_v7 = vor.u32 1.1754944e-38, %v1531_v0 }
 0x2b7   : > { %v6383_v37 = vadd.f32 1.1283791, %v1547_v52  ;;  %v1857_v35 = vmul.f32 %v6369_v31, %v6369_v31  ;;  %v4120_v6 = vclamps-f32 %v6357_v28, 1.0  ;;  %v6391_v36 = vadd.f32 %v6292_v16, %v1523_v21 }
 0x2b8   : > { %7545 = vst [vmem:[#allocation55_spill] sm:$0xff] %v6379_v62  ;;  %v4702_v48 = vpop.eup %4701  ;;  %vm1526_vm8 = vweird.f32 %v6292_v16  ;;  %v1795_v38 = vadd.f32 0.112945676, %v1794_v17  ;;  %v1819_v3 = vmul.f32 2.1237322e-06, %v6376_v42  ;;  %v1561_v49 = vmul.f32 %v6371_v9, %v6315_v40 }
 0x2b9   : > { %v1749_v19 = vmul.f32 %v1748_v1, %v6181_v54  ;;  %v1761_v63 = vmul.f32 %v4702_v48, %v6330_v2  ;;  %v1830_v51 = vmul.f32 3.8918573e-05, %v6376_v42  ;;  %vm1525_vm9 = vweird.f32 %v6253_v60 }
 0x2ba   : > { %v1784_v14 = vadd.f32 0.05243302, %v1783_v25  ;;  %v1796_v0 = vmul.f32 %v1795_v38, %v6307_v50  ;;  %v1820_v52 = vadd.f32 0.00028619796, %v1819_v3  ;;  %v6402_v61 = vmin.f32 %v1857_v35, 16.0  ;;  %vm6439_vm15 = vmor %vm1525_vm9, %vm1526_vm8 }
 0x2bb   : > { %v1762_v28 = vsub.f32 1.0, %v1761_v63  ;;  %vm1765_vm10 = vweird.f32 %v6330_v2  ;;  %v1769_v21 = vand.u32 2147483647, %v6330_v2  ;;  %v1831_v56 = vadd.f32 0.001143296, %v1830_v51 }
 0x2bc   : > { %v1771_v54 = vand.u32 2147483648, %v6330_v2  ;;  %v1797_v18 = vadd.f32 0.4994258, %v1796_v0  ;;  %v1821_v1 = vmul.f32 %v1820_v52, %v6376_v42  ;;  %v1859_v17 = vmul.f32 2.1237322e-06, %v6402_v61 }
 0x2bd   : > { %v1763_v12 = vmul.f32 %v4702_v48, %v1762_v28  ;;  %vm1766_vm11 = vweird.f32 %v4702_v48  ;;  %v1832_v25 = vmul.f32 %v1831_v56, %v6376_v42  ;;  %v1870_v35 = vmul.f32 3.8918573e-05, %v6402_v61 }
 0x2be   : > { %vm6411_vm12 = vcmp.eq.f32.partialorder %v1529_v43, 8.507059e+37  ;;  %v1785_v3 = vmul.f32 %v1784_v14, %v6307_v50  ;;  %v1798_v63 = vmul.f32 %v1797_v18, %v6307_v50  ;;  %v1822_v51 = vadd.f32 0.0036580483, %v1821_v1  ;;  %vm1767_vm13 = vmor %vm1765_vm10, %vm1766_vm11  ;;  %v6427_v1 = vpop.f32.mrf.mxu1 }
 0x2bf   : > { %v1860_v0 = vadd.f32 0.00028619796, %v1859_v17  ;;  %v1562_v20 = vsub.f32 1.0, %v1561_v49  ;;  %v1764_v52 = vadd.f32 %v4702_v48, %v1763_v12  ;;  %v1833_v30 = vadd.f32 0.014752088, %v1832_v25  ;;  %v6425_v12 = vpop.f32.mrf.mxu0 }
 0x2c0   : > { %v1871_v44 = vadd.f32 0.001143296, %v1870_v35  ;;  %v1772_v28 = vor.u32 1.1754944e-38, %v1771_v54  ;;  %v6419_v56 = vadd.f32 1.0, %v1798_v63  ;;  %v1823_v43 = vmul.f32 %v1822_v51, %v6376_v42  ;;  %v4539_v35 = vld [vmem:[%s5193_s16 + $0x1b8] sm:$0xff] }
 0x2c1   : > { %v1861_v41 = vmul.f32 %v1860_v0, %v6402_v61  ;;  %v1768_v14 = vsel %vm1767_vm13, %v4702_v48, %v1764_v52  ;;  %vm1770_vm14 = vcmp.eq.f32.partialorder %v1769_v21, 8.507059e+37  ;;  %v1834_v18 = vmul.f32 %v1833_v30, %v6376_v42  ;;  %3616 = vmatpush.bf16.msrb.mxu2 %v4539_v35 }
 0x2c2   : > { %v1872_v49 = vmul.f32 %v1871_v44, %v6402_v61  ;;  %v1773_v2 = vsel %vm1770_vm14, %v1772_v28, %v1768_v14  ;;  %v1786_v17 = vadd.f32 0.18741608, %v1785_v3  ;;  %4703 = vrcp.f32 %v6419_v56 }
 0x2c3   : > { %v6431_v54 = vadd.f32 %v1099_v11, %v6024_v45  ;;  %v6433_v25 = vadd.f32 1.0, %v4120_v6  ;;  %v1571_v30 = vand.u32 2147483648, %v6315_v40  ;;  %v1774_v48 = vmul.f32 %v1773_v2, %v1749_v19  ;;  %v4547_v19 = vld [vmem:[%s5193_s16 + $0x1f8] sm:$0xff] }
 0x2c4   : > { %v1824_v21 = vadd.f32 0.05243302, %v1823_v43  ;;  %v1528_v11 = vsel %vm6439_vm15, %v6292_v16, %v6391_v36  ;;  %v1835_v6 = vadd.f32 0.112945676, %v1834_v18  ;;  %v1862_v3 = vadd.f32 0.0036580483, %v1861_v41  ;;  %3639 = vmatpush.bf16.msrb.mxu3 %v4547_v19 }
 0x2c5   : > { %v1873_v63 = vadd.f32 0.014752088, %v1872_v49  ;;  %v1563_v60 = vmul.f32 %v6371_v9, %v1562_v20  ;;  %vm1565_vm0 = vweird.f32 %v6315_v40  ;;  %v1569_v51 = vand.u32 2147483647, %v6315_v40  ;;  %v4523_v41 = vld [vmem:[%s5193_s16 + $0x138] sm:$0xff] }
 0x2c6   : > { %v4127_v0 = vclamps-f32 %v1774_v48, 1.0  ;;  %v1787_v52 = vmul.f32 %v1786_v17, %v6307_v50  ;;  %v1836_v28 = vmul.f32 %v1835_v6, %v6376_v42  ;;  %v6457_v16 = vmul.f32 0.70710677, %v6431_v54  ;;  %v4531_v36 = vld [vmem:[%s5193_s16 + $0x178] sm:$0xff]  ;;  %3570 = vmatpush.bf16.msrb.mxu0 %v4523_v41 }
 0x2c7   : > { %v1874_v43 = vmul.f32 %v1873_v63, %v6402_v61  ;;  %v1533_v20 = vsel %vm6411_vm12, %v6381_v7, %v1528_v11  ;;  %v1572_v14 = vor.u32 1.1754944e-38, %v1571_v30  ;;  %v1863_v49 = vmul.f32 %v1862_v3, %v6402_v61  ;;  %3593 = vmatpush.bf16.msrb.mxu1 %v4531_v36  ;;  %v6487_v19 = vpop.f32.mrf.mxu0  ;;  %v4538_v36 = vld [vmem:[%s5193_s16 + $0x1b0] sm:$0xff] }
 0x2c8   : > { %v2869_v18 = vadd.f32 1.0, %v4127_v0  ;;  %v4704_v2 = vpop.eup %4703  ;;  %vm1566_vm1 = vweird.f32 %v6371_v9  ;;  %v1825_v50 = vmul.f32 %v1824_v21, %v6376_v42  ;;  %v1837_v17 = vadd.f32 0.4994258, %v1836_v28  ;;  %v1145_v21 = vpop.f32.mrf.mxu2  ;;  %3617 = vmatpush.bf16.msrb.mxu2 %v4538_v36 }
 0x2c9   : > { %v1875_v44 = vadd.f32 0.112945676, %v1874_v43  ;;  %v1564_v48 = vadd.f32 %v6371_v9, %v1563_v60  ;;  %vm6468_vm2 = vcmp.eq.f32.partialorder %v1569_v51, 8.507059e+37  ;;  %v1801_v38 = vmul.f32 %v4704_v2, %v6419_v56  ;;  %vm6500_vm3 = vmor %vm1565_vm0, %vm1566_vm1 }
 0x2ca   : > { %v6473_v7 = vmul.f32 %v2869_v18, %v6349_v24  ;;  %v6478_v30 = vadd.f32 %v6387_v29, %v6039_v46  ;;  %v1788_v11 = vadd.f32 1.1283791, %v1787_v52  ;;  %v1838_v6 = vmul.f32 %v1837_v17, %v6376_v42  ;;  %v6489_v29 = vpop.f32.mrf.mxu1 }
 0x2cb   : > { %v1876_v3 = vmul.f32 %v1875_v44, %v6402_v61  ;;  %v2057_v63 = vmul.f32 %v6457_v16, %v6457_v16  ;;  %v1802_v24 = vsub.f32 1.0, %v1801_v38  ;;  %v1811_v51 = vand.u32 2147483648, %v6419_v56  ;;  %v4522_v38 = vld [vmem:[%s5193_s16 + $0x130] sm:$0xff] }
 0x2cc   : > { %7552 = vst [vmem:[#allocation56_spill] sm:$0xff] %v6473_v7  ;;  %v1864_v0 = vadd.f32 0.05243302, %v1863_v49  ;;  %v1826_v52 = vadd.f32 0.18741608, %v1825_v50  ;;  %v6491_v28 = vadd.f32 1.0, %v1838_v6  ;;  %v6494_v41 = vadd.f32 %v1145_v21, %v6096_v26  ;;  %3571 = vmatpush.bf16.msrb.mxu0 %v4522_v38 }
 0x2cd   : > { %v1877_v43 = vadd.f32 0.4994258, %v1876_v3  ;;  %v1803_v18 = vmul.f32 %v4704_v2, %v1802_v24  ;;  %vm1806_vm4 = vweird.f32 %v4704_v2  ;;  %v1809_v49 = vand.u32 2147483647, %v6419_v56 }
 0x2ce   : > { %v6506_v50 = vmul.f32 0.70710677, %v6478_v30  ;;  %v6509_v17 = vmul.f32 %v1533_v20, %v6363_v32  ;;  %v1568_v40 = vsel %vm6500_vm3, %v6371_v9, %v1564_v48  ;;  %4705 = vrcp.f32 %v6491_v28 }
 0x2cf   : > { %v6515_v44 = vmin.f32 %v2057_v63, 16.0  ;;  %v1804_v21 = vadd.f32 %v4704_v2, %v1803_v18  ;;  %vm1805_vm5 = vweird.f32 %v6419_v56  ;;  %v1865_v6 = vmul.f32 %v1864_v0, %v6402_v61  ;;  %v1168_v63 = vpop.f32.mrf.mxu3  ;;  %v4546_v56 = vld [vmem:[%s5193_s16 + $0x1f0] sm:$0xff] }
 0x2d0   : > { %v1878_v3 = vmul.f32 %v1877_v43, %v6402_v61  ;;  %vm6521_vm6 = vmor %vm1805_vm5, %vm1806_vm4  ;;  %v1812_v20 = vor.u32 1.1754944e-38, %v1811_v51  ;;  %v1827_v24 = vmul.f32 %v1826_v52, %v6376_v42  ;;  %v2097_v9 = vmul.f32 %v6506_v50, %v6506_v50  ;;  %3640 = vmatpush.bf16.msrb.mxu3 %v4546_v56 }
 0x2d1   : > { %v6529_v48 = vmul.f32 0.70710677, %v6494_v41  ;;  %v1789_v0 = vmul.f32 %v1788_v11, %v6268_v53  ;;  %v1808_v43 = vsel %vm6521_vm6, %v4704_v2, %v1804_v21  ;;  %vm1810_vm7 = vcmp.eq.f32.partialorder %v1809_v49, 8.507059e+37  ;;  %v1106_v2 = vpop.f32.mrf.mxu0 }
 0x2d2   : > { %v6536_v18 = vadd.f32 1.0, %v1878_v3  ;;  %v1549_v42 = vmul.f32 %v6383_v37, %v6174_v8  ;;  %v1573_v51 = vsel %vm6468_vm2, %v1572_v14, %v1568_v40  ;;  %v1813_v52 = vsel %vm1810_vm7, %v1812_v20, %v1808_v43  ;;  %v1129_v11 = vpop.f32.mrf.mxu1 }
 0x2d3   : > { %v2059_v60 = vmul.f32 2.1237322e-06, %v6515_v44  ;;  %v1814_v38 = vmul.f32 %v1813_v52, %v1789_v0  ;;  %v1866_v62 = vadd.f32 0.18741608, %v1865_v6  ;;  %v6545_v53 = vadd.f32 %v1168_v63, %v6149_v55 }
 0x2d4   : > { %4707 = vrcp.f32 %v6536_v18  ;;  %v4706_v49 = vpop.eup %4705  ;;  %v6549_v8 = vmul.f32 %v6433_v25, %v6232_v33  ;;  %v1828_v37 = vadd.f32 1.1283791, %v1827_v24  ;;  %v6551_v14 = vmin.f32 %v2097_v9, 16.0 }
 0x2d5   : > { %7557 = vst [vmem:[#allocation57_spill] sm:$0xff] %v6545_v53  ;;  %v2137_v35 = vmul.f32 %v6529_v48, %v6529_v48  ;;  %v4121_v40 = vclamps-f32 %v6509_v17, 1.0  ;;  %v4128_v21 = vclamps-f32 %v1814_v38, 1.0  ;;  %v6557_v6 = vmul.f32 0.5, %v6318_v4 }
 0x2d6   : > { %7558 = vst [vmem:[#allocation58_spill] sm:$0xff] %v6549_v8  ;;  %v1841_v3 = vmul.f32 %v4706_v49, %v6491_v28  ;;  %v6560_v32 = vmul.f32 %v1573_v51, %v1549_v42  ;;  %v1849_v20 = vand.u32 2147483647, %v6491_v28  ;;  %v1851_v33 = vand.u32 2147483648, %v6491_v28 }
 0x2d7   : > { %v2060_v25 = vadd.f32 0.00028619796, %v2059_v60  ;;  %v2870_v24 = vadd.f32 1.0, %v4128_v21  ;;  %v1867_v63 = vmul.f32 %v1866_v62, %v6402_v61  ;;  %v6566_v36 = vmul.f32 0.70710677, %v6545_v53 }
 0x2d8   : > { %v1842_v9 = vsub.f32 1.0, %v1841_v3  ;;  %v1829_v17 = vmul.f32 %v1828_v37, %v6333_v34  ;;  %vm1846_vm8 = vweird.f32 %v4706_v49  ;;  %v2099_v4 = vmul.f32 2.1237322e-06, %v6551_v14 }
 0x2d9   : > { %v6570_v56 = vmin.f32 %v2137_v35, 16.0  ;;  %v6573_v43 = vmul.f32 %v2870_v24, %v6366_v57  ;;  %v2177_v60 = vmul.f32 %v6566_v36, %v6566_v36  ;;  %v6579_v62 = vadd.f32 %v6425_v12, %v6024_v45 }
 0x2da   : > { %v4708_v0 = vpop.eup %4707  ;;  %v1843_v42 = vmul.f32 %v4706_v49, %v1842_v9  ;;  %vm1845_vm9 = vweird.f32 %v6491_v28  ;;  %vm6582_vm10 = vcmp.eq.f32.partialorder %v1849_v20, 8.507059e+37  ;;  %v2061_v51 = vmul.f32 %v2060_v25, %v6515_v44 }
 0x2db   : > { %7559 = vst [vmem:[#allocation59_spill] sm:$0xff] %v6573_v43  ;;  %v1881_v61 = vmul.f32 %v4708_v0, %v6536_v18  ;;  %v1852_v38 = vor.u32 1.1754944e-38, %v1851_v33  ;;  %v1868_v2 = vadd.f32 1.1283791, %v1867_v63  ;;  %vm1847_vm11 = vmor %vm1845_vm9, %vm1846_vm8  ;;  %v1889_v11 = vand.u32 2147483647, %v6536_v18 }
 0x2dc   : > { %v1844_v52 = vadd.f32 %v4706_v49, %v1843_v42  ;;  %v1891_v28 = vand.u32 2147483648, %v6536_v18  ;;  %v2100_v37 = vadd.f32 0.00028619796, %v2099_v4  ;;  %v2139_v21 = vmul.f32 2.1237322e-06, %v6570_v56 }
 0x2dd   : > { %v1882_v12 = vsub.f32 1.0, %v1881_v61  ;;  %v6594_v3 = vmin.f32 %v2177_v60, 16.0  ;;  %v6597_v20 = vmul.f32 0.70710677, %v6579_v62  ;;  %vm1886_vm12 = vweird.f32 %v4708_v0  ;;  %v1147_v61 = vpop.f32.mrf.mxu2 }
 0x2de   : > { %v1848_v35 = vsel %vm1847_vm11, %v4706_v49, %v1844_v52  ;;  %v6603_v24 = vadd.f32 %v6427_v1, %v6039_v46  ;;  %v2863_v9 = vadd.f32 1.0, %v4121_v40  ;;  %v4122_v63 = vclamps-f32 %v6560_v32, 1.0 }
 0x2df   : > { %7562 = vst [vmem:[#allocation60_spill] sm:$0xff] %v6594_v3  ;;  %v1853_v33 = vsel %vm6582_vm10, %v1852_v38, %v1848_v35  ;;  %v1883_v25 = vmul.f32 %v4708_v0, %v1882_v12  ;;  %v2062_v4 = vadd.f32 0.0036580483, %v2061_v51  ;;  %vm1885_vm13 = vweird.f32 %v6536_v18 }
 0x2e0   : > { %v1854_v49 = vmul.f32 %v1853_v33, %v1829_v17  ;;  %v2101_v60 = vmul.f32 %v2100_v37, %v6551_v14  ;;  %v2377_v34 = vmul.f32 %v6597_v20, %v6597_v20  ;;  %v1869_v38 = vmul.f32 %v1868_v2, %v6369_v31  ;;  %vm1887_vm14 = vmor %vm1885_vm13, %vm1886_vm12 }
 0x2e1   : > { %v1884_v42 = vadd.f32 %v4708_v0, %v1883_v25  ;;  %v1892_v1 = vor.u32 1.1754944e-38, %v1891_v28  ;;  %v2179_v40 = vmul.f32 2.1237322e-06, %v6594_v3  ;;  %vm1890_vm15 = vcmp.eq.f32.partialorder %v1889_v11, 8.507059e+37 }
 0x2e2   : > { %v4129_v52 = vclamps-f32 %v1854_v49, 1.0  ;;  %v2140_v32 = vadd.f32 0.00028619796, %v2139_v21  ;;  %v6613_v17 = vmul.f32 0.70710677, %v6603_v24  ;;  %v2063_v37 = vmul.f32 %v2062_v4, %v6515_v44 }
 0x2e3   : > { %v1888_v12 = vsel %vm1887_vm14, %v4708_v0, %v1884_v42  ;;  %v6617_v35 = vadd.f32 %v1147_v61, %v6096_v26  ;;  %v2102_v25 = vadd.f32 0.0036580483, %v2101_v60  ;;  %v6619_v31 = vmin.f32 %v2377_v34, 16.0 }
 0x2e4   : > { %v2871_v18 = vadd.f32 1.0, %v4129_v52  ;;  %v1893_v51 = vsel %vm1890_vm15, %v1892_v1, %v1888_v12  ;;  %v2417_v2 = vmul.f32 %v6613_v17, %v6613_v17  ;;  %v2666_v0 = vadd.f32 0.18741608, %v6345_v23 }
 0x2e5   : > { %v1894_v33 = vmul.f32 %v1893_v51, %v1869_v38  ;;  %v6625_v11 = vmul.f32 %v2863_v9, %v6289_v13  ;;  %v2180_v21 = vadd.f32 0.00028619796, %v2179_v40  ;;  %v2864_v49 = vadd.f32 1.0, %v4122_v63  ;;  %v1170_v51 = vpop.f32.mrf.mxu3 }
 0x2e6   : > { %v6628_v28 = vmul.f32 %v2871_v18, %v6557_v6  ;;  %v2141_v42 = vmul.f32 %v2140_v32, %v6570_v56  ;;  %v6631_v61 = vmin.f32 %v2417_v2, 16.0  ;;  %v1184_v60 = vmul.f32 0.5, %v6159_v39  ;;  %v7569_v2 = vld [vmem:[#allocation52_spill] sm:$0xff] }
 0x2e7   : > { %7563 = vst [vmem:[#allocation61_spill] sm:$0xff] %v6625_v11  ;;  %v4130_v4 = vclamps-f32 %v1894_v33, 1.0  ;;  %v1192_v23 = vmul.f32 0.5, %v6339_v58  ;;  %v6638_v13 = vmul.f32 0.70710677, %v6617_v35  ;;  %v2103_v52 = vmul.f32 %v2102_v25, %v6551_v14 }
 0x2e8   : > { %7564 = vst [vmem:[#allocation62_spill] sm:$0xff] %v6628_v28  ;;  %v2064_v6 = vadd.f32 0.05243302, %v2063_v37  ;;  %v2379_v63 = vmul.f32 2.1237322e-06, %v6619_v31  ;;  %v2547_v38 = vmul.f32 %v6221_v10, %v6029_v15  ;;  %v2587_v39 = vmul.f32 %v6259_v59, %v6090_v47  ;;  %v7567_v37 = vld [vmem:[#allocation31_spill] sm:$0xff] }
 0x2e9   : > { %v2872_v9 = vadd.f32 1.0, %v4130_v4  ;;  %v2181_v1 = vmul.f32 %v2180_v21, %v6594_v3  ;;  %v2419_v40 = vmul.f32 2.1237322e-06, %v6631_v61  ;;  %v6648_v58 = vmul.f32 %v2864_v49, %v1184_v60  ;;  %v7568_v59 = vld [vmem:[#allocation53_spill] sm:$0xff] }
 0x2ea   : > { %v2142_v32 = vadd.f32 0.0036580483, %v2141_v42  ;;  %v2457_v18 = vmul.f32 %v6638_v13, %v6638_v13  ;;  %v6656_v33 = vmul.f32 %v6125_v5, %v7567_v37  ;;  %v2308_v10 = vadd.f32 1.1283791, %v6198_v27 }
 0x2eb   : > { %7565 = vst [vmem:[#allocation63_spill] sm:$0xff] %v6648_v58  ;;  %v6650_v12 = vmul.f32 %v2872_v9, %v1192_v23  ;;  %v2627_v25 = vmul.f32 %v7568_v59, %v6120_v22  ;;  %v2667_v21 = vmul.f32 %v2666_v0, %v7569_v2  ;;  %v2065_v4 = vmul.f32 %v2064_v6, %v6515_v44  ;;  %v7570_v23 = vld [vmem:[#allocation54_spill] sm:$0xff] }
 0x2ec   : > { %v2104_v42 = vadd.f32 0.05243302, %v2103_v52  ;;  %v2380_v60 = vadd.f32 0.00028619796, %v2379_v63  ;;  %v2348_v9 = vadd.f32 1.1283791, %v7570_v23  ;;  %v6667_v5 = vadd.f32 %v1170_v51, %v6149_v55 }
 0x2ed   : > { %7566 = vst [vmem:[#allocation64_spill] sm:$0xff] %v6650_v12  ;;  %v2182_v34 = vadd.f32 0.0036580483, %v2181_v1  ;;  %v2420_v57 = vadd.f32 0.00028619796, %v2419_v40  ;;  %v2143_v59 = vmul.f32 %v2142_v32, %v6570_v56  ;;  %v6670_v53 = vmin.f32 %v2457_v18, 16.0 }
 0x2ee   : > { %7571 = vst [vmem:[#allocation31_spill] sm:$0xff] %v6667_v5  ;;  %v2548_v27 = vadd.f32 1.1283791, %v2547_v38  ;;  %v2588_v37 = vadd.f32 1.1283791, %v2587_v39  ;;  %v6674_v6 = vadd.f32 %v6487_v19, %v6024_v45  ;;  %v7574_v52 = vld [vmem:[#allocation22_spill] sm:$0xff]  ;;  %v2105_v51 = vmul.f32 %v2104_v42, %v6551_v14 }
 0x2ef   : > { %7572 = vst [vmem:[#allocation53_spill] sm:$0xff] %v6670_v53  ;;  %v2628_v0 = vadd.f32 1.1283791, %v2627_v25  ;;  %v2668_v11 = vadd.f32 1.1283791, %v2667_v21  ;;  %v7575_v23 = vld [vmem:[#allocation33_spill] sm:$0xff]  ;;  %v2381_v38 = vmul.f32 %v2380_v60, %v6619_v31  ;;  %v2183_v18 = vmul.f32 %v2182_v34, %v6594_v3 }
 0x2f0   : > { %7573 = vst [vmem:[#allocation52_spill] sm:$0xff] %v6674_v6  ;;  %v1910_v63 = vmul.f32 3.8918573e-05, %v7574_v52  ;;  %v6678_v1 = vmul.f32 %v2308_v10, %v7575_v23  ;;  %v2066_v40 = vadd.f32 0.18741608, %v2065_v4  ;;  %v7576_v39 = vld [vmem:[#allocation34_spill] sm:$0xff]  ;;  %v2421_v25 = vmul.f32 %v2420_v57, %v6631_v61 }
 0x2f1   : > { %v6683_v32 = vmul.f32 %v2348_v9, %v7576_v39  ;;  %v6688_v45 = vmul.f32 0.70710677, %v6667_v5  ;;  %v7578_v19 = vld [vmem:[#allocation36_spill] sm:$0xff]  ;;  %v7579_v10 = vld [vmem:[#allocation43_spill] sm:$0xff]  ;;  %v2144_v4 = vadd.f32 0.05243302, %v2143_v59 }
 0x2f2   : > { %v6691_v21 = vmul.f32 %v2548_v27, %v7578_v19  ;;  %v6694_v23 = vmul.f32 %v2588_v37, %v7579_v10  ;;  %v2459_v42 = vmul.f32 2.1237322e-06, %v6670_v53  ;;  %v7580_v60 = vld [vmem:[#allocation47_spill] sm:$0xff]  ;;  %v7581_v9 = vld [vmem:[#allocation48_spill] sm:$0xff]  ;;  %v6704_v57 = vmul.f32 0.70710677, %v6674_v6 }
 0x2f3   : > { %7577 = vst [vmem:[#allocation54_spill] sm:$0xff] %v6688_v45  ;;  %v6698_v49 = vmul.f32 %v2628_v0, %v7580_v60  ;;  %v6701_v39 = vmul.f32 %v2668_v11, %v7581_v9  ;;  %v1911_v34 = vadd.f32 0.001143296, %v1910_v63  ;;  %v2067_v5 = vmul.f32 %v2066_v40, %v6515_v44  ;;  %v7584_v58 = vld [vmem:[#allocation30_spill] sm:$0xff] }
 0x2f4   : > { %7583 = vst [vmem:[#allocation33_spill] sm:$0xff] %v6704_v57  ;;  %v2106_v27 = vadd.f32 0.18741608, %v2105_v51  ;;  %v2382_v19 = vadd.f32 0.0036580483, %v2381_v38  ;;  %v2497_v12 = vmul.f32 %v6688_v45, %v6688_v45  ;;  %v6712_v11 = vmul.f32 0.5, %v6431_v54 }
 0x2f5   : > { %7582 = vst [vmem:[#allocation22_spill] sm:$0xff] %v6701_v39  ;;  %v2230_v37 = vmul.f32 3.8918573e-05, %v7584_v58  ;;  %v2184_v10 = vadd.f32 0.05243302, %v2183_v18  ;;  %v1912_v0 = vmul.f32 %v1911_v34, %v7574_v52  ;;  %v2145_v60 = vmul.f32 %v2144_v4, %v6570_v56 }
 0x2f6   : > { %v2422_v59 = vadd.f32 0.0036580483, %v2421_v25  ;;  %7585 = vst [vmem:[#allocation34_spill] sm:$0xff] %v6712_v11  ;;  %v2460_v9 = vadd.f32 0.00028619796, %v2459_v42  ;;  %v6716_v40 = vmul.f32 0.5, %v6478_v30  ;;  %v2697_v51 = vmul.f32 %v6704_v57, %v6704_v57 }
 0x2f7   : > { %v2231_v63 = vadd.f32 0.001143296, %v2230_v37  ;;  %v6722_v38 = vadd.f32 %v6489_v29, %v6039_v46  ;;  %v1913_v18 = vadd.f32 0.014752088, %v1912_v0  ;;  %v6724_v25 = vadd.f32 1.1283791, %v2067_v5 }
 0x2f8   : > { %7586 = vst [vmem:[#allocation36_spill] sm:$0xff] %v6716_v40  ;;  %v2107_v54 = vmul.f32 %v2106_v27, %v6551_v14  ;;  %v2383_v34 = vmul.f32 %v2382_v19, %v6619_v31  ;;  %v2185_v42 = vmul.f32 %v2184_v10, %v6594_v3  ;;  %v2423_v30 = vmul.f32 %v2422_v59, %v6631_v61  ;;  %v7588_v5 = vld [vmem:[#allocation24_spill] sm:$0xff] }
 0x2f9   : > { %7587 = vst [vmem:[#allocation43_spill] sm:$0xff] %v6722_v38  ;;  %v2232_v4 = vmul.f32 %v2231_v63, %v7584_v58  ;;  %v6731_v37 = vmin.f32 %v2497_v12, 16.0  ;;  %v1914_v6 = vmul.f32 %v1913_v18, %v7574_v52  ;;  %v2146_v57 = vadd.f32 0.18741608, %v2145_v60 }
 0x2fa   : > { %v2461_v46 = vmul.f32 %v2460_v9, %v6670_v53  ;;  %v1950_v0 = vmul.f32 3.8918573e-05, %v7588_v5  ;;  %v6737_v27 = vmul.f32 0.5, %v6494_v41  ;;  %v6739_v19 = vmin.f32 %v2697_v51, 16.0 }
 0x2fb   : > { %v2233_v29 = vadd.f32 0.014752088, %v2232_v4  ;;  %v6742_v63 = vmul.f32 0.70710677, %v6722_v38  ;;  %v1915_v10 = vadd.f32 0.112945676, %v1914_v6  ;;  %v2147_v38 = vmul.f32 %v2146_v57, %v6570_v56 }
 0x2fc   : > { %7589 = vst [vmem:[#allocation47_spill] sm:$0xff] %v6737_v27  ;;  %v2108_v59 = vadd.f32 1.1283791, %v2107_v54  ;;  %v2384_v12 = vadd.f32 0.05243302, %v2383_v34  ;;  %v7591_v27 = vld [vmem:[#allocation32_spill] sm:$0xff] }
 0x2fd   : > { %7590 = vst [vmem:[#allocation48_spill] sm:$0xff] %v6742_v63  ;;  %v2234_v45 = vmul.f32 %v2233_v29, %v7584_v58  ;;  %v1951_v18 = vadd.f32 0.001143296, %v1950_v0  ;;  %v2186_v60 = vadd.f32 0.18741608, %v2185_v42  ;;  %v1916_v4 = vmul.f32 %v1915_v10, %v7574_v52 }
 0x2fe   : > { %v2424_v40 = vadd.f32 0.05243302, %v2423_v30  ;;  %v2499_v9 = vmul.f32 2.1237322e-06, %v6731_v37  ;;  %v2462_v11 = vadd.f32 0.0036580483, %v2461_v46  ;;  %v2737_v54 = vmul.f32 %v6742_v63, %v6742_v63 }
 0x2ff   : > { %v2235_v41 = vadd.f32 0.112945676, %v2234_v45  ;;  %v1952_v51 = vmul.f32 %v1951_v18, %v7588_v5  ;;  %v2270_v28 = vmul.f32 3.8918573e-05, %v7591_v27  ;;  %v2699_v6 = vmul.f32 2.1237322e-06, %v6739_v19 }
 0x300   : > { %v1917_v34 = vadd.f32 0.4994258, %v1916_v4  ;;  %v2385_v42 = vmul.f32 %v2384_v12, %v6619_v31  ;;  %v2187_v45 = vmul.f32 %v2186_v60, %v6594_v3  ;;  %v2425_v46 = vmul.f32 %v2424_v40, %v6631_v61 }
 0x301   : > { %v2236_v30 = vmul.f32 %v2235_v41, %v7584_v58  ;;  %v1953_v29 = vadd.f32 0.014752088, %v1952_v51  ;;  %v2271_v0 = vadd.f32 0.001143296, %v2270_v28  ;;  %v2500_v10 = vadd.f32 0.00028619796, %v2499_v9 }
 0x302   : > { %v1918_v18 = vmul.f32 %v1917_v34, %v7574_v52  ;;  %v2463_v57 = vmul.f32 %v2462_v11, %v6670_v53  ;;  %v2148_v63 = vadd.f32 1.1283791, %v2147_v38  ;;  %v2700_v12 = vadd.f32 0.00028619796, %v2699_v6 }
 0x303   : > { %v2237_v8 = vadd.f32 0.4994258, %v2236_v30  ;;  %v1954_v43 = vmul.f32 %v1953_v29, %v7588_v5  ;;  %v2272_v4 = vmul.f32 %v2271_v0, %v7591_v27  ;;  %v6761_v7 = vmin.f32 %v2737_v54, 16.0  ;;  %v7593_v54 = vld [vmem:[#allocation25_spill] sm:$0xff] }
 0x304   : > { %v6763_v41 = vadd.f32 1.0, %v1918_v18  ;;  %v2386_v28 = vadd.f32 0.18741608, %v2385_v42  ;;  %v2188_v51 = vadd.f32 1.1283791, %v2187_v45  ;;  %v2501_v11 = vmul.f32 %v2500_v10, %v6731_v37 }
 0x305   : > { %v2238_v60 = vmul.f32 %v2237_v8, %v7584_v58  ;;  %v1955_v40 = vadd.f32 0.112945676, %v1954_v43  ;;  %v2273_v9 = vadd.f32 0.014752088, %v2272_v4  ;;  %v2426_v52 = vadd.f32 0.18741608, %v2425_v46 }
 0x306   : > { %4709 = vrcp.f32 %v6763_v41  ;;  %v6769_v34 = vmul.f32 0.5, %v6579_v62  ;;  %v2464_v38 = vadd.f32 0.05243302, %v2463_v57  ;;  %v1990_v30 = vmul.f32 3.8918573e-05, %v7593_v54 }
 0x307   : > { %v6771_v6 = vadd.f32 1.0, %v2238_v60  ;;  %v2701_v42 = vmul.f32 %v2700_v12, %v6739_v19  ;;  %v2739_v8 = vmul.f32 2.1237322e-06, %v6761_v7  ;;  %v1956_v43 = vmul.f32 %v1955_v40, %v7588_v5 }
 0x308   : > { %7592 = vst [vmem:[#allocation30_spill] sm:$0xff] %v6769_v34  ;;  %v2274_v58 = vmul.f32 %v2273_v9, %v7591_v27  ;;  %v6780_v29 = vmul.f32 %v6724_v25, %v6457_v16  ;;  %v2387_v62 = vmul.f32 %v2386_v28, %v6619_v31  ;;  %v6784_v0 = vmul.f32 0.5, %v6603_v24  ;;  %v7608_v34 = vld [vmem:[#allocation42_spill] sm:$0xff] }
 0x309   : > { %4711 = vrcp.f32 %v6771_v6  ;;  %v6788_v45 = vmul.f32 %v2108_v59, %v6506_v50  ;;  %v2427_v46 = vmul.f32 %v2426_v52, %v6631_v61  ;;  %v6792_v10 = vmul.f32 0.5, %v6617_v35 }
 0x30a   : > { %7594 = vst [vmem:[#allocation24_spill] sm:$0xff] %v6780_v29  ;;  %v2502_v18 = vadd.f32 0.0036580483, %v2501_v11  ;;  %v6795_v57 = vmul.f32 %v2148_v63, %v6529_v48  ;;  %v1957_v16 = vadd.f32 0.4994258, %v1956_v43  ;;  %v6798_v24 = vmul.f32 %v2188_v51, %v6566_v36  ;;  %v7600_v51 = vld [vmem:[#allocation35_spill] sm:$0xff] }
 0x30b   : > { %7595 = vst [vmem:[#allocation32_spill] sm:$0xff] %v6784_v0  ;;  %v2275_v25 = vadd.f32 0.112945676, %v2274_v58  ;;  %v1991_v4 = vadd.f32 0.001143296, %v1990_v30  ;;  %v2465_v28 = vmul.f32 %v2464_v38, %v6670_v53  ;;  %v1931_v36 = vand.u32 2147483648, %v6763_v41 }
 0x30c   : > { %7596 = vst [vmem:[#allocation25_spill] sm:$0xff] %v6788_v45  ;;  %v4710_v12 = vpop.eup %4709  ;;  %v2702_v50 = vadd.f32 0.0036580483, %v2701_v42  ;;  %v2740_v59 = vadd.f32 0.00028619796, %v2739_v8  ;;  %v1958_v40 = vmul.f32 %v1957_v16, %v7588_v5  ;;  %v2503_v9 = vmul.f32 %v2502_v18, %v6731_v37  ;;  %v4530_v16 = vld [vmem:[%s5193_s16 + $0x170] sm:$0xff] }
 0x30d   : > { %7597 = vst [vmem:[#allocation65_spill] sm:$0xff] %v6792_v10  ;;  %v6801_v60 = vadd.f32 1.1283791, %v2387_v62  ;;  %v1921_v35 = vmul.f32 %v4710_v12, %v6763_v41  ;;  %v2276_v48 = vmul.f32 %v2275_v25, %v7591_v27  ;;  %v6806_v63 = vadd.f32 1.1283791, %v2427_v46  ;;  %v4537_v25 = vld [vmem:[%s5193_s16 + $0x1a8] sm:$0xff]  ;;  %3594 = vmatpush.bf16.msrb.mxu1 %v4530_v16 }
 0x30e   : > { %7598 = vst [vmem:[#allocation66_spill] sm:$0xff] %v6795_v57  ;;  %v2310_v52 = vmul.f32 3.8918573e-05, %v7600_v51  ;;  %v6811_v30 = vadd.f32 1.0, %v1958_v40  ;;  %v1992_v8 = vmul.f32 %v1991_v4, %v7593_v54  ;;  %v2466_v5 = vadd.f32 0.18741608, %v2465_v28  ;;  %v6823_v4 = vpop.f32.mrf.mxu3  ;;  %3618 = vmatpush.bf16.msrb.mxu2 %v4537_v25 }
 0x30f   : > { %7599 = vst [vmem:[#allocation67_spill] sm:$0xff] %v6798_v24  ;;  %v4712_v11 = vpop.eup %4711  ;;  %v1922_v38 = vsub.f32 1.0, %v1921_v35  ;;  %v2277_v42 = vadd.f32 0.4994258, %v2276_v48  ;;  %v2703_v43 = vmul.f32 %v2702_v50, %v6739_v19  ;;  %v2741_v58 = vmul.f32 %v2740_v59, %v6761_v7  ;;  %v6821_v35 = vpop.f32.mrf.mxu2  ;;  %v4545_v40 = vld [vmem:[%s5193_s16 + $0x1e8] sm:$0xff] }
 0x310   : > { %v2241_v62 = vmul.f32 %v4712_v11, %v6771_v6  ;;  %vm1926_vm0 = vweird.f32 %v4710_v12  ;;  %v1929_v18 = vand.u32 2147483647, %v6763_v41  ;;  %4713 = vrcp.f32 %v6811_v30  ;;  %v4521_v48 = vld [vmem:[%s5193_s16 + $0x128] sm:$0xff]  ;;  %3641 = vmatpush.bf16.msrb.mxu3 %v4545_v40 }
 0x311   : > { %v1923_v46 = vmul.f32 %v4710_v12, %v1922_v38  ;;  %vm1925_vm1 = vweird.f32 %v6763_v41  ;;  %v1932_v28 = vor.u32 1.1754944e-38, %v1931_v36  ;;  %v2278_v59 = vmul.f32 %v2277_v42, %v7591_v27  ;;  %3572 = vmatpush.bf16.msrb.mxu0 %v4521_v48 }
 0x312   : > { %v2242_v50 = vsub.f32 1.0, %v2241_v62  ;;  %v2251_v24 = vand.u32 2147483648, %v6771_v6  ;;  %v1993_v10 = vadd.f32 0.014752088, %v1992_v8  ;;  %v2311_v0 = vadd.f32 0.001143296, %v2310_v52  ;;  %vm1927_vm2 = vmor %vm1925_vm1, %vm1926_vm0 }
 0x313   : > { %v1924_v38 = vadd.f32 %v4710_v12, %v1923_v46  ;;  %vm2246_vm3 = vweird.f32 %v4712_v11  ;;  %v2249_v45 = vand.u32 2147483647, %v6771_v6  ;;  %v6832_v41 = vadd.f32 1.0, %v2278_v59  ;;  %v7601_v8 = vld [vmem:[#allocation20_spill] sm:$0xff] }
 0x314   : > { %v2243_v57 = vmul.f32 %v4712_v11, %v2242_v50  ;;  %v2504_v27 = vadd.f32 0.05243302, %v2503_v9  ;;  %v6834_v36 = vadd.f32 0.05243302, %v2703_v43  ;;  %vm1930_vm4 = vcmp.eq.f32.partialorder %v1929_v18, 8.507059e+37 }
 0x315   : > { %v1928_v42 = vsel %vm1927_vm2, %v4710_v12, %v1924_v38  ;;  %vm2245_vm5 = vweird.f32 %v6771_v6  ;;  %4715 = vrcp.f32 %v6832_v41  ;;  %v2252_v25 = vor.u32 1.1754944e-38, %v2251_v24  ;;  %v7602_v38 = vld [vmem:[#allocation29_spill] sm:$0xff] }
 0x316   : > { %v1933_v62 = vsel %vm1930_vm4, %v1932_v28, %v1928_v42  ;;  %v2244_v46 = vadd.f32 %v4712_v11, %v2243_v57  ;;  %v4714_v52 = vpop.eup %4713  ;;  %vm2247_vm6 = vmor %vm2245_vm5, %vm2246_vm3  ;;  %v1994_v50 = vmul.f32 %v1993_v10, %v7593_v54  ;;  %v2312_v9 = vmul.f32 %v2311_v0, %v7600_v51  ;;  %v1175_v48 = vpop.f32.mrf.mxu3  ;;  %v7603_v10 = vld [vmem:[#allocation28_spill] sm:$0xff]  ;;  %v7604_v0 = vld [vmem:[#allocation39_spill] sm:$0xff] }
 0x317   : > { %v1934_v16 = vmul.f32 %v1933_v62, %v7601_v8  ;;  %v6842_v43 = vadd.f32 0.0036580483, %v2741_v58  ;;  %vm2250_vm7 = vcmp.eq.f32.partialorder %v2249_v45, 8.507059e+37  ;;  %v1961_v57 = vmul.f32 %v4714_v52, %v6811_v30  ;;  %v1152_v40 = vpop.f32.mrf.mxu2 }
 0x318   : > { %v2248_v12 = vsel %vm2247_vm6, %v4712_v11, %v2244_v46  ;;  %v1969_v28 = vand.u32 2147483647, %v6811_v30  ;;  %v1971_v59 = vand.u32 2147483648, %v6811_v30  ;;  %v2030_v62 = vmul.f32 3.8918573e-05, %v7603_v10 }
 0x319   : > { %v4131_v18 = vclamps-f32 %v1934_v16, 1.0  ;;  %v2253_v6 = vsel %vm2250_vm7, %v2252_v25, %v2248_v12  ;;  %v1962_v42 = vsub.f32 1.0, %v1961_v57  ;;  %v2350_v58 = vmul.f32 3.8918573e-05, %v7604_v0 }
 0x31a   : > { %v2254_v24 = vmul.f32 %v2253_v6, %v7602_v38  ;;  %v2467_v11 = vmul.f32 %v2466_v5, %v6670_v53  ;;  %v1995_v46 = vadd.f32 0.112945676, %v1994_v50  ;;  %v2313_v8 = vadd.f32 0.014752088, %v2312_v9 }
 0x31b   : > { %v2873_v45 = vadd.f32 1.0, %v4131_v18  ;;  %v4716_v16 = vpop.eup %4715  ;;  %v1963_v12 = vmul.f32 %v4714_v52, %v1962_v42  ;;  %vm1965_vm8 = vweird.f32 %v6811_v30  ;;  %vm1966_vm9 = vweird.f32 %v4714_v52  ;;  %v7607_v18 = vld [vmem:[#allocation37_spill] sm:$0xff] }
 0x31c   : > { %v4139_v25 = vclamps-f32 %v2254_v24, 1.0  ;;  %vm6852_vm10 = vcmp.eq.f32.partialorder %v1969_v28, 8.507059e+37  ;;  %v1972_v57 = vor.u32 1.1754944e-38, %v1971_v59  ;;  %v2281_v6 = vmul.f32 %v4716_v16, %v6832_v41  ;;  %vm1967_vm11 = vmor %vm1965_vm8, %vm1966_vm9 }
 0x31d   : > { %v1996_v48 = vmul.f32 %v1995_v46, %v7593_v54  ;;  %v1964_v5 = vadd.f32 %v4714_v52, %v1963_v12  ;;  %v2289_v50 = vand.u32 2147483647, %v6832_v41  ;;  %v2291_v9 = vand.u32 2147483648, %v6832_v41 }
 0x31e   : > { %v2881_v38 = vadd.f32 1.0, %v4139_v25  ;;  %v2913_v24 = vmul.f32 %v2873_v45, %v7607_v18  ;;  %v2282_v30 = vsub.f32 1.0, %v2281_v6  ;;  %v2314_v28 = vmul.f32 %v2313_v8, %v7600_v51  ;;  %v7609_v18 = vld [vmem:[#allocation21_spill] sm:$0xff] }
 0x31f   : > { %v1997_v42 = vadd.f32 0.4994258, %v1996_v48  ;;  %v1968_v59 = vsel %vm1967_vm11, %v4714_v52, %v1964_v5  ;;  %vm2286_vm12 = vweird.f32 %v4716_v16  ;;  %v2031_v39 = vadd.f32 0.001143296, %v2030_v62 }
 0x320   : > { %v2921_v29 = vmul.f32 %v2881_v38, %v7608_v34  ;;  %v1973_v46 = vsel %vm6852_vm10, %v1972_v57, %v1968_v59  ;;  %v2283_v25 = vmul.f32 %v4716_v16, %v2282_v30  ;;  %v2315_v3 = vadd.f32 0.112945676, %v2314_v28  ;;  %v7610_v28 = vld [vmem:[#allocation38_spill] sm:$0xff] }
 0x321   : > { %v1998_v12 = vmul.f32 %v1997_v42, %v7593_v54  ;;  %v2505_v53 = vmul.f32 %v2504_v27, %v6731_v37  ;;  %v1974_v6 = vmul.f32 %v1973_v46, %v7609_v18  ;;  %v6870_v8 = vadd.f32 %v6821_v35, %v6096_v26 }
 0x322   : > { %v2945_v45 = vpack.c.bf16 %v2921_v29, %v2913_v24  ;;  %v2284_v34 = vadd.f32 %v4716_v16, %v2283_v25  ;;  %vm2285_vm13 = vweird.f32 %v6832_v41  ;;  %v2316_v62 = vmul.f32 %v2315_v3, %v7600_v51  ;;  %v7611_v25 = vld [vmem:[#allocation44_spill] sm:$0xff] }
 0x323   : > { %v6873_v52 = vadd.f32 1.0, %v1998_v12  ;;  %v2468_v40 = vadd.f32 1.1283791, %v2467_v11  ;;  %v4132_v54 = vclamps-f32 %v1974_v6, 1.0  ;;  %vm2287_vm14 = vmor %vm2285_vm13, %vm2286_vm12  ;;  %v2292_v27 = vor.u32 1.1754944e-38, %v2291_v9 }
 0x324   : > { %3491 = vmatmul.bf16.gmra.mxu0 %v2945_v45  ;;  %v2032_v29 = vmul.f32 %v2031_v39, %v7603_v10  ;;  %v2288_v57 = vsel %vm2287_vm14, %v4716_v16, %v2284_v34  ;;  %vm2290_vm15 = vcmp.eq.f32.partialorder %v2289_v50, 8.507059e+37  ;;  %v2351_v26 = vadd.f32 0.001143296, %v2350_v58 }
 0x325   : > { %4717 = vrcp.f32 %v6873_v52  ;;  %v2506_v35 = vadd.f32 0.18741608, %v2505_v53  ;;  %v2293_v48 = vsel %vm2290_vm15, %v2292_v27, %v2288_v57  ;;  %v6880_v41 = vmul.f32 0.70710677, %v6870_v8 }
 0x326   : > { %v6884_v3 = vadd.f32 %v6823_v4, %v6149_v55  ;;  %v6888_v11 = vmul.f32 %v6801_v60, %v6597_v20  ;;  %v6892_v39 = vmul.f32 %v6806_v63, %v6613_v17  ;;  %v2294_v16 = vmul.f32 %v2293_v48, %v6656_v33 }
 0x327   : > { %v2317_v58 = vadd.f32 0.4994258, %v2316_v62  ;;  %v6897_v53 = vmul.f32 %v6834_v36, %v6739_v19  ;;  %v2743_v38 = vmul.f32 %v6842_v43, %v6761_v7  ;;  %v2874_v55 = vadd.f32 1.0, %v4132_v54 }
 0x328   : > { %v2033_v4 = vadd.f32 0.014752088, %v2032_v29  ;;  %v4140_v5 = vclamps-f32 %v2294_v16, 1.0  ;;  %v2352_v60 = vmul.f32 %v2351_v26, %v7604_v0  ;;  %v2550_v17 = vmul.f32 3.8918573e-05, %v6029_v15 }
 0x329   : > { %v2318_v20 = vmul.f32 %v2317_v58, %v7600_v51  ;;  %v6905_v63 = vmul.f32 %v2468_v40, %v6638_v13  ;;  %v2507_v33 = vmul.f32 %v2506_v35, %v6731_v37  ;;  %v2777_v36 = vmul.f32 %v6880_v41, %v6880_v41 }
 0x32a   : > { %v6911_v50 = vmul.f32 0.70710677, %v6884_v3  ;;  %v2882_v9 = vadd.f32 1.0, %v4140_v5  ;;  %v2034_v51 = vmul.f32 %v2033_v4, %v7603_v10  ;;  %v2353_v30 = vadd.f32 0.014752088, %v2352_v60 }
 0x32b   : > { %v4718_v43 = vpop.eup %4717  ;;  %v6913_v24 = vadd.f32 1.0, %v2318_v20  ;;  %v2744_v42 = vadd.f32 0.05243302, %v2743_v38  ;;  %v2914_v59 = vmul.f32 %v2874_v55, %v7610_v28  ;;  %v2009_v46 = vand.u32 2147483647, %v6873_v52 }
 0x32c   : > { %v2001_v13 = vmul.f32 %v4718_v43, %v6873_v52  ;;  %v2922_v12 = vmul.f32 %v2882_v9, %v7611_v25  ;;  %v2551_v45 = vadd.f32 0.001143296, %v2550_v17  ;;  %v2590_v18 = vmul.f32 3.8918573e-05, %v6090_v47 }
 0x32d   : > { %4719 = vrcp.f32 %v6913_v24  ;;  %v6922_v6 = vadd.f32 1.1283791, %v2507_v33  ;;  %v2817_v34 = vmul.f32 %v6911_v50, %v6911_v50  ;;  %v2011_v40 = vand.u32 2147483648, %v6873_v52 }
 0x32e   : > { %v2002_v62 = vsub.f32 1.0, %v2001_v13  ;;  %v2946_v54 = vpack.c.bf16 %v2922_v12, %v2914_v59  ;;  %v6927_v27 = vmin.f32 %v2777_v36, 16.0  ;;  %v2035_v29 = vadd.f32 0.112945676, %v2034_v51  ;;  %v7614_v12 = vld [vmem:[#allocation23_spill] sm:$0xff] }
 0x32f   : > { %v2354_v57 = vmul.f32 %v2353_v30, %v7604_v0  ;;  %vm2005_vm0 = vweird.f32 %v6873_v52  ;;  %vm2006_vm1 = vweird.f32 %v4718_v43  ;;  %vm6931_vm2 = vcmp.eq.f32.partialorder %v2009_v46, 8.507059e+37 }
 0x330   : > { %v2003_v26 = vmul.f32 %v4718_v43, %v2002_v62  ;;  %3514 = vmatmul.bf16.gmra.mxu1 %v2946_v54  ;;  %v2036_v48 = vmul.f32 %v2035_v29, %v7603_v10  ;;  %v2552_v58 = vmul.f32 %v2551_v45, %v6029_v15  ;;  %v2591_v38 = vadd.f32 0.001143296, %v2590_v18  ;;  %vm2007_vm3 = vmor %vm2005_vm0, %vm2006_vm1 }
 0x331   : > { %v2355_v16 = vadd.f32 0.112945676, %v2354_v57  ;;  %v2012_v4 = vor.u32 1.1754944e-38, %v2011_v40  ;;  %v2329_v5 = vand.u32 2147483647, %v6913_v24  ;;  %v2331_v30 = vand.u32 2147483648, %v6913_v24 }
 0x332   : > { %v2004_v55 = vadd.f32 %v4718_v43, %v2003_v26  ;;  %v2630_v20 = vmul.f32 3.8918573e-05, %v6120_v22  ;;  %v2037_v52 = vadd.f32 0.4994258, %v2036_v48  ;;  %v2553_v33 = vadd.f32 0.014752088, %v2552_v58 }
 0x333   : > { %v4720_v60 = vpop.eup %4719  ;;  %v2356_v17 = vmul.f32 %v2355_v16, %v7604_v0  ;;  %v2592_v36 = vmul.f32 %v2591_v38, %v6090_v47  ;;  %v6950_v40 = vmul.f32 %v2744_v42, %v6761_v7  ;;  %v4529_v57 = vld [vmem:[%s5193_s16 + $0x168] sm:$0xff]  ;;  %v4544_v26 = vld [vmem:[%s5193_s16 + $0x1e0] sm:$0xff]  ;;  %vm2325_vm5 = vweird.f32 %v6913_v24 }
 0x334   : > { %v2008_v9 = vsel %vm2007_vm3, %v4718_v43, %v2004_v55  ;;  %v2321_v51 = vmul.f32 %v4720_v60, %v6913_v24  ;;  %v2631_v28 = vadd.f32 0.001143296, %v2630_v20  ;;  %v2038_v13 = vmul.f32 %v2037_v52, %v7603_v10  ;;  %v4536_v10 = vld [vmem:[%s5193_s16 + $0x1a0] sm:$0xff]  ;;  %3595 = vmatpush.bf16.msrb.mxu1 %v4529_v57  ;;  %3642 = vmatpush.bf16.msrb.mxu3 %v4544_v26 }
 0x335   : > { %v2013_v59 = vsel %vm6931_vm2, %v2012_v4, %v2008_v9  ;;  %v2357_v46 = vadd.f32 0.4994258, %v2356_v17  ;;  %v2554_v25 = vmul.f32 %v2553_v33, %v6029_v15  ;;  %v2593_v43 = vadd.f32 0.014752088, %v2592_v36  ;;  %v4520_v16 = vld [vmem:[%s5193_s16 + $0x120] sm:$0xff]  ;;  %3619 = vmatpush.bf16.msrb.mxu2 %v4536_v10  ;;  %v4535_v4 = vld [vmem:[%s5193_s16 + $0x198] sm:$0xff] }
 0x336   : > { %v2014_v45 = vmul.f32 %v2013_v59, %v7614_v12  ;;  %v2322_v18 = vsub.f32 1.0, %v2321_v51  ;;  %v2632_v62 = vmul.f32 %v2631_v28, %v6120_v22  ;;  %v6952_v54 = vadd.f32 1.0, %v2038_v13  ;;  %3573 = vmatpush.bf16.msrb.mxu0 %v4520_v16  ;;  %v4543_v17 = vld [vmem:[%s5193_s16 + $0x1d8] sm:$0xff] }
 0x337   : > { %v2358_v29 = vmul.f32 %v2357_v46, %v7604_v0  ;;  %v2555_v35 = vadd.f32 0.112945676, %v2554_v25  ;;  %vm2326_vm4 = vweird.f32 %v4720_v60  ;;  %v2594_v58 = vmul.f32 %v2593_v43, %v6090_v47  ;;  %v4528_v0 = vld [vmem:[%s5193_s16 + $0x160] sm:$0xff] }
 0x338   : > { %v2323_v48 = vmul.f32 %v4720_v60, %v2322_v18  ;;  %v2633_v38 = vadd.f32 0.014752088, %v2632_v62  ;;  %v6960_v55 = vmin.f32 %v2817_v34, 16.0  ;;  %v4133_v42 = vclamps-f32 %v2014_v45, 1.0  ;;  %vm2327_vm6 = vmor %vm2325_vm5, %vm2326_vm4  ;;  %3596 = vmatpush.bf16.msrb.mxu1 %v4528_v0  ;;  %3643 = vmatpush.bf16.msrb.mxu3 %v4543_v17  ;;  %v4519_v17 = vld [vmem:[%s5193_s16 + $0x118] sm:$0xff] }
 0x339   : > { %4721 = vrcp.f32 %v6952_v54  ;;  %v6966_v52 = vadd.f32 1.0, %v2358_v29  ;;  %v2556_v33 = vmul.f32 %v2555_v35, %v6029_v15  ;;  %v2670_v34 = vmul.f32 3.8918573e-05, %v7569_v2  ;;  %3620 = vmatpush.bf16.msrb.mxu2 %v4535_v4 }
 0x33a   : > { %v2324_v20 = vadd.f32 %v4720_v60, %v2323_v48  ;;  %v2332_v36 = vor.u32 1.1754944e-38, %v2331_v30  ;;  %v2051_v24 = vand.u32 2147483648, %v6952_v54  ;;  %v2595_v9 = vadd.f32 0.112945676, %v2594_v58  ;;  %v7617_v48 = vld [vmem:[#allocation40_spill] sm:$0xff]  ;;  %3574 = vmatpush.bf16.msrb.mxu0 %v4519_v17 }
 0x33b   : > { %v2634_v51 = vmul.f32 %v2633_v38, %v6120_v22  ;;  %vm2330_vm7 = vcmp.eq.f32.partialorder %v2329_v5, 8.507059e+37  ;;  %v2049_v59 = vand.u32 2147483647, %v6952_v54  ;;  %4723 = vrcp.f32 %v6966_v52 }
 0x33c   : > { %v2328_v28 = vsel %vm2327_vm6, %v4720_v60, %v2324_v20  ;;  %v6977_v13 = vmul.f32 2.1237322e-06, %v6927_v27  ;;  %v2875_v25 = vadd.f32 1.0, %v4133_v42  ;;  %v2557_v12 = vadd.f32 0.4994258, %v2556_v33  ;;  %v4527_v33 = vld [vmem:[%s5193_s16 + $0x158] sm:$0xff] }
 0x33d   : > { %v2333_v46 = vsel %vm2330_vm7, %v2332_v36, %v2328_v28  ;;  %v2596_v45 = vmul.f32 %v2595_v9, %v6090_v47  ;;  %v2635_v18 = vadd.f32 0.112945676, %v2634_v51  ;;  %v2671_v60 = vadd.f32 0.001143296, %v2670_v34  ;;  %v4534_v34 = vld [vmem:[%s5193_s16 + $0x190] sm:$0xff]  ;;  %3597 = vmatpush.bf16.msrb.mxu1 %v4527_v33  ;;  %v7621_v33 = vld [vmem:[#allocation27_spill] sm:$0xff] }
 0x33e   : > { %v2334_v30 = vmul.f32 %v2333_v46, %v6678_v1  ;;  %v6982_v43 = vmul.f32 2.1237322e-06, %v6960_v55  ;;  %vm2045_vm8 = vweird.f32 %v6952_v54  ;;  %v2052_v62 = vor.u32 1.1754944e-38, %v2051_v24  ;;  %v4542_v51 = vld [vmem:[%s5193_s16 + $0x1d0] sm:$0xff]  ;;  %3621 = vmatpush.bf16.msrb.mxu2 %v4534_v34 }
 0x33f   : > { %v4722_v5 = vpop.eup %4721  ;;  %v2558_v29 = vmul.f32 %v2557_v12, %v6029_v15  ;;  %vm6987_vm9 = vcmp.eq.f32.partialorder %v2049_v59, 8.507059e+37  ;;  %v2597_v26 = vadd.f32 0.4994258, %v2596_v45  ;;  %v2070_v35 = vmul.f32 3.8918573e-05, %v6515_v44  ;;  %v7618_v28 = vld [vmem:[#allocation45_spill] sm:$0xff]  ;;  %3644 = vmatpush.bf16.msrb.mxu3 %v4542_v51 }
 0x340   : > { %v4141_v57 = vclamps-f32 %v2334_v30, 1.0  ;;  %v2041_v1 = vmul.f32 %v4722_v5, %v6952_v54  ;;  %v2915_v16 = vmul.f32 %v2875_v25, %v7617_v48  ;;  %v2636_v38 = vmul.f32 %v2635_v18, %v6120_v22  ;;  %v4518_v25 = vld [vmem:[%s5193_s16 + $0x110] sm:$0xff] }
 0x341   : > { %v6993_v58 = vadd.f32 1.0, %v2558_v29  ;;  %v2672_v15 = vmul.f32 %v2671_v60, %v7569_v2  ;;  %v4724_v42 = vpop.eup %4723  ;;  %vm2365_vm10 = vweird.f32 %v6966_v52  ;;  %v2598_v20 = vmul.f32 %v2597_v26, %v6090_v47  ;;  %v4526_v47 = vld [vmem:[%s5193_s16 + $0x150] sm:$0xff]  ;;  %3575 = vmatpush.bf16.msrb.mxu0 %v4518_v25 }
 0x342   : > { %v2883_v0 = vadd.f32 1.0, %v4141_v57  ;;  %v2042_v4 = vsub.f32 1.0, %v2041_v1  ;;  %v2361_v36 = vmul.f32 %v4724_v42, %v6966_v52  ;;  %v2369_v24 = vand.u32 2147483647, %v6966_v52  ;;  %3598 = vmatpush.bf16.msrb.mxu1 %v4526_v47 }
 0x343   : > { %v2371_v9 = vand.u32 2147483648, %v6966_v52  ;;  %4725 = vrcp.f32 %v6993_v58  ;;  %vm2046_vm11 = vweird.f32 %v4722_v5  ;;  %v2071_v12 = vadd.f32 0.001143296, %v2070_v35 }
 0x344   : > { %v2923_v59 = vmul.f32 %v2883_v0, %v7618_v28  ;;  %v2043_v46 = vmul.f32 %v4722_v5, %v2042_v4  ;;  %v2362_v30 = vsub.f32 1.0, %v2361_v36  ;;  %v7010_v45 = vadd.f32 1.0, %v2598_v20  ;;  %vm2047_vm12 = vmor %vm2045_vm8, %vm2046_vm11 }
 0x345   : > { %v2637_v18 = vadd.f32 0.4994258, %v2636_v38  ;;  %v2673_v60 = vadd.f32 0.014752088, %v2672_v15  ;;  %v2569_v1 = vand.u32 2147483647, %v6993_v58  ;;  %vm2366_vm13 = vweird.f32 %v4724_v42 }
 0x346   : > { %v2947_v29 = vpack.c.bf16 %v2923_v59, %v2915_v16  ;;  %v2044_v57 = vadd.f32 %v4722_v5, %v2043_v46  ;;  %v2571_v26 = vand.u32 2147483648, %v6993_v58  ;;  %v2363_v48 = vmul.f32 %v4724_v42, %v2362_v30  ;;  %vm2367_vm0 = vmor %vm2365_vm10, %vm2366_vm13 }
 0x347   : > { %vm7017_vm14 = vcmp.eq.f32.partialorder %v2369_v24, 8.507059e+37  ;;  %4727 = vrcp.f32 %v7010_v45  ;;  %v2372_v16 = vor.u32 1.1754944e-38, %v2371_v9  ;;  %v2638_v15 = vmul.f32 %v2637_v18, %v6120_v22 }
 0x348   : > { %3537 = vmatmul.bf16.gmra.mxu2 %v2947_v29  ;;  %v2048_v38 = vsel %vm2047_vm12, %v4722_v5, %v2044_v57  ;;  %v2674_v0 = vmul.f32 %v2673_v60, %v7569_v2  ;;  %v2364_v20 = vadd.f32 %v4724_v42, %v2363_v48  ;;  %vm2565_vm15 = vweird.f32 %v6993_v58 }
 0x349   : > { %v4726_v4 = vpop.eup %4725  ;;  %v2053_v54 = vsel %vm6987_vm9, %v2052_v62, %v2048_v38  ;;  %v2072_v17 = vmul.f32 %v2071_v12, %v6515_v44  ;;  %vm7033_vm1 = vcmp.eq.f32.partialorder %v2569_v1, 8.507059e+37  ;;  %v2572_v10 = vor.u32 1.1754944e-38, %v2571_v26 }
 0x34a   : > { %v2054_v34 = vmul.f32 %v2053_v54, %v7621_v33  ;;  %v2561_v22 = vmul.f32 %v4726_v4, %v6993_v58  ;;  %v2609_v62 = vand.u32 2147483647, %v7010_v45  ;;  %v2368_v36 = vsel %vm2367_vm0, %v4724_v42, %v2364_v20  ;;  %v4517_v33 = vld [vmem:[%s5193_s16 + $0x108] sm:$0xff] }
 0x34b   : > { %v2611_v24 = vand.u32 2147483648, %v7010_v45  ;;  %v7039_v9 = vadd.f32 1.0, %v2638_v15  ;;  %v2675_v51 = vadd.f32 0.112945676, %v2674_v0  ;;  %v2373_v52 = vsel %vm7017_vm14, %v2372_v16, %v2368_v36  ;;  %v7626_v0 = vld [vmem:[#allocation41_spill] sm:$0xff]  ;;  %3576 = vmatpush.bf16.msrb.mxu0 %v4517_v33 }
 0x34c   : > { %v4134_v28 = vclamps-f32 %v2054_v34, 1.0  ;;  %v2562_v59 = vsub.f32 1.0, %v2561_v22  ;;  %v2073_v46 = vadd.f32 0.014752088, %v2072_v17  ;;  %v2374_v47 = vmul.f32 %v2373_v52, %v6683_v32  ;;  %v4525_v34 = vld [vmem:[%s5193_s16 + $0x148] sm:$0xff] }
 0x34d   : > { %v4728_v25 = vpop.eup %4727  ;;  %vm2605_vm2 = vweird.f32 %v7010_v45  ;;  %4729 = vrcp.f32 %v7039_v9  ;;  %v2390_v42 = vmul.f32 3.8918573e-05, %v6619_v31  ;;  %vm2566_vm3 = vweird.f32 %v4726_v4  ;;  %v4533_v22 = vld [vmem:[%s5193_s16 + $0x188] sm:$0xff]  ;;  %3599 = vmatpush.bf16.msrb.mxu1 %v4525_v34 }
 0x34e   : > { %v2876_v12 = vadd.f32 1.0, %v4134_v28  ;;  %v2563_v30 = vmul.f32 %v4726_v4, %v2562_v59  ;;  %v2601_v18 = vmul.f32 %v4728_v25, %v7010_v45  ;;  %v4142_v60 = vclamps-f32 %v2374_v47, 1.0  ;;  %vm2567_vm5 = vmor %vm2565_vm15, %vm2566_vm3  ;;  %v4541_v52 = vld [vmem:[%s5193_s16 + $0x1c8] sm:$0xff]  ;;  %3622 = vmatpush.bf16.msrb.mxu2 %v4533_v22 }
 0x34f   : > { %vm7048_vm4 = vcmp.eq.f32.partialorder %v2609_v62, 8.507059e+37  ;;  %v2612_v57 = vor.u32 1.1754944e-38, %v2611_v24  ;;  %v2676_v32 = vmul.f32 %v2675_v51, %v7569_v2  ;;  %v2649_v48 = vand.u32 2147483647, %v7039_v9  ;;  %v7627_v24 = vld [vmem:[#allocation46_spill] sm:$0xff]  ;;  %3645 = vmatpush.bf16.msrb.mxu3 %v4541_v52 }
 0x350   : > { %v2564_v1 = vadd.f32 %v4726_v4, %v2563_v30  ;;  %v2602_v26 = vsub.f32 1.0, %v2601_v18  ;;  %v2074_v35 = vmul.f32 %v2073_v46, %v6515_v44  ;;  %v2884_v38 = vadd.f32 1.0, %v4142_v60  ;;  %v4524_v30 = vld [vmem:[%s5193_s16 + $0x140] sm:$0xff] }
 0x351   : > { %vm2606_vm6 = vweird.f32 %v4728_v25  ;;  %v2677_v16 = vadd.f32 0.4994258, %v2676_v32  ;;  %v2391_v15 = vadd.f32 0.001143296, %v2390_v42  ;;  %v2916_v54 = vmul.f32 %v2876_v12, %v7626_v0  ;;  %v4516_v12 = vld [vmem:[%s5193_s16 + $0x100] sm:$0xff]  ;;  %3600 = vmatpush.bf16.msrb.mxu1 %v4524_v30 }
 0x352   : > { %v2568_v20 = vsel %vm2567_vm5, %v4726_v4, %v2564_v1  ;;  %v2603_v17 = vmul.f32 %v4728_v25, %v2602_v26  ;;  %v2075_v62 = vadd.f32 0.112945676, %v2074_v35  ;;  %v2924_v51 = vmul.f32 %v2884_v38, %v7627_v24  ;;  %vm2607_vm7 = vmor %vm2605_vm2, %vm2606_vm6  ;;  %3577 = vmatpush.bf16.msrb.mxu0 %v4516_v12 }
 0x353   : > { %v4730_v36 = vpop.eup %4729  ;;  %v2573_v58 = vsel %vm7033_vm1, %v2572_v10, %v2568_v20  ;;  %v2678_v28 = vmul.f32 %v2677_v16, %v7569_v2  ;;  %v2392_v4 = vmul.f32 %v2391_v15, %v6619_v31  ;;  %v2651_v42 = vand.u32 2147483648, %v7039_v9  ;;  %v4532_v10 = vld [vmem:[%s5193_s16 + $0x180] sm:$0xff] }
 0x354   : > { %v2574_v59 = vmul.f32 %v2573_v58, %v6691_v21  ;;  %v2604_v46 = vadd.f32 %v4728_v25, %v2603_v17  ;;  %v2641_v47 = vmul.f32 %v4730_v36, %v7039_v9  ;;  %v2948_v5 = vpack.c.bf16 %v2924_v51, %v2916_v54  ;;  %v4540_v21 = vld [vmem:[%s5193_s16 + $0x1c0] sm:$0xff]  ;;  %3623 = vmatpush.bf16.msrb.mxu2 %v4532_v10  ;;  %v7630_v54 = vld [vmem:[#allocation26_spill] sm:$0xff] }
 0x355   : > { %v7075_v2 = vadd.f32 1.0, %v2678_v28  ;;  %v2076_v18 = vmul.f32 %v2075_v62, %v6515_v44  ;;  %v2393_v60 = vadd.f32 0.014752088, %v2392_v4  ;;  %v2110_v35 = vmul.f32 3.8918573e-05, %v6551_v14  ;;  %3646 = vmatpush.bf16.msrb.mxu3 %v4540_v21 }
 0x356   : > { %v4147_v32 = vclamps-f32 %v2574_v59, 1.0  ;;  %v2608_v1 = vsel %vm2607_vm7, %v4728_v25, %v2604_v46  ;;  %v2642_v26 = vsub.f32 1.0, %v2641_v47  ;;  %v7082_v38 = vadd.f32 0.00028619796, %v6977_v13  ;;  %3560 = vmatmul.bf16.gmra.mxu3 %v2948_v5  ;;  %v7631_v47 = vld [vmem:[#allocation49_spill] sm:$0xff] }
 0x357   : > { %v2613_v45 = vsel %vm7048_vm4, %v2612_v57, %v2608_v1  ;;  %vm2645_vm8 = vweird.f32 %v7039_v9  ;;  %4731 = vrcp.f32 %v7075_v2  ;;  %vm2646_vm9 = vweird.f32 %v4730_v36 }
 0x358   : > { %v2889_v16 = vadd.f32 1.0, %v4147_v32  ;;  %v2614_v15 = vmul.f32 %v2613_v45, %v6694_v23  ;;  %v2643_v0 = vmul.f32 %v4730_v36, %v2642_v26  ;;  %vm7089_vm10 = vcmp.eq.f32.partialorder %v2649_v48, 8.507059e+37  ;;  %vm2647_vm11 = vmor %vm2645_vm8, %vm2646_vm9 }
 0x359   : > { %v2077_v13 = vadd.f32 0.4994258, %v2076_v18  ;;  %v2394_v29 = vmul.f32 %v2393_v60, %v6619_v31  ;;  %v2111_v57 = vadd.f32 0.001143296, %v2110_v35  ;;  %v2652_v34 = vor.u32 1.1754944e-38, %v2651_v42 }
 0x35a   : > { %v2929_v20 = vmul.f32 %v2889_v16, %v7630_v54  ;;  %v4148_v17 = vclamps-f32 %v2614_v15, 1.0  ;;  %v2644_v33 = vadd.f32 %v4730_v36, %v2643_v0  ;;  %v2691_v23 = vand.u32 2147483648, %v7075_v2  ;;  %v7632_v0 = vld [vmem:[#allocation53_spill] sm:$0xff] }
 0x35b   : > { %v2078_v48 = vmul.f32 %v2077_v13, %v6515_v44  ;;  %v2395_v22 = vadd.f32 0.112945676, %v2394_v29  ;;  %v2112_v62 = vmul.f32 %v2111_v57, %v6551_v14  ;;  %v2430_v28 = vmul.f32 3.8918573e-05, %v6631_v61  ;;  %v7633_v13 = vld [vmem:[#allocation60_spill] sm:$0xff]  ;;  %v7634_v57 = vld [vmem:[#allocation50_spill] sm:$0xff] }
 0x35c   : > { %v2953_v24 = vpack.c.bf16 %v2929_v20, %v2929_v20  ;;  %v2890_v51 = vadd.f32 1.0, %v4148_v17  ;;  %v2648_v58 = vsel %vm2647_vm11, %v4730_v36, %v2644_v33  ;;  %v2150_v36 = vmul.f32 3.8918573e-05, %v6570_v56 }
 0x35d   : > { %v4732_v52 = vpop.eup %4731  ;;  %v2653_v4 = vsel %vm7089_vm10, %v2652_v34, %v2648_v58  ;;  %v7103_v59 = vadd.f32 1.0, %v2078_v48  ;;  %v2396_v9 = vmul.f32 %v2395_v22, %v6619_v31  ;;  %v2113_v46 = vadd.f32 0.014752088, %v2112_v62 }
 0x35e   : > { %3496 = vmatmul.bf16.gmra.mxu0 %v2953_v24  ;;  %v2930_v44 = vmul.f32 %v2890_v51, %v7631_v47  ;;  %v2654_v42 = vmul.f32 %v2653_v4, %v6698_v49  ;;  %v2681_v12 = vmul.f32 %v4732_v52, %v7075_v2  ;;  %v7111_v30 = vadd.f32 0.00028619796, %v6982_v43 }
 0x35f   : > { %vm2685_vm12 = vweird.f32 %v7075_v2  ;;  %v2689_v5 = vand.u32 2147483647, %v7075_v2  ;;  %4733 = vrcp.f32 %v7103_v59  ;;  %v2397_v60 = vadd.f32 0.4994258, %v2396_v9  ;;  %v7635_v2 = vld [vmem:[#allocation22_spill] sm:$0xff] }
 0x360   : > { %v2954_v10 = vpack.c.bf16 %v2930_v44, %v2930_v44  ;;  %v4149_v21 = vclamps-f32 %v2654_v42, 1.0  ;;  %v2682_v18 = vsub.f32 1.0, %v2681_v12  ;;  %vm2686_vm13 = vweird.f32 %v4732_v52 }
 0x361   : > { %v2692_v32 = vor.u32 1.1754944e-38, %v2691_v23  ;;  %v2114_v49 = vmul.f32 %v2113_v46, %v6551_v14  ;;  %v2431_v1 = vadd.f32 0.001143296, %v2430_v28  ;;  %v2398_v43 = vmul.f32 %v2397_v60, %v6619_v31  ;;  %vm2687_vm14 = vmor %vm2685_vm12, %vm2686_vm13 }
 0x362   : > { %3519 = vmatmul.bf16.gmra.mxu1 %v2954_v10  ;;  %v2891_v26 = vadd.f32 1.0, %v4149_v21  ;;  %v2683_v35 = vmul.f32 %v4732_v52, %v2682_v18  ;;  %v2151_v45 = vadd.f32 0.001143296, %v2150_v36  ;;  %v2470_v25 = vmul.f32 3.8918573e-05, %v7632_v0 }
 0x363   : > { %v2115_v16 = vadd.f32 0.112945676, %v2114_v49  ;;  %v2432_v15 = vmul.f32 %v2431_v1, %v6631_v61  ;;  %v2190_v29 = vmul.f32 3.8918573e-05, %v7633_v13  ;;  %v2089_v17 = vand.u32 2147483647, %v7103_v59 }
 0x364   : > { %v2931_v54 = vmul.f32 %v2891_v26, %v7634_v57  ;;  %v2684_v20 = vadd.f32 %v4732_v52, %v2683_v35  ;;  %v7123_v33 = vadd.f32 1.0, %v2398_v43  ;;  %v2152_v48 = vmul.f32 %v2151_v45, %v6570_v56  ;;  %v7639_v57 = vld [vmem:[#allocation56_spill] sm:$0xff] }
 0x365   : > { %v4734_v34 = vpop.eup %4733  ;;  %v2116_v31 = vmul.f32 %v2115_v16, %v6551_v14  ;;  %v2433_v23 = vadd.f32 0.014752088, %v2432_v15  ;;  %v2471_v22 = vadd.f32 0.001143296, %v2470_v25  ;;  %vm2690_vm15 = vcmp.eq.f32.partialorder %v2689_v5, 8.507059e+37  ;;  %v7638_v25 = vld [vmem:[#allocation51_spill] sm:$0xff] }
 0x366   : > { %v2955_v62 = vpack.c.bf16 %v2931_v54, %v2931_v54  ;;  %v2688_v24 = vsel %vm2687_vm14, %v4732_v52, %v2684_v20  ;;  %v2081_v51 = vmul.f32 %v4734_v34, %v7103_v59  ;;  %vm2085_vm0 = vweird.f32 %v7103_v59  ;;  %v7640_v54 = vld [vmem:[#allocation55_spill] sm:$0xff] }
 0x367   : > { %v2693_v58 = vsel %vm2690_vm15, %v2692_v32, %v2688_v24  ;;  %4735 = vrcp.f32 %v7123_v33  ;;  %v2191_v28 = vadd.f32 0.001143296, %v2190_v29  ;;  %v2091_v46 = vand.u32 2147483648, %v7103_v59  ;;  %v7642_v24 = vld [vmem:[#allocation24_spill] sm:$0xff] }
 0x368   : > { %3542 = vmatmul.bf16.gmra.mxu2 %v2955_v62  ;;  %v2694_v4 = vmul.f32 %v2693_v58, %v7635_v2  ;;  %v2082_v9 = vsub.f32 1.0, %v2081_v51  ;;  %v2117_v47 = vadd.f32 0.4994258, %v2116_v31  ;;  %vm7135_vm1 = vcmp.eq.f32.partialorder %v2089_v17, 8.507059e+37 }
 0x369   : > { %v2434_v52 = vmul.f32 %v2433_v23, %v6631_v61  ;;  %v2153_v42 = vadd.f32 0.014752088, %v2152_v48  ;;  %v2472_v12 = vmul.f32 %v2471_v22, %v7632_v0  ;;  %vm2086_vm2 = vweird.f32 %v4734_v34 }
 0x36a   : > { %v4150_v36 = vclamps-f32 %v2694_v4, 1.0  ;;  %v2083_v5 = vmul.f32 %v4734_v34, %v2082_v9  ;;  %v2118_v10 = vmul.f32 %v2117_v47, %v6551_v14  ;;  %v2192_v32 = vmul.f32 %v2191_v28, %v7633_v13  ;;  %vm2087_vm3 = vmor %vm2085_vm0, %vm2086_vm2  ;;  %v7643_v4 = vld [vmem:[#allocation59_spill] sm:$0xff]  ;;  %v7644_v9 = vld [vmem:[#allocation58_spill] sm:$0xff] }
 0x36b   : > { %v2435_v21 = vadd.f32 0.112945676, %v2434_v52  ;;  %v2154_v18 = vmul.f32 %v2153_v42, %v6570_v56  ;;  %v2473_v60 = vadd.f32 0.014752088, %v2472_v12  ;;  %v2092_v26 = vor.u32 1.1754944e-38, %v2091_v46 }
 0x36c   : > { %v2892_v49 = vadd.f32 1.0, %v4150_v36  ;;  %v2084_v1 = vadd.f32 %v4734_v34, %v2083_v5  ;;  %v7144_v35 = vadd.f32 1.0, %v2118_v10  ;;  %v2411_v45 = vand.u32 2147483648, %v7123_v33 }
 0x36d   : > { %v4736_v43 = vpop.eup %4735  ;;  %v2436_v16 = vmul.f32 %v2435_v21, %v6631_v61  ;;  %v2155_v14 = vadd.f32 0.112945676, %v2154_v18  ;;  %v2474_v15 = vmul.f32 %v2473_v60, %v7632_v0  ;;  %v7641_v20 = vpack.c.bf16 %v7639_v57, %v7640_v54 }
 0x36e   : > { %v2932_v29 = vmul.f32 %v2892_v49, %v7638_v25  ;;  %v2088_v17 = vsel %vm2087_vm3, %v4734_v34, %v2084_v1  ;;  %v2401_v31 = vmul.f32 %v4736_v43, %v7123_v33  ;;  %v2193_v23 = vadd.f32 0.014752088, %v2192_v32  ;;  %v7646_v25 = vld [vmem:[#allocation62_spill] sm:$0xff] }
 0x36f   : > { %3578 = vmatmul.bf16.vlgmr.msrb.gmra.mxu0 %v7641_v20  ;;  %v7158_v59 = vmul.f32 %v7082_v38, %v6927_v27  ;;  %v2093_v48 = vsel %vm7135_vm1, %v2092_v26, %v2088_v17  ;;  %4737 = vrcp.f32 %v7144_v35  ;;  %v2510_v22 = vmul.f32 3.8918573e-05, %v6731_v37 }
 0x370   : > { %v2956_v62 = vpack.c.bf16 %v2932_v29, %v2932_v29  ;;  %v2094_v51 = vmul.f32 %v2093_v48, %v7642_v24  ;;  %v2402_v58 = vsub.f32 1.0, %v2401_v31  ;;  %vm2405_vm4 = vweird.f32 %v7123_v33 }
 0x371   : > { %v2409_v34 = vand.u32 2147483647, %v7123_v33  ;;  %v2437_v28 = vadd.f32 0.4994258, %v2436_v16  ;;  %v2156_v2 = vmul.f32 %v2155_v14, %v6570_v56  ;;  %v2475_v38 = vadd.f32 0.112945676, %v2474_v15 }
 0x372   : > { %3565 = vmatmul.bf16.gmra.mxu3 %v2956_v62  ;;  %v7645_v46 = vpack.c.bf16 %v7643_v4, %v7644_v9  ;;  %v2403_v47 = vmul.f32 %v4736_v43, %v2402_v58  ;;  %vm2406_vm5 = vweird.f32 %v4736_v43  ;;  %v2412_v44 = vor.u32 1.1754944e-38, %v2411_v45 }
 0x373   : > { %v2194_v52 = vmul.f32 %v2193_v23, %v7633_v13  ;;  %v2438_v42 = vmul.f32 %v2437_v28, %v6631_v61  ;;  %v2157_v12 = vadd.f32 0.4994258, %v2156_v2  ;;  %v2476_v36 = vmul.f32 %v2475_v38, %v7632_v0  ;;  %vm2407_vm6 = vmor %vm2405_vm4, %vm2406_vm5  ;;  %v7651_v38 = vld [vmem:[#allocation34_spill] sm:$0xff] }
 0x374   : > { %3601 = vmatmul.bf16.vlgmr.msrb.gmra.mxu1 %v7645_v46  ;;  %v2511_v5 = vadd.f32 0.001143296, %v2510_v22  ;;  %v4135_v10 = vclamps-f32 %v2094_v51, 1.0  ;;  %v2404_v21 = vadd.f32 %v4736_v43, %v2403_v47  ;;  %v2129_v18 = vand.u32 2147483647, %v7144_v35  ;;  %v7652_v47 = vld [vmem:[#allocation30_spill] sm:$0xff] }
 0x375   : > { %v2195_v60 = vadd.f32 0.112945676, %v2194_v52  ;;  %v4738_v32 = vpop.eup %4737  ;;  %v7177_v49 = vadd.f32 1.0, %v2438_v42  ;;  %v2158_v1 = vmul.f32 %v2157_v12, %v6570_v56  ;;  %v2477_v26 = vadd.f32 0.4994258, %v2476_v36  ;;  %v7647_v56 = vld [vmem:[#allocation61_spill] sm:$0xff] }
 0x376   : > { %v2512_v61 = vmul.f32 %v2511_v5, %v6731_v37  ;;  %v7183_v45 = vmul.f32 %v7111_v30, %v6960_v55  ;;  %v2408_v16 = vsel %vm2407_vm6, %v4736_v43, %v2404_v21  ;;  %vm2410_vm7 = vcmp.eq.f32.partialorder %v2409_v34, 8.507059e+37 }
 0x377   : > { %v2121_v14 = vmul.f32 %v4738_v32, %v7144_v35  ;;  %v2413_v15 = vsel %vm2410_vm7, %v2412_v44, %v2408_v16  ;;  %vm2125_vm8 = vweird.f32 %v7144_v35  ;;  %v2131_v33 = vand.u32 2147483648, %v7144_v35 }
 0x378   : > { %4739 = vrcp.f32 %v7177_v49  ;;  %v7648_v29 = vpack.c.bf16 %v7646_v25, %v7647_v56  ;;  %v2414_v57 = vmul.f32 %v2413_v15, %v6888_v11  ;;  %vm7193_vm9 = vcmp.eq.f32.partialorder %v2129_v18, 8.507059e+37  ;;  %v7659_v15 = vld [vmem:[#allocation63_spill] sm:$0xff] }
 0x379   : > { %v2122_v54 = vsub.f32 1.0, %v2121_v14  ;;  %v7197_v43 = vadd.f32 1.0, %v2158_v1  ;;  %v2877_v20 = vadd.f32 1.0, %v4135_v10  ;;  %v2478_v17 = vmul.f32 %v2477_v26, %v7632_v0  ;;  %v7655_v1 = vld [vmem:[#allocation25_spill] sm:$0xff]  ;;  %v7658_v14 = vld [vmem:[#allocation64_spill] sm:$0xff] }
 0x37a   : > { %3624 = vmatmul.bf16.vlgmr.msrb.gmra.mxu2 %v7648_v29  ;;  %v2196_v31 = vmul.f32 %v2195_v60, %v7633_v13  ;;  %v2513_v23 = vadd.f32 0.014752088, %v2512_v61  ;;  %v4143_v48 = vclamps-f32 %v2414_v57, 1.0  ;;  %vm2126_vm10 = vweird.f32 %v4738_v32 }
 0x37b   : > { %v2123_v22 = vmul.f32 %v4738_v32, %v2122_v54  ;;  %4741 = vrcp.f32 %v7197_v43  ;;  %v2132_v62 = vor.u32 1.1754944e-38, %v2131_v33  ;;  %v2449_v11 = vand.u32 2147483647, %v7177_v49  ;;  %vm2127_vm11 = vmor %vm2125_vm8, %vm2126_vm10 }
 0x37c   : > { %v2451_v24 = vand.u32 2147483648, %v7177_v49  ;;  %v7204_v51 = vadd.f32 1.0, %v2478_v17  ;;  %v2885_v58 = vadd.f32 1.0, %v4143_v48  ;;  %v2197_v28 = vadd.f32 0.4994258, %v2196_v31 }
 0x37d   : > { %v2124_v34 = vadd.f32 %v4738_v32, %v2123_v22  ;;  %v2514_v0 = vmul.f32 %v2513_v23, %v6731_v37  ;;  %v2917_v4 = vmul.f32 %v2877_v20, %v7651_v38  ;;  %v2169_v9 = vand.u32 2147483647, %v7197_v43 }
 0x37e   : > { %v4740_v2 = vpop.eup %4739  ;;  %4743 = vrcp.f32 %v7204_v51  ;;  %v2710_v46 = vmul.f32 3.8918573e-05, %v6739_v19  ;;  %v2925_v44 = vmul.f32 %v2885_v58, %v7652_v47  ;;  %vm2445_vm12 = vweird.f32 %v7177_v49 }
 0x37f   : > { %v2128_v52 = vsel %vm2127_vm11, %v4738_v32, %v2124_v34  ;;  %v2441_v42 = vmul.f32 %v4740_v2, %v7177_v49  ;;  %vm7218_vm13 = vcmp.eq.f32.partialorder %v2449_v11, 8.507059e+37  ;;  %v2171_v35 = vand.u32 2147483648, %v7197_v43 }
 0x380   : > { %v2133_v12 = vsel %vm7193_vm9, %v2132_v62, %v2128_v52  ;;  %v2198_v5 = vmul.f32 %v2197_v28, %v7633_v13  ;;  %v2949_v21 = vpack.c.bf16 %v2925_v44, %v2917_v4  ;;  %v2452_v60 = vor.u32 1.1754944e-38, %v2451_v24 }
 0x381   : > { %v4742_v10 = vpop.eup %4741  ;;  %v2442_v18 = vsub.f32 1.0, %v2441_v42  ;;  %v2515_v32 = vadd.f32 0.112945676, %v2514_v0  ;;  %v2134_v26 = vmul.f32 %v2133_v12, %v7655_v1  ;;  %vm2165_vm14 = vweird.f32 %v7197_v43  ;;  %v7664_v1 = vld [vmem:[#allocation36_spill] sm:$0xff] }
 0x382   : > { %v2161_v61 = vmul.f32 %v4742_v10, %v7197_v43  ;;  %vm7227_vm15 = vcmp.eq.f32.partialorder %v2169_v9, 8.507059e+37  ;;  %v7660_v33 = vpack.c.bf16 %v7658_v14, %v7659_v15  ;;  %3583 = vmatmul.bf16.gmra.mxu0 %v2949_v21  ;;  %vm2446_vm0 = vweird.f32 %v4740_v2 }
 0x383   : > { %v2443_v13 = vmul.f32 %v4740_v2, %v2442_v18  ;;  %v2489_v25 = vand.u32 2147483647, %v7204_v51  ;;  %v7235_v56 = vadd.f32 1.0, %v2198_v5  ;;  %v2172_v54 = vor.u32 1.1754944e-38, %v2171_v35  ;;  %vm2447_vm2 = vmor %vm2445_vm12, %vm2446_vm0  ;;  %v7663_v35 = vld [vmem:[#allocation66_spill] sm:$0xff] }
 0x384   : > { %3647 = vmatmul.bf16.vlgmr.msrb.gmra.mxu3 %v7660_v33  ;;  %v4744_v29 = vpop.eup %4743  ;;  %v2162_v57 = vsub.f32 1.0, %v2161_v61  ;;  %v2491_v30 = vand.u32 2147483648, %v7204_v51  ;;  %v2516_v20 = vmul.f32 %v2515_v32, %v6731_v37  ;;  %vm2166_vm1 = vweird.f32 %v4742_v10 }
 0x385   : > { %v2444_v17 = vadd.f32 %v4740_v2, %v2443_v13  ;;  %v2481_v31 = vmul.f32 %v4744_v29, %v7204_v51  ;;  %v2711_v23 = vadd.f32 0.001143296, %v2710_v46  ;;  %v4136_v48 = vclamps-f32 %v2134_v26, 1.0  ;;  %vm2167_vm5 = vmor %vm2165_vm14, %vm2166_vm1 }
 0x386   : > { %v2163_v22 = vmul.f32 %v4742_v10, %v2162_v57  ;;  %4745 = vrcp.f32 %v7235_v56  ;;  %v2750_v62 = vmul.f32 3.8918573e-05, %v6761_v7  ;;  %vm2485_vm3 = vweird.f32 %v7204_v51  ;;  %v7665_v51 = vld [vmem:[#allocation32_spill] sm:$0xff] }
 0x387   : > { %v2448_v11 = vsel %vm2447_vm2, %v4740_v2, %v2444_v17  ;;  %v2482_v24 = vsub.f32 1.0, %v2481_v31  ;;  %vm7245_vm4 = vcmp.eq.f32.partialorder %v2489_v25, 8.507059e+37  ;;  %v2492_v0 = vor.u32 1.1754944e-38, %v2491_v30 }
 0x388   : > { %v2453_v34 = vsel %vm7218_vm13, %v2452_v60, %v2448_v11  ;;  %v2164_v28 = vadd.f32 %v4742_v10, %v2163_v22  ;;  %v2517_v49 = vadd.f32 0.4994258, %v2516_v20  ;;  %vm2486_vm6 = vweird.f32 %v4744_v29 }
 0x389   : > { %v2454_v38 = vmul.f32 %v2453_v34, %v6892_v39  ;;  %v2483_v2 = vmul.f32 %v4744_v29, %v2482_v24  ;;  %v2712_v4 = vmul.f32 %v2711_v23, %v6739_v19  ;;  %v2878_v9 = vadd.f32 1.0, %v4136_v48  ;;  %vm2487_vm7 = vmor %vm2485_vm3, %vm2486_vm6 }
 0x38a   : > { %v2168_v46 = vsel %vm2167_vm5, %v4742_v10, %v2164_v28  ;;  %v2518_v47 = vmul.f32 %v2517_v49, %v6731_v37  ;;  %v2751_v44 = vadd.f32 0.001143296, %v2750_v62  ;;  %v2790_v39 = vmul.f32 3.8918573e-05, %v6927_v27  ;;  %v7666_v28 = vld [vmem:[#allocation47_spill] sm:$0xff] }
 0x38b   : > { %v4144_v52 = vclamps-f32 %v2454_v38, 1.0  ;;  %v2173_v42 = vsel %vm7227_vm15, %v2172_v54, %v2168_v46  ;;  %v2484_v12 = vadd.f32 %v4744_v29, %v2483_v2  ;;  %v2713_v21 = vadd.f32 0.014752088, %v2712_v4 }
 0x38c   : > { %v4746_v36 = vpop.eup %4745  ;;  %v2174_v43 = vmul.f32 %v2173_v42, %v7663_v35  ;;  %v7263_v5 = vadd.f32 1.0, %v2518_v47  ;;  %v2752_v10 = vmul.f32 %v2751_v44, %v6761_v7  ;;  %v2209_v32 = vand.u32 2147483647, %v7235_v56 }
 0x38d   : > { %v2886_v37 = vadd.f32 1.0, %v4144_v52  ;;  %v2488_v18 = vsel %vm2487_vm7, %v4744_v29, %v2484_v12  ;;  %v2201_v60 = vmul.f32 %v4746_v36, %v7235_v56  ;;  %v2918_v26 = vmul.f32 %v2878_v9, %v7664_v1 }
 0x38e   : > { %v4137_v61 = vclamps-f32 %v2174_v43, 1.0  ;;  %v2493_v16 = vsel %vm7245_vm4, %v2492_v0, %v2488_v18  ;;  %4747 = vrcp.f32 %v7263_v5  ;;  %v2791_v13 = vadd.f32 0.001143296, %v2790_v39  ;;  %v7667_v0 = vld [vmem:[#allocation65_spill] sm:$0xff] }
 0x38f   : > { %v2926_v14 = vmul.f32 %v2886_v37, %v7665_v51  ;;  %v2494_v15 = vmul.f32 %v2493_v16, %v6905_v63  ;;  %v2202_v33 = vsub.f32 1.0, %v2201_v60  ;;  %vm2206_vm8 = vweird.f32 %v4746_v36 }
 0x390   : > { %v2211_v25 = vand.u32 2147483648, %v7235_v56  ;;  %v2714_v29 = vmul.f32 %v2713_v21, %v6739_v19  ;;  %v2753_v57 = vadd.f32 0.014752088, %v2752_v10  ;;  %v2879_v20 = vadd.f32 1.0, %v4137_v61  ;;  %v7669_v61 = vld [vmem:[#allocation54_spill] sm:$0xff] }
 0x391   : > { %v2950_v54 = vpack.c.bf16 %v2926_v14, %v2918_v26  ;;  %v4145_v30 = vclamps-f32 %v2494_v15, 1.0  ;;  %v2203_v17 = vmul.f32 %v4746_v36, %v2202_v33  ;;  %v2782_v31 = vadd.f32 0.0036580483, %v7158_v59 }
 0x392   : > { %vm2205_vm9 = vweird.f32 %v7235_v56  ;;  %v2715_v23 = vadd.f32 0.112945676, %v2714_v29  ;;  %v2754_v48 = vmul.f32 %v2753_v57, %v6761_v7  ;;  %v2792_v62 = vmul.f32 %v2791_v13, %v6927_v27 }
 0x393   : > { %3606 = vmatmul.bf16.gmra.mxu1 %v2950_v54  ;;  %v2887_v63 = vadd.f32 1.0, %v4145_v30  ;;  %v2204_v22 = vadd.f32 %v4746_v36, %v2203_v17  ;;  %v2830_v11 = vmul.f32 3.8918573e-05, %v6960_v55  ;;  %vm2207_vm10 = vmor %vm2205_vm9, %vm2206_vm8  ;;  %vm2210_vm11 = vcmp.eq.f32.partialorder %v2209_v32, 8.507059e+37 }
 0x394   : > { %v4748_v24 = vpop.eup %4747  ;;  %v2212_v58 = vor.u32 1.1754944e-38, %v2211_v25  ;;  %v2716_v34 = vmul.f32 %v2715_v23, %v6739_v19  ;;  %v2755_v59 = vadd.f32 0.112945676, %v2754_v48  ;;  %v2919_v56 = vmul.f32 %v2879_v20, %v7666_v28 }
 0x395   : > { %v2927_v49 = vmul.f32 %v2887_v63, %v7667_v0  ;;  %v2208_v38 = vsel %vm2207_vm10, %v4746_v36, %v2204_v22  ;;  %v2521_v2 = vmul.f32 %v4748_v24, %v7263_v5  ;;  %v2793_v47 = vadd.f32 0.014752088, %v2792_v62  ;;  %v7668_v36 = vld [vmem:[#allocation67_spill] sm:$0xff] }
 0x396   : > { %v2213_v4 = vsel %vm2210_vm11, %v2212_v58, %v2208_v38  ;;  %v2717_v9 = vadd.f32 0.4994258, %v2716_v34  ;;  %v2756_v46 = vmul.f32 %v2755_v59, %v6761_v7  ;;  %v2529_v42 = vand.u32 2147483647, %v7263_v5  ;;  %v7670_v58 = vld [vmem:[#allocation57_spill] sm:$0xff]  ;;  %v7671_v59 = vld [vmem:[#allocation31_spill] sm:$0xff] }
 0x397   : > { %v2951_v44 = vpack.c.bf16 %v2927_v49, %v2919_v56  ;;  %v2522_v52 = vsub.f32 1.0, %v2521_v2  ;;  %v2831_v12 = vadd.f32 0.001143296, %v2830_v11  ;;  %v2531_v39 = vand.u32 2147483648, %v7263_v5 }
 0x398   : > { %v2718_v35 = vmul.f32 %v2717_v9, %v6739_v19  ;;  %v2757_v43 = vadd.f32 0.4994258, %v2756_v46  ;;  %v2794_v21 = vmul.f32 %v2793_v47, %v6927_v27  ;;  %v2214_v10 = vmul.f32 %v2213_v4, %v7668_v36 }
 0x399   : > { %3629 = vmatmul.bf16.gmra.mxu2 %v2951_v44  ;;  %v2523_v37 = vmul.f32 %v4748_v24, %v2522_v52  ;;  %vm2526_vm12 = vweird.f32 %v4748_v24  ;;  %v2832_v18 = vmul.f32 %v2831_v12, %v6960_v55  ;;  %v2783_v60 = vmul.f32 %v2782_v31, %v6927_v27 }
 0x39a   : > { %v7294_v32 = vadd.f32 1.0, %v2718_v35  ;;  %v2758_v1 = vmul.f32 %v2757_v43, %v6761_v7  ;;  %v2795_v26 = vadd.f32 0.112945676, %v2794_v21  ;;  %v2509_v16 = vmul.f32 %v6922_v6, %v7669_v61  ;;  %v7324_v35 = vpop.f32.mrf.mxu0  ;;  %v7326_v43 = vpop.f32.mrf.mxu1 }
 0x39b   : > { %v2524_v51 = vadd.f32 %v4748_v24, %v2523_v37  ;;  %vm2525_vm13 = vweird.f32 %v7263_v5  ;;  %v2833_v14 = vadd.f32 0.014752088, %v2832_v18  ;;  %v2822_v15 = vadd.f32 0.0036580483, %v7183_v45 }
 0x39c   : > { %vm2527_vm14 = vmor %vm2525_vm13, %vm2526_vm12  ;;  %vm2530_vm15 = vcmp.eq.f32.partialorder %v2529_v42, 8.507059e+37  ;;  %v2532_v33 = vor.u32 1.1754944e-38, %v2531_v39  ;;  %4749 = vrcp.f32 %v7294_v32  ;;  %v4138_v13 = vclamps-f32 %v2214_v10, 1.0 }
 0x39d   : > { %v2528_v25 = vsel %vm2527_vm14, %v4748_v24, %v2524_v51  ;;  %v7302_v29 = vadd.f32 1.0, %v2758_v1  ;;  %v2796_v57 = vmul.f32 %v2795_v26, %v6927_v27  ;;  %v2706_v54 = vadd.f32 0.18741608, %v6897_v53  ;;  %v7672_v51 = vld [vmem:[#allocation33_spill] sm:$0xff] }
 0x39e   : > { %v2784_v6 = vadd.f32 0.05243302, %v2783_v60  ;;  %v2533_v30 = vsel %vm2530_vm15, %v2532_v33, %v2528_v25  ;;  %v2834_v5 = vmul.f32 %v2833_v14, %v6960_v55  ;;  %v2746_v45 = vadd.f32 0.18741608, %v6950_v40 }
 0x39f   : > { %v2534_v20 = vmul.f32 %v2533_v30, %v2509_v16  ;;  %4751 = vrcp.f32 %v7302_v29  ;;  %v2823_v17 = vmul.f32 %v2822_v15, %v6960_v55  ;;  %v2797_v31 = vadd.f32 0.4994258, %v2796_v57  ;;  %v7673_v30 = vld [vmem:[#allocation48_spill] sm:$0xff] }
 0x3a0   : > { %v2835_v23 = vadd.f32 0.112945676, %v2834_v5  ;;  %v2880_v63 = vadd.f32 1.0, %v4138_v13  ;;  %v2707_v62 = vmul.f32 %v2706_v54, %v6739_v19  ;;  %v2785_v53 = vmul.f32 %v2784_v6, %v6927_v27 }
 0x3a1   : > { %v4146_v48 = vclamps-f32 %v2534_v20, 1.0  ;;  %v2798_v11 = vmul.f32 %v2797_v31, %v6927_v27  ;;  %v1200_v34 = vmul.f32 0.5, %v7670_v58  ;;  %v1208_v28 = vmul.f32 0.5, %v7671_v59 }
 0x3a2   : > { %v4750_v22 = vpop.eup %4749  ;;  %v2836_v24 = vmul.f32 %v2835_v23, %v6960_v55  ;;  %v2747_v0 = vmul.f32 %v2746_v45, %v6761_v7  ;;  %v2824_v49 = vadd.f32 0.05243302, %v2823_v17  ;;  %v2731_v47 = vand.u32 2147483648, %v7294_v32  ;;  %v7341_v23 = vpop.f32.mrf.mxu0 }
 0x3a3   : > { %v2888_v40 = vadd.f32 1.0, %v4146_v48  ;;  %v2721_v56 = vmul.f32 %v4750_v22, %v7294_v32  ;;  %v7318_v38 = vadd.f32 1.0, %v2798_v11  ;;  %v2920_v4 = vmul.f32 %v2880_v63, %v1200_v34  ;;  %v7343_v48 = vpop.f32.mrf.mxu1 }
 0x3a4   : > { %v2837_v2 = vadd.f32 0.4994258, %v2836_v24  ;;  %v2708_v44 = vadd.f32 1.1283791, %v2707_v62  ;;  %v2786_v52 = vadd.f32 0.18741608, %v2785_v53  ;;  %vm2726_vm0 = vweird.f32 %v4750_v22 }
 0x3a5   : > { %v4752_v19 = vpop.eup %4751  ;;  %v2928_v9 = vmul.f32 %v2888_v40, %v1208_v28  ;;  %v2722_v46 = vsub.f32 1.0, %v2721_v56  ;;  %4753 = vrcp.f32 %v7318_v38  ;;  %v2729_v7 = vand.u32 2147483647, %v7294_v32 }
 0x3a6   : > { %v2761_v42 = vmul.f32 %v4752_v19, %v7302_v29  ;;  %v2748_v21 = vadd.f32 1.1283791, %v2747_v0  ;;  %v2825_v36 = vmul.f32 %v2824_v49, %v6960_v55  ;;  %v2838_v37 = vmul.f32 %v2837_v2, %v6960_v55  ;;  %v7675_v49 = vld [vmem:[#allocation43_spill] sm:$0xff] }
 0x3a7   : > { %v2952_v12 = vpack.c.bf16 %v2928_v9, %v2920_v4  ;;  %v2723_v39 = vmul.f32 %v4750_v22, %v2722_v46  ;;  %vm2725_vm1 = vweird.f32 %v7294_v32  ;;  %v2732_v60 = vor.u32 1.1754944e-38, %v2731_v47 }
 0x3a8   : > { %v2762_v10 = vsub.f32 1.0, %v2761_v42  ;;  %v2771_v1 = vand.u32 2147483648, %v7302_v29  ;;  %vm2727_vm2 = vmor %vm2725_vm1, %vm2726_vm0  ;;  %vm2766_vm3 = vweird.f32 %v4752_v19  ;;  %v2769_v61 = vand.u32 2147483647, %v7302_v29 }
 0x3a9   : > { %3652 = vmatmul.bf16.gmra.mxu3 %v2952_v12  ;;  %v2724_v18 = vadd.f32 %v4750_v22, %v2723_v39  ;;  %v7333_v16 = vadd.f32 1.0, %v2838_v37  ;;  %v2709_v14 = vmul.f32 %v2708_v44, %v7672_v51  ;;  %v2787_v15 = vmul.f32 %v2786_v52, %v6927_v27 }
 0x3aa   : > { %v2763_v26 = vmul.f32 %v4752_v19, %v2762_v10  ;;  %vm2730_vm4 = vcmp.eq.f32.partialorder %v2729_v7, 8.507059e+37  ;;  %vm2765_vm5 = vweird.f32 %v7302_v29  ;;  %v2772_v54 = vor.u32 1.1754944e-38, %v2771_v1  ;;  %v7674_v29 = vld [vmem:[#allocation52_spill] sm:$0xff]  ;;  %v3533_v10 = vpop.f32.mrf.mxu2 }
 0x3ab   : > { %v2728_v33 = vsel %vm2727_vm2, %v4750_v22, %v2724_v18  ;;  %v4754_v13 = vpop.eup %4753  ;;  %4755 = vrcp.f32 %v7333_v16  ;;  %vm2767_vm6 = vmor %vm2765_vm5, %vm2766_vm3  ;;  %v2749_v5 = vmul.f32 %v2748_v21, %v7673_v30  ;;  %v2826_v20 = vadd.f32 0.18741608, %v2825_v36  ;;  %v3492_v21 = vpop.f32.mrf.mxu0 }
 0x3ac   : > { %v2733_v25 = vsel %vm2730_vm4, %v2732_v60, %v2728_v33  ;;  %v2764_v57 = vadd.f32 %v4752_v19, %v2763_v26  ;;  %v2801_v6 = vmul.f32 %v4754_v13, %v7318_v38  ;;  %vm2770_vm7 = vcmp.eq.f32.partialorder %v2769_v61, 8.507059e+37 }
 0x3ad   : > { %v2734_v32 = vmul.f32 %v2733_v25, %v2709_v14  ;;  %v1213_v63 = vmul.f32 0.5, %v7674_v29  ;;  %v2788_v22 = vadd.f32 1.1283791, %v2787_v15  ;;  %v2811_v53 = vand.u32 2147483648, %v7318_v38 }
 0x3ae   : > { %v2768_v45 = vsel %vm2767_vm6, %v4752_v19, %v2764_v57  ;;  %v2802_v31 = vsub.f32 1.0, %v2801_v6  ;;  %vm2806_vm8 = vweird.f32 %v4754_v13  ;;  %v2809_v58 = vand.u32 2147483647, %v7318_v38 }
 0x3af   : > { %v4151_v27 = vclamps-f32 %v2734_v32, 1.0  ;;  %v2773_v17 = vsel %vm2770_vm7, %v2772_v54, %v2768_v45  ;;  %v2827_v59 = vmul.f32 %v2826_v20, %v6960_v55  ;;  %vm2805_vm9 = vweird.f32 %v7318_v38 }
 0x3b0   : > { %v2774_v62 = vmul.f32 %v2773_v17, %v2749_v5  ;;  %v2803_v24 = vmul.f32 %v4754_v13, %v2802_v31  ;;  %v1214_v2 = vmul.f32 0.5, %v7675_v49  ;;  %v2789_v19 = vmul.f32 %v2788_v22, %v6880_v41  ;;  %vm2807_vm10 = vmor %vm2805_vm9, %vm2806_vm8  ;;  %v3515_v41 = vpop.f32.mrf.mxu1 }
 0x3b1   : > { %v2893_v11 = vadd.f32 1.0, %v4151_v27  ;;  %v4756_v34 = vpop.eup %4755  ;;  %v2812_v9 = vor.u32 1.1754944e-38, %v2811_v53  ;;  %vm2810_vm11 = vcmp.eq.f32.partialorder %v2809_v58, 8.507059e+37  ;;  %v2828_v52 = vadd.f32 1.1283791, %v2827_v59  ;;  %v3556_v27 = vpop.f32.mrf.mxu3 }
 0x3b2   : > { %v4152_v28 = vclamps-f32 %v2774_v62, 1.0  ;;  %v2804_v56 = vadd.f32 %v4754_v13, %v2803_v24  ;;  %v2841_v0 = vmul.f32 %v4756_v34, %v7333_v16  ;;  %v2851_v12 = vand.u32 2147483648, %v7333_v16  ;;  %v3535_v30 = vpop.f32.mrf.mxu2 }
 0x3b3   : > { %v2933_v40 = vmul.f32 %v2893_v11, %v1213_v63  ;;  %vm2846_vm12 = vweird.f32 %v4756_v34  ;;  %v2849_v7 = vand.u32 2147483647, %v7333_v16  ;;  %v3516_v37 = vadd.f32 %v3515_v41, %v3492_v21  ;;  %v3494_v32 = vpop.f32.mrf.mxu0 }
 0x3b4   : > { %v2894_v4 = vadd.f32 1.0, %v4152_v28  ;;  %v2808_v47 = vsel %vm2807_vm10, %v4754_v13, %v2804_v56  ;;  %v2842_v44 = vsub.f32 1.0, %v2841_v0  ;;  %vm2845_vm13 = vweird.f32 %v7333_v16 }
 0x3b5   : > { %v2957_v46 = vpack.c.bf16 %v2933_v40, %v2933_v40  ;;  %v2813_v42 = vsel %vm2810_vm11, %v2812_v9, %v2808_v47  ;;  %v1215_v1 = vmul.f32 0.5, %v6870_v8  ;;  %vm2847_vm14 = vmor %vm2845_vm13, %vm2846_vm12  ;;  %v2852_v26 = vor.u32 1.1754944e-38, %v2851_v12 }
 0x3b6   : > { %v2934_v55 = vmul.f32 %v2894_v4, %v1214_v2  ;;  %v2814_v38 = vmul.f32 %v2813_v42, %v2789_v19  ;;  %v2843_v39 = vmul.f32 %v4756_v34, %v2842_v44  ;;  %v2829_v61 = vmul.f32 %v2828_v52, %v6911_v50 }
 0x3b7   : > { %3588 = vmatmul.bf16.gmra.mxu0 %v2957_v46  ;;  %vm2850_vm15 = vcmp.eq.f32.partialorder %v2849_v7, 8.507059e+37  ;;  %v1216_v16 = vmul.f32 0.5, %v6884_v3  ;;  %v3511_v28 = vadd.f32 %v7326_v43, %v7324_v35  ;;  %v3513_v19 = vadd.f32 %v7343_v48, %v7341_v23  ;;  %v2962_v23 = vld [vmem:[#allocation11 + $0x8] sm:$0xff] }
 0x3b8   : > { %v2958_v36 = vpack.c.bf16 %v2934_v55, %v2934_v55  ;;  %v4153_v18 = vclamps-f32 %v2814_v38, 1.0  ;;  %v2844_v60 = vadd.f32 %v4756_v34, %v2843_v39  ;;  %v3517_v54 = vpop.f32.mrf.mxu1  ;;  %v2961_v39 = vld [vmem:[#allocation11] sm:$0xff] }
 0x3b9   : > { %v3518_v6 = vadd.f32 %v3517_v54, %v3494_v32  ;;  %v3558_v29 = vpop.f32.mrf.mxu3  ;;  %v3534_v56 = vadd.f32 %v3533_v10, %v3511_v28  ;;  %v3536_v44 = vadd.f32 %v3535_v30, %v3513_v19 }
 0x3ba   : > { %3611 = vmatmul.bf16.gmra.mxu1 %v2958_v36  ;;  %v2895_v51 = vadd.f32 1.0, %v4153_v18  ;;  %v2848_v14 = vsel %vm2847_vm14, %v4756_v34, %v2844_v60 }
 0x3bb   : > { %v2853_v15 = vsel %vm2850_vm15, %v2852_v26, %v2848_v14  ;;  %v3557_v2 = vadd.f32 %v3556_v27, %v3534_v56  ;;  %v3559_v42 = vadd.f32 %v3558_v29, %v3536_v44 }
 0x3bc   : > { %v2935_v33 = vmul.f32 %v2895_v51, %v1215_v1  ;;  %v2854_v13 = vmul.f32 %v2853_v15, %v2829_v61 }
 0x3be   : > { %v2959_v25 = vpack.c.bf16 %v2935_v33, %v2935_v33  ;;  %v4154_v57 = vclamps-f32 %v2854_v13, 1.0 }
 0x3c0   : > { %3634 = vmatmul.bf16.gmra.mxu2 %v2959_v25  ;;  %v2896_v8 = vadd.f32 1.0, %v4154_v57  ;;  %v2963_v57 = vld [vmem:[#allocation11 + $0x10] sm:$0xff] }
 0x3c2   : > { %v2936_v5 = vmul.f32 %v2896_v8, %v1216_v16 }
 0x3c4   : > { %v2960_v20 = vpack.c.bf16 %v2936_v5, %v2936_v5 }
 0x3c6   : > { %3657 = vmatmul.bf16.gmra.mxu3 %v2960_v20 }
 0x3cb   : > { %v3538_v50 = vpop.f32.mrf.mxu2 }
 0x3cc   : > { %v3539_v45 = vadd.f32 %v3538_v50, %v3516_v37  ;;  %v2964_v50 = vld [vmem:[#allocation11 + $0x18] sm:$0xff] }
 0x3d3   : > { %v3540_v17 = vpop.f32.mrf.mxu2 }
 0x3d4   : > { %v3541_v31 = vadd.f32 %v3540_v17, %v3518_v6 }
 0x3d9   : > { %v3561_v53 = vpop.f32.mrf.mxu3 }
 0x3da   : > { %v3562_v1 = vadd.f32 %v3561_v53, %v3539_v45 }
 0x3db   : > { %v3497_v63 = vpop.f32.mrf.mxu0 }
 0x3df   : > { %v3520_v22 = vpop.f32.mrf.mxu1 }
 0x3e0   : > { %v3521_v62 = vadd.f32 %v3520_v22, %v3497_v63 }
 0x3e1   : > { %v3563_v58 = vpop.f32.mrf.mxu3 }
 0x3e2   : > { %v3564_v33 = vadd.f32 %v3563_v58, %v3541_v31 }
 0x3e3   : > { %v3499_v11 = vpop.f32.mrf.mxu0 }
 0x3e7   : > { %v3522_v24 = vpop.f32.mrf.mxu1 }
 0x3e8   : > { %v2965_v24 = vld [vmem:[#allocation11 + $0x20] sm:$0xff] }
 0x3eb   : > { %v3543_v3 = vpop.f32.mrf.mxu2 }
 0x3ec   : > { %v3544_v34 = vadd.f32 %v3543_v3, %v3521_v62  ;;  %v3579_v49 = vpop.f32.mrf.mxu0 }
 0x3ed   : > { %v3580_v4 = vadd.f32 %v3579_v49, %v3557_v2 }
 0x3f1   : > { %v3602_v9 = vpop.f32.mrf.mxu1 }
 0x3f2   : > { %v3603_v52 = vadd.f32 %v3602_v9, %v3580_v4 }
 0x3f3   : > { %v3545_v59 = vpop.f32.mrf.mxu2 }
 0x3f4   : > { %v3581_v55 = vpop.f32.mrf.mxu0 }
 0x3f5   : > { %v3566_v40 = vpop.f32.mrf.mxu3  ;;  %v3582_v38 = vadd.f32 %v3581_v55, %v3559_v42 }
 0x3f6   : > { %v3567_v0 = vadd.f32 %v3566_v40, %v3544_v34 }
 0x3f9   : > { %v3604_v7 = vpop.f32.mrf.mxu1 }
 0x3fa   : > { %v3605_v41 = vadd.f32 %v3604_v7, %v3582_v38 }
 0x3fd   : > { %v3568_v46 = vpop.f32.mrf.mxu3  ;;  %v3625_v47 = vpop.f32.mrf.mxu2 }
 0x3fe   : > { %v3626_v12 = vadd.f32 %v3625_v47, %v3603_v52 }
 0x3ff   : > { %v3584_v60 = vpop.f32.mrf.mxu0 }
 0x400   : > { %v3585_v26 = vadd.f32 %v3584_v60, %v3562_v1 }
 0x405   : > { %v3627_v21 = vpop.f32.mrf.mxu2 }
 0x406   : > { %v3628_v10 = vadd.f32 %v3627_v21, %v3605_v41 }
 0x407   : > { %v3648_v35 = vpop.f32.mrf.mxu3  ;;  %v3586_v15 = vpop.f32.mrf.mxu0 }
 0x408   : > { %v3649_v43 = vadd.f32 %v3648_v35, %v3626_v12  ;;  %v3587_v25 = vadd.f32 %v3586_v15, %v3564_v33 }
 0x40a   : > { %v3662_v36 = vadd.f32 %v3649_v43, %v2961_v39 }
 0x40c   : > { %3667 = vst [vmem:[#allocation11] sm:$0xff] %v3662_v36 }
 0x40f   : > { %v3650_v48 = vpop.f32.mrf.mxu3 }
 0x410   : > { %v3651_v37 = vadd.f32 %v3650_v48, %v3628_v10  ;;  %v3607_v61 = vpop.f32.mrf.mxu1 }
 0x411   : > { %v3608_v14 = vadd.f32 %v3607_v61, %v3585_v26 }
 0x412   : > { %v3663_v18 = vadd.f32 %v3651_v37, %v2962_v23 }
 0x414   : > { %3668 = vst [vmem:[#allocation11 + $0x8] sm:$0xff] %v3663_v18 }
 0x418   : > { %v3609_v54 = vpop.f32.mrf.mxu1 }
 0x419   : > { %v3610_v8 = vadd.f32 %v3609_v54, %v3587_v25 }
 0x41c   : > { %v3630_v51 = vpop.f32.mrf.mxu2 }
 0x41d   : > { %v3631_v13 = vadd.f32 %v3630_v51, %v3608_v14 }
 0x424   : > { %v3632_v16 = vpop.f32.mrf.mxu2 }
 0x425   : > { %v3633_v5 = vadd.f32 %v3632_v16, %v3610_v8 }
 0x42c   : > { %v3653_v32 = vpop.f32.mrf.mxu3 }
 0x42d   : > { %v3654_v6 = vadd.f32 %v3653_v32, %v3631_v13 }
 0x42f   : > { %v3664_v30 = vadd.f32 %v3654_v6, %v2963_v57 }
 0x431   : > { %3669 = vst [vmem:[#allocation11 + $0x10] sm:$0xff] %v3664_v30 }
 0x434   : > { %v3589_v20 = vpop.f32.mrf.mxu0  ;;  %v3655_v45 = vpop.f32.mrf.mxu3 }
 0x435   : > { %v3656_v27 = vadd.f32 %v3655_v45, %v3633_v5  ;;  %v3590_v22 = vadd.f32 %v3589_v20, %v3567_v0 }
 0x437   : > { %v3612_v17 = vpop.f32.mrf.mxu1  ;;  %v3665_v29 = vadd.f32 %v3656_v27, %v2964_v50 }
 0x438   : > { %v3613_v53 = vadd.f32 %v3612_v17, %v3590_v22 }
 0x439   : > { %3670 = vst [vmem:[#allocation11 + $0x18] sm:$0xff] %v3665_v29 }
 0x43c   : > { %v3591_v63 = vpop.f32.mrf.mxu0 }
 0x43f   : > { %v3614_v31 = vpop.f32.mrf.mxu1 }
 0x443   : > { %v3635_v62 = vpop.f32.mrf.mxu2 }
 0x444   : > { %v3636_v11 = vadd.f32 %v3635_v62, %v3613_v53 }
 0x449   : > { %v3658_v58 = vpop.f32.mrf.mxu3 }
 0x44a   : > { %v3659_v3 = vadd.f32 %v3658_v58, %v3636_v11 }
 0x44b   : > { %v3637_v34 = vpop.f32.mrf.mxu2 }
 0x44c   : > { %v3666_v59 = vadd.f32 %v3659_v3, %v2965_v24 }
 0x44d   : > { %3675 = sbr.rel (%p4411_p2) target bundleno = 1114 (0x45a), region = 76 }
 0x44e   : > { %3671 = vst [vmem:[#allocation11 + $0x20] sm:$0xff] %v3666_v59 }
 0x451   : > { %v3660_v28 = vpop.f32.mrf.mxu3 }
 0x452   : > { %v3676_v40 = vld [vmem:[#allocation11] sm:$0xff]  ;;  %v4758_v56 = vld [vmem:[%s7395_s6] ss:$0 sm:$0xff]  ;;  %v3677_v49 = vld [vmem:[#allocation11 + $0x8] sm:$0xff] }
 0x453   : > { %v3678_v0 = vld [vmem:[#allocation11 + $0x10] sm:$0xff]  ;;  %v3679_v2 = vld [vmem:[#allocation11 + $0x18] sm:$0xff]  ;;  %v3685_v19 = vadd.f32 %v4758_v56, %v3676_v40  ;;  %v3686_v4 = vadd.f32 %v4758_v56, %v3677_v49 }
 0x454   : > { %v3687_v9 = vadd.f32 %v4758_v56, %v3678_v0  ;;  %v3688_v47 = vadd.f32 %v4758_v56, %v3679_v2 }
 0x455   : > { %v3680_v46 = vld [vmem:[#allocation11 + $0x20] sm:$0xff]  ;;  %3690 = vst [vmem:[#allocation11] sm:$0xff] %v3685_v19 }
 0x456   : > { %v3689_v44 = vadd.f32 %v4758_v56, %v3680_v46  ;;  %3691 = vst [vmem:[#allocation11 + $0x8] sm:$0xff] %v3686_v4 }
 0x457   : > { %3692 = vst [vmem:[#allocation11 + $0x10] sm:$0xff] %v3687_v9 }
 0x458   : > { %3693 = vst [vmem:[#allocation11 + $0x18] sm:$0xff] %v3688_v47 }
 0x459   : > { %3694 = vst [vmem:[#allocation11 + $0x20] sm:$0xff] %v3689_v44 }
 0x45a PF: > { %p4599_p3 = scmp.eq.s32.totalorder %s5084_s30, 1  ;;  %s7676_s23 = sld [smem:[#allocation70_spill]] }
 0x45b   : > { %s5012_s11 = smov [#allocation11]   ;;  %s5013_s24 = smov 128  }
 0x45c   : > { %s3703_s3 = sshll.u32 %s5012_s11, 4  ;;  %s5014_s9 = smov 8   ;;  %s3704_s3 = int_to_ptr.vmem [resolvable:$true] %s3703_s3 }
 0x460   : > { %s3705_s18 = sshll.u32 %s7676_s23, 4  ;;  %s3706_s18 = int_to_ptr.hbm [resolvable:$true] %s3705_s18 }
 0x461   : > { %4574 = dma.vmem_to_hbm [thread:$0]  (%p4599_p3), %s3704_s3, 640, %s3706_s18, [#allocation5], %s5013_s24, %s5013_s24, %s5014_s9  }
 0x462   : > { %4974 = dma.done.wait (%p4599_p3), [#allocation5], 640  }
 0x463   : > { %4976 = vsyncadd (%p4599_p3), [#allocation5], 4294966656 }
 0x464 PF: > { %s7677_s8 = sld [smem:[#allocation17_spill]]  ;;  %s7681_s24 = smov %s4983_s25 }
 0x465   : > { %s7678_s26 = sld [smem:[#allocation16_spill]]  ;;  %s7684_s27 = smov %s4995_s28 }
 0x466   : > { %s7679_s30 = sld [smem:[#allocation19_spill]] }
 0x467   : > { %s7680_s19 = sld [smem:[#allocation18_spill]] }
 0x46a   : > { %s20_s29 = sadd.s32 1, %s7677_s8  }
 0x46b   : > { %p17_p4 = scmp.ge.s32.totalorder %s20_s29, 4   ;;  %s7682_s25 = smov %s7678_s26 }
 0x46c   : > { %s7683_s26 = smov %s7679_s30 }
 0x46d   : > { %s7685_s28 = smov %s7680_s19  ;;  %19 = sbr.rel (!%p17_p4) target bundleno = 9 (0x9), region = 124 }
 0x472   :  { %3722 = vsyncpa [#allocation4], 1 }
 0x473   :  { %3724 = vsyncpa [#allocation4 + $0x1], 1 }
 0x474   :  { %3725 = vsyncpa [#allocation7], 1 }
 0x475   :  { %3726 = vsyncpa [#allocation5], 1 }
 0x476   :  { %3728 = vsyncpa [#allocation5 + $0x1], 1 }

</bundles_post_ra>
